<compile_context>
chip_gen: v7x
topology: tpu7x:2x2x1
jax: 0.10.0
libtpu: 0.0.40
codegen_flags: <defaults>
</compile_context>

<pallas_src>
import functools

import jax
import jax.numpy as jnp
from jax.experimental import pallas as pl
from jax.experimental.pallas import tpu as pltpu

BN_EPS = 1e-5          # torch.nn.BatchNorm1d default eps
TILE_N = 256           # destination-node (row) tile
TILE_K = 256           # source-node (reduction) tile
VMEM_LIMIT = 48 * 1024 * 1024
_HI = jax.lax.Precision.HIGHEST


def gin_mlp_kernel(a_ref, x_ref, w1_ref, w2_ref, b_ref,
                   h_ref, stats_ref, acc_ref, *, n_real, one_plus_eps):
    """grid = (row tiles, K tiles).

    Accumulates A_hat @ x (bf16 operands, f32 accumulation) in a VMEM scratch;
    on the last K step applies Linear->ReLU->Linear->ReLU and emits the h tile
    plus masked partial BatchNorm statistics (sum, sum of squares)."""
    i = pl.program_id(0)
    k = pl.program_id(1)

    # k == 0: start the aggregation with the (1 + eps) * x self term (exact f32,
    # sliced from the resident x).
    @pl.when(k == 0)
    def _():
        row0 = pl.multiple_of(i * TILE_N, TILE_N)
        acc_ref[...] = one_plus_eps * x_ref[pl.ds(row0, TILE_N), :]

    # Accumulate this K-slice of A_hat @ x on the native bf16 MXU path.
    col0 = pl.multiple_of(k * TILE_K, TILE_K)
    xk = x_ref[pl.ds(col0, TILE_K), :].astype(jnp.bfloat16)
    acc_ref[...] += jnp.dot(a_ref[...], xk, preferred_element_type=jnp.float32)

    # Last k: MLP -> ReLU, write h tile + masked partial BN statistics.
    @pl.when(k == pl.num_programs(1) - 1)
    def _():
        h = jnp.dot(acc_ref[...], w1_ref[...],
                    preferred_element_type=jnp.float32,
                    precision=_HI) + b_ref[0:1, :]
        h = jnp.maximum(h, 0.0)
        h = jnp.dot(h, w2_ref[...],
                    preferred_element_type=jnp.float32,
                    precision=_HI) + b_ref[1:2, :]
        h = jnp.maximum(h, 0.0)                       # outer F.relu
        h_ref[...] = h

        # Partial BN stats over *real* rows only (padded rows masked out).
        rows = i * TILE_N + jax.lax.broadcasted_iota(jnp.int32, (TILE_N, 1), 0)
        hm = jnp.where(rows < n_real, h, 0.0)
        stats_ref[0, 0:1, :] = jnp.sum(hm, axis=0, keepdims=True)
        stats_ref[0, 1:2, :] = jnp.sum(hm * hm, axis=0, keepdims=True)


def bn_apply_kernel(h_ref, ss_ref, o_ref):
    """grid = (row tiles,).  Pure streamed normalize: h * scale + shift."""
    o_ref[...] = h_ref[...] * ss_ref[0:1, :] + ss_ref[1:2, :]


def _round_up(v, m):
    return ((v + m - 1) // m) * m


@functools.partial(jax.jit, static_argnames=("eps",))
def basic_block(x, edge_index, params, eps=0.0):
    """x: [N, indim] f32, edge_index: [2, E] int32 (row 0 = src, row 1 = dst)."""
    n, indim = x.shape
    hidden = params["w1"].shape[1]

    n_pad = _round_up(n, TILE_N)
    ind_p = _round_up(indim, 128)
    hid_p = _round_up(hidden, 128)
    n_tiles = n_pad // TILE_N
    k_tiles = n_pad // TILE_K

    # --- glue (plain JAX): dense adjacency from edge_index ------------------
    # bf16 is exact for small integer edge counts (multiplicity <= 256).
    src, dst = edge_index[0], edge_index[1]
    a_hat = (jnp.zeros((n_pad, n_pad), jnp.float32)
             .at[dst, src].add(1.0)
             .astype(jnp.bfloat16))

    x_p = jnp.zeros((n_pad, ind_p), jnp.float32).at[:n, :indim].set(x)
    w1_p = jnp.zeros((ind_p, hid_p), jnp.float32).at[:indim, :hidden].set(params["w1"])
    w2_p = jnp.zeros((hid_p, hid_p), jnp.float32).at[:hidden, :hidden].set(params["w2"])
    bias = (jnp.zeros((8, hid_p), jnp.float32)
            .at[0, :hidden].set(params["b1"].reshape(-1))
            .at[1, :hidden].set(params["b2"].reshape(-1)))

    flops = (2 * n_pad * n_pad * ind_p
             + 2 * n_pad * ind_p * hid_p
             + 2 * n_pad * hid_p * hid_p)
    bytes_accessed = (a_hat.size * 2            # bf16 A tiles, each read once
                      + x_p.size * 4            # x is resident: fetched once
                      + w1_p.size * 4 + w2_p.size * 4 + bias.size * 4
                      + n_pad * hid_p * 4       # h output
                      + n_tiles * 2 * hid_p * 4)  # BN partials

    h_full, stats = pl.pallas_call(
        functools.partial(gin_mlp_kernel, n_real=n, one_plus_eps=1.0 + eps),
        out_shape=(jax.ShapeDtypeStruct((n_pad, hid_p), jnp.float32),
                   jax.ShapeDtypeStruct((n_tiles, 2, hid_p), jnp.float32)),
        grid=(n_tiles, k_tiles),
        in_specs=[
            pl.BlockSpec((TILE_N, TILE_K), lambda i, k: (i, k)),   # A_hat tile
            pl.BlockSpec((n_pad, ind_p), lambda i, k: (0, 0)),     # x (resident)
            pl.BlockSpec((ind_p, hid_p), lambda i, k: (0, 0)),     # W1 (resident)
            pl.BlockSpec((hid_p, hid_p), lambda i, k: (0, 0)),     # W2 (resident)
            pl.BlockSpec((8, hid_p), lambda i, k: (0, 0)),         # bias slab
        ],
        out_specs=(
            pl.BlockSpec((TILE_N, hid_p), lambda i, k: (i, 0)),
            pl.BlockSpec((1, 2, hid_p), lambda i, k: (i, 0, 0)),
        ),
        scratch_shapes=[pltpu.VMEM((TILE_N, ind_p), jnp.float32)],
        compiler_params=pltpu.CompilerParams(
            dimension_semantics=("parallel", "arbitrary"),
            vmem_limit_bytes=VMEM_LIMIT),
        cost_estimate=pl.CostEstimate(flops=flops, transcendentals=0,
                                      bytes_accessed=bytes_accessed),
    )(a_hat, x_p, w1_p, w2_p, bias)

    # --- glue (plain JAX): reduce BN partials to a (8, hid_p) scale/shift slab.
    inv_n = 1.0 / n
    mean = jnp.sum(stats[:, 0, :], axis=0) * inv_n          # (hid_p,)
    ex2 = jnp.sum(stats[:, 1, :], axis=0) * inv_n
    var = jnp.maximum(ex2 - mean * mean, 0.0)
    inv_std = jax.lax.rsqrt(var + BN_EPS)
    gamma_p = jnp.zeros((hid_p,), jnp.float32).at[:hidden].set(params["gamma"].reshape(-1))
    beta_p = jnp.zeros((hid_p,), jnp.float32).at[:hidden].set(params["beta"].reshape(-1))
    scale = gamma_p * inv_std
    shift = beta_p - mean * scale
    ss = jnp.zeros((8, hid_p), jnp.float32).at[0, :].set(scale).at[1, :].set(shift)

    out_p = pl.pallas_call(
        bn_apply_kernel,
        out_shape=jax.ShapeDtypeStruct((n_pad, hid_p), jnp.float32),
        grid=(n_tiles,),
        in_specs=[
            pl.BlockSpec((TILE_N, hid_p), lambda i: (i, 0)),
            pl.BlockSpec((8, hid_p), lambda i: (0, 0)),
        ],
        out_specs=pl.BlockSpec((TILE_N, hid_p), lambda i: (i, 0)),
        input_output_aliases={0: 0},           # normalize h in place
        compiler_params=pltpu.CompilerParams(
            dimension_semantics=("parallel",),
            vmem_limit_bytes=VMEM_LIMIT),
    )(h_full, ss)

    return out_p[:n, :hidden]


def reference(x, edge_index, params, eps=0.0, neighbor_dtype=jnp.float32):
    """Pure-JAX reference matching PyTorch semantics.  `neighbor_dtype=bf16`
    matches the kernel's bf16 aggregation-operand precision (self term, MLP and
    BN stay f32)."""
    src, dst = edge_index[0], edge_index[1]
    xn = x.astype(neighbor_dtype).astype(jnp.float32)
    agg = jnp.zeros_like(x).at[dst].add(xn[src])
    h = (1.0 + eps) * x + agg
    h = jnp.maximum(jnp.dot(h, params["w1"], precision=_HI) + params["b1"], 0.0)
    h = jnp.dot(h, params["w2"], precision=_HI) + params["b2"]
    h = jnp.maximum(h, 0.0)
    mean = h.mean(axis=0, keepdims=True)
    var = ((h - mean) ** 2).mean(axis=0, keepdims=True)
    return (h - mean) / jnp.sqrt(var + BN_EPS) * params["gamma"] + params["beta"]


def init_params(key, indim, hidden):
    k1, k2, k3, k4, k5, k6 = jax.random.split(key, 6)
    # Weights stored already transposed: [in, out] (PyTorch Linear is [out, in]).
    return {
        "w1": jax.random.normal(k1, (indim, hidden), jnp.float32) * 0.1,
        "b1": jax.random.normal(k3, (hidden,), jnp.float32) * 0.1,
        "w2": jax.random.normal(k2, (hidden, hidden), jnp.float32) * 0.1,
        "b2": jax.random.normal(k4, (hidden,), jnp.float32) * 0.1,
        "gamma": 1.0 + 0.1 * jax.random.normal(k5, (hidden,), jnp.float32),
        "beta": 0.1 * jax.random.normal(k6, (hidden,), jnp.float32),
    }


if __name__ == "__main__":
    N, INDIM, HIDDEN, E = 200, 16, 32, 512

    key = jax.random.PRNGKey(0)
    kx, ke, kp = jax.random.split(key, 3)

    x = jax.random.normal(kx, (N, INDIM), jnp.float32)
    edge_index = jax.random.randint(ke, (2, E), 0, N, dtype=jnp.int32)
    params = init_params(kp, INDIM, HIDDEN)

    out = jax.block_until_ready(basic_block(x, edge_index, params))
    assert out.shape == (N, HIDDEN)

    # Precision-matched reference (neighbor aggregation operand in bf16, as in
    # the kernel); everything else f32.
    ref = reference(x, edge_index, params, neighbor_dtype=jnp.bfloat16)
    err = jnp.max(jnp.abs(out - ref))
    assert jnp.allclose(out, ref, atol=2e-3, rtol=2e-3), f"max abs err = {err}"

    print("KERNEL_OK")
</pallas_src>

<mosaic_0001>
module attributes {stable_mosaic.version = 11 : i64} {
  func.func private @main(%arg0: i32) attributes {dimension_semantics = [#tpu.dimension_semantics<core_parallel>], iteration_bounds = array<i64: 2>, tpu.core_type = #tpu.core_type<sc_scalar_subcore>, window_params = []} {
    return
  }
}

module attributes {stable_mosaic.version = 11 : i64} {
  func.func private @main(%arg0: i32) attributes {dimension_semantics = [#tpu.dimension_semantics<core_parallel>], iteration_bounds = array<i64: 2>, tpu.core_type = #tpu.core_type<sc_scalar_subcore>, window_params = []} {
    return
  }
}

module attributes {stable_mosaic.version = 11 : i64} {
  func.func @gin_mlp_kernel(%arg0: i32, %arg1: i32, %arg2: memref<256x256xbf16, #tpu.memory_space<vmem>>, %arg3: memref<256x128xf32, #tpu.memory_space<vmem>>, %arg4: memref<128x128xf32, #tpu.memory_space<vmem>>, %arg5: memref<128x128xf32, #tpu.memory_space<vmem>>, %arg6: memref<8x128xf32, #tpu.memory_space<vmem>>, %arg7: memref<256x128xf32, #tpu.memory_space<vmem>>, %arg8: memref<1x2x128xf32, #tpu.memory_space<vmem>>, %arg9: memref<256x128xf32, #tpu.memory_space<vmem>>) attributes {dimension_semantics = [#tpu.dimension_semantics<parallel>, #tpu.dimension_semantics<arbitrary>], iteration_bounds = array<i64: 1, 1>, scalar_prefetch = 0 : i64, scratch_operands = 1 : i64, tpu.core_type = #tpu.core_type<tc>, window_params = [{transform_indices = @transform_0, window_bounds = array<i64: 256, 256>}, {pipeline_mode = #tpu.pipeline_mode<synchronous>, transform_indices = @transform_1, window_bounds = array<i64: 256, 128>}, {pipeline_mode = #tpu.pipeline_mode<synchronous>, transform_indices = @transform_2, window_bounds = array<i64: 128, 128>}, {pipeline_mode = #tpu.pipeline_mode<synchronous>, transform_indices = @transform_3, window_bounds = array<i64: 128, 128>}, {pipeline_mode = #tpu.pipeline_mode<synchronous>, transform_indices = @transform_4, window_bounds = array<i64: 8, 128>}, {transform_indices = @transform_5, window_bounds = array<i64: 256, 128>}, {transform_indices = @transform_6, window_bounds = array<i64: 1, 2, 128>}]} {
    %c0_i32 = arith.constant 0 : i32
    %0 = arith.cmpi eq, %arg1, %c0_i32 : i32
    %1 = arith.extui %0 : i1 to i32
    %c0_i32_0 = arith.constant 0 : i32
    %2 = arith.cmpi ne, %1, %c0_i32_0 : i32
    scf.if %2 {
      %c256_i32_9 = arith.constant 256 : i32
      %16 = arith.muli %arg0, %c256_i32_9 : i32
      %17 = tpu.assume_multiple %16, 256 : i32
      %18 = arith.index_cast %17 : i32 to index
      %c0_10 = arith.constant 0 : index
      %19 = vector.load %arg3[%18, %c0_10] : memref<256x128xf32, #tpu.memory_space<vmem>>, vector<256x128xf32>
      %cst_11 = arith.constant 1.000000e+00 : f32
      %20 = vector.broadcast %cst_11 : f32 to vector<256x128xf32>
      %21 = arith.mulf %20, %19 : vector<256x128xf32>
      %c0_12 = arith.constant 0 : index
      %c0_13 = arith.constant 0 : index
      %22 = vector.load %arg9[%c0_12, %c0_13] : memref<256x128xf32, #tpu.memory_space<vmem>>, vector<256x128xf32>
      tpu.vector_store %arg9[%c0_12, %c0_13], %21 {strides = array<i32>} : memref<256x128xf32, #tpu.memory_space<vmem>>, vector<256x128xf32>,
    } else {
    }
    %c256_i32 = arith.constant 256 : i32
    %3 = arith.muli %arg1, %c256_i32 : i32
    %4 = tpu.assume_multiple %3, 256 : i32
    %5 = arith.index_cast %4 : i32 to index
    %c0 = arith.constant 0 : index
    %6 = vector.load %arg3[%5, %c0] : memref<256x128xf32, #tpu.memory_space<vmem>>, vector<256x128xf32>
    %7 = arith.truncf %6 : vector<256x128xf32> to vector<256x128xbf16>
    %c0_1 = arith.constant 0 : index
    %c0_2 = arith.constant 0 : index
    %8 = vector.load %arg9[%c0_1, %c0_2] : memref<256x128xf32, #tpu.memory_space<vmem>>, vector<256x128xf32>
    %c0_3 = arith.constant 0 : index
    %c0_4 = arith.constant 0 : index
    %9 = vector.load %arg2[%c0_3, %c0_4] : memref<256x256xbf16, #tpu.memory_space<vmem>>, vector<256x256xbf16>
    %cst = arith.constant dense<0.000000e+00> : vector<256x128xf32>
    %10 = tpu.matmul %9, %7, %cst {dimension_numbers = #tpu.dot_dimension_numbers<[1], [0], [0], [1], [0, 0, 1, 1], [], []>} : vector<256x256xbf16>, vector<256x128xbf16>, vector<256x128xf32> -> vector<256x128xf32>
    %11 = arith.addf %8, %10 : vector<256x128xf32>
    %c0_5 = arith.constant 0 : index
    %c0_6 = arith.constant 0 : index
    %12 = vector.load %arg9[%c0_5, %c0_6] : memref<256x128xf32, #tpu.memory_space<vmem>>, vector<256x128xf32>
    tpu.vector_store %arg9[%c0_5, %c0_6], %11 {strides = array<i32>} : memref<256x128xf32, #tpu.memory_space<vmem>>, vector<256x128xf32>,
    %c0_i32_7 = arith.constant 0 : i32
    %13 = arith.cmpi eq, %arg1, %c0_i32_7 : i32
    %14 = arith.extui %13 : i1 to i32
    %c0_i32_8 = arith.constant 0 : i32
    %15 = arith.cmpi ne, %14, %c0_i32_8 : i32
    scf.if %15 {
      %c0_9 = arith.constant 0 : index
      %c0_10 = arith.constant 0 : index
      %16 = vector.load %arg9[%c0_9, %c0_10] : memref<256x128xf32, #tpu.memory_space<vmem>>, vector<256x128xf32>
      %c0_11 = arith.constant 0 : index
      %c0_12 = arith.constant 0 : index
      %17 = vector.load %arg4[%c0_11, %c0_12] : memref<128x128xf32, #tpu.memory_space<vmem>>, vector<128x128xf32>
      %cst_13 = arith.constant dense<0.000000e+00> : vector<256x128xf32>
      %18 = tpu.matmul %16, %17, %cst_13 {dimension_numbers = #tpu.dot_dimension_numbers<[1], [0], [0], [1], [0, 0, 1, 1], [], []>, precision = #tpu.contract_precision<fp32>} : vector<256x128xf32>, vector<128x128xf32>, vector<256x128xf32> -> vector<256x128xf32>
      %c0_14 = arith.constant 0 : index
      %c0_15 = arith.constant 0 : index
      %19 = vector.load %arg6[%c0_14, %c0_15] : memref<8x128xf32, #tpu.memory_space<vmem>>, vector<1x128xf32>
      %20 = vector.broadcast %19 : vector<1x128xf32> to vector<256x128xf32>
      %21 = arith.addf %18, %20 : vector<256x128xf32>
      %cst_16 = arith.constant 0.000000e+00 : f32
      %22 = vector.broadcast %cst_16 : f32 to vector<256x128xf32>
      %23 = arith.maximumf %21, %22 : vector<256x128xf32>
      %c0_17 = arith.constant 0 : index
      %c0_18 = arith.constant 0 : index
      %24 = vector.load %arg5[%c0_17, %c0_18] : memref<128x128xf32, #tpu.memory_space<vmem>>, vector<128x128xf32>
      %cst_19 = arith.constant dense<0.000000e+00> : vector<256x128xf32>
      %25 = tpu.matmul %23, %24, %cst_19 {dimension_numbers = #tpu.dot_dimension_numbers<[1], [0], [0], [1], [0, 0, 1, 1], [], []>, precision = #tpu.contract_precision<fp32>} : vector<256x128xf32>, vector<128x128xf32>, vector<256x128xf32> -> vector<256x128xf32>
      %c1 = arith.constant 1 : index
      %c0_20 = arith.constant 0 : index
      %26 = vector.load %arg6[%c1, %c0_20] : memref<8x128xf32, #tpu.memory_space<vmem>>, vector<1x128xf32>
      %27 = vector.broadcast %26 : vector<1x128xf32> to vector<256x128xf32>
      %28 = arith.addf %25, %27 : vector<256x128xf32>
      %cst_21 = arith.constant 0.000000e+00 : f32
      %29 = vector.broadcast %cst_21 : f32 to vector<256x128xf32>
      %30 = arith.maximumf %28, %29 : vector<256x128xf32>
      %c0_22 = arith.constant 0 : index
      %c0_23 = arith.constant 0 : index
      %31 = vector.load %arg7[%c0_22, %c0_23] : memref<256x128xf32, #tpu.memory_space<vmem>>, vector<256x128xf32>
      tpu.vector_store %arg7[%c0_22, %c0_23], %30 {strides = array<i32>} : memref<256x128xf32, #tpu.memory_space<vmem>>, vector<256x128xf32>,
      %c256_i32_24 = arith.constant 256 : i32
      %32 = arith.muli %arg0, %c256_i32_24 : i32
      %33 = tpu.iota {dimensions = array<i32: 0>} : vector<256x1xi32>
      %34 = vector.broadcast %32 : i32 to vector<256x1xi32>
      %35 = arith.addi %34, %33 : vector<256x1xi32>
      %c200_i32 = arith.constant 200 : i32
      %36 = vector.broadcast %c200_i32 : i32 to vector<256x1xi32>
      %37 = arith.cmpi slt, %35, %36 : vector<256x1xi32>
      %cst_25 = arith.constant 0.000000e+00 : f32
      %38 = vector.shape_cast %37 : vector<256x1xi1> to vector<256x1xi1>
      %39 = vector.broadcast %38 : vector<256x1xi1> to vector<256x128xi1>
      %40 = vector.broadcast %cst_25 : f32 to vector<256x128xf32>
      %41 = arith.select %39, %30, %40 : vector<256x128xi1>, vector<256x128xf32>
      %cst_26 = arith.constant dense<0.000000e+00> : vector<128xf32>
      %42 = vector.multi_reduction <add>, %41, %cst_26 [0] : vector<256x128xf32> to vector<128xf32>
      %43 = vector.shape_cast %42 : vector<128xf32> to vector<1x128xf32>
      %c0_27 = arith.constant 0 : index
      %c0_28 = arith.constant 0 : index
      %c0_29 = arith.constant 0 : index
      %44 = vector.load %arg8[%c0_27, %c0_28, %c0_29] : memref<1x2x128xf32, #tpu.memory_space<vmem>>, vector<1x1x128xf32>
      %45 = vector.shape_cast %44 : vector<1x1x128xf32> to vector<1x128xf32>
      %46 = vector.shape_cast %43 : vector<1x128xf32> to vector<1x1x128xf32>
      tpu.vector_store %arg8[%c0_27, %c0_28, %c0_29], %46 {strides = array<i32>} : memref<1x2x128xf32, #tpu.memory_space<vmem>>, vector<1x1x128xf32>,
      %47 = arith.mulf %41, %41 : vector<256x128xf32>
      %cst_30 = arith.constant dense<0.000000e+00> : vector<128xf32>
      %48 = vector.multi_reduction <add>, %47, %cst_30 [0] : vector<256x128xf32> to vector<128xf32>
      %49 = vector.shape_cast %48 : vector<128xf32> to vector<1x128xf32>
      %c0_31 = arith.constant 0 : index
      %c1_32 = arith.constant 1 : index
      %c0_33 = arith.constant 0 : index
      %50 = vector.load %arg8[%c0_31, %c1_32, %c0_33] : memref<1x2x128xf32, #tpu.memory_space<vmem>>, vector<1x1x128xf32>
      %51 = vector.shape_cast %50 : vector<1x1x128xf32> to vector<1x128xf32>
      %52 = vector.shape_cast %49 : vector<1x128xf32> to vector<1x1x128xf32>
      tpu.vector_store %arg8[%c0_31, %c1_32, %c0_33], %52 {strides = array<i32>} : memref<1x2x128xf32, #tpu.memory_space<vmem>>, vector<1x1x128xf32>,
    } else {
    }
    return
  }
  func.func @transform_0(%arg0: i32, %arg1: i32) -> (i32, i32) {
    %c0_i32 = arith.constant 0 : i32
    return %arg0, %arg1 : i32, i32
  }
  func.func @transform_1(%arg0: i32, %arg1: i32) -> (i32, i32) {
    %c0_i32 = arith.constant 0 : i32
    %c0_i32_0 = arith.constant 0 : i32
    %c0_i32_1 = arith.constant 0 : i32
    return %c0_i32, %c0_i32_0 : i32, i32
  }
  func.func @transform_2(%arg0: i32, %arg1: i32) -> (i32, i32) {
    %c0_i32 = arith.constant 0 : i32
    %c0_i32_0 = arith.constant 0 : i32
    %c0_i32_1 = arith.constant 0 : i32
    return %c0_i32, %c0_i32_0 : i32, i32
  }
  func.func @transform_3(%arg0: i32, %arg1: i32) -> (i32, i32) {
    %c0_i32 = arith.constant 0 : i32
    %c0_i32_0 = arith.constant 0 : i32
    %c0_i32_1 = arith.constant 0 : i32
    return %c0_i32, %c0_i32_0 : i32, i32
  }
  func.func @transform_4(%arg0: i32, %arg1: i32) -> (i32, i32) {
    %c0_i32 = arith.constant 0 : i32
    %c0_i32_0 = arith.constant 0 : i32
    %c0_i32_1 = arith.constant 0 : i32
    return %c0_i32, %c0_i32_0 : i32, i32
  }
  func.func @transform_5(%arg0: i32, %arg1: i32) -> (i32, i32) {
    %c0_i32 = arith.constant 0 : i32
    %c0_i32_0 = arith.constant 0 : i32
    return %arg0, %c0_i32 : i32, i32
  }
  func.func @transform_6(%arg0: i32, %arg1: i32) -> (i32, i32, i32) {
    %c0_i32 = arith.constant 0 : i32
    %c0_i32_0 = arith.constant 0 : i32
    %c0_i32_1 = arith.constant 0 : i32
    return %arg0, %c0_i32, %c0_i32_0 : i32, i32, i32
  }
}

module attributes {stable_mosaic.version = 11 : i64} {
  func.func @bn_apply_kernel(%arg0: i32, %arg1: memref<256x128xf32, #tpu.memory_space<vmem>>, %arg2: memref<8x128xf32, #tpu.memory_space<vmem>>, %arg3: memref<256x128xf32, #tpu.memory_space<vmem>>) attributes {dimension_semantics = [#tpu.dimension_semantics<parallel>], iteration_bounds = array<i64: 1>, scalar_prefetch = 0 : i64, scratch_operands = 0 : i64, tpu.core_type = #tpu.core_type<tc>, window_params = [{transform_indices = @transform_0, window_bounds = array<i64: 256, 128>}, {pipeline_mode = #tpu.pipeline_mode<synchronous>, transform_indices = @transform_1, window_bounds = array<i64: 8, 128>}, {transform_indices = @transform_2, window_bounds = array<i64: 256, 128>}]} {
    %c0 = arith.constant 0 : index
    %c0_0 = arith.constant 0 : index
    %0 = vector.load %arg1[%c0, %c0_0] : memref<256x128xf32, #tpu.memory_space<vmem>>, vector<256x128xf32>
    %c0_1 = arith.constant 0 : index
    %c0_2 = arith.constant 0 : index
    %1 = vector.load %arg2[%c0_1, %c0_2] : memref<8x128xf32, #tpu.memory_space<vmem>>, vector<1x128xf32>
    %2 = vector.broadcast %1 : vector<1x128xf32> to vector<256x128xf32>
    %3 = arith.mulf %0, %2 : vector<256x128xf32>
    %c1 = arith.constant 1 : index
    %c0_3 = arith.constant 0 : index
    %4 = vector.load %arg2[%c1, %c0_3] : memref<8x128xf32, #tpu.memory_space<vmem>>, vector<1x128xf32>
    %5 = vector.broadcast %4 : vector<1x128xf32> to vector<256x128xf32>
    %6 = arith.addf %3, %5 : vector<256x128xf32>
    %c0_4 = arith.constant 0 : index
    %c0_5 = arith.constant 0 : index
    %7 = vector.load %arg3[%c0_4, %c0_5] : memref<256x128xf32, #tpu.memory_space<vmem>>, vector<256x128xf32>
    tpu.vector_store %arg3[%c0_4, %c0_5], %6 {strides = array<i32>} : memref<256x128xf32, #tpu.memory_space<vmem>>, vector<256x128xf32>,
    return
  }
  func.func @transform_0(%arg0: i32) -> (i32, i32) {
    %c0_i32 = arith.constant 0 : i32
    %c0_i32_0 = arith.constant 0 : i32
    return %arg0, %c0_i32 : i32, i32
  }
  func.func @transform_1(%arg0: i32) -> (i32, i32) {
    %c0_i32 = arith.constant 0 : i32
    %c0_i32_0 = arith.constant 0 : i32
    %c0_i32_1 = arith.constant 0 : i32
    return %c0_i32, %c0_i32_0 : i32, i32
  }
  func.func @transform_2(%arg0: i32) -> (i32, i32) {
    %c0_i32 = arith.constant 0 : i32
    %c0_i32_0 = arith.constant 0 : i32
    return %arg0, %c0_i32 : i32, i32
  }
}

</mosaic_0001>

<bundles_post_ra>
// kernel: basic_block.3
= control target key start
LH: loop header
LB: loop body
LE: loop exit
PB: predicated region body
PF: predicated region fallthrough
CT: control target
= control target key end

     0   :  { %s436_s0 = inlined_call_operand.vmem [shape: f32[256,128], index: 0, kind: input, shape index: {}, may-alias: {0,2}]   ;;  %s437_s1 = inlined_call_operand.vmem [shape: f32[8,128], index: 1, kind: input, shape index: {}]   ;;  %s438_s2 = inlined_call_operand.vmem [shape: f32[256,128], index: 2, kind: output, shape index: {}, may-alias: {0,2}]  }
   0x1   :  { %v11_v0 = vld [vmem:[%s436_s0] sm:$0xff]  ;;  %v12_v4 = vld [vmem:[%s436_s0 + $0x8] sm:$0xff]  ;;  %v13_v5 = vld [vmem:[%s436_s0 + $0x10] sm:$0xff] }
   0x2   :  { %v176_v1 = vld [vmem:[%s437_s1] ss:$0 sm:$0xff]  ;;  %v181_v2 = vld [vmem:[%s437_s1 + $0x1] ss:$0 sm:$0xff]  ;;  %v14_v6 = vld [vmem:[%s436_s0 + $0x18] sm:$0xff] }
   0x3   :  { %v48_v3 = vmul.f32 %v176_v1, %v11_v0  ;;  %v49_v7 = vmul.f32 %v176_v1, %v12_v4  ;;  %v50_v8 = vmul.f32 %v176_v1, %v13_v5  ;;  %v51_v9 = vmul.f32 %v176_v1, %v14_v6  ;;  %v15_v10 = vld [vmem:[%s436_s0 + $0x20] sm:$0xff]  ;;  %v16_v11 = vld [vmem:[%s436_s0 + $0x28] sm:$0xff]  ;;  %v17_v12 = vld [vmem:[%s436_s0 + $0x30] sm:$0xff] }
   0x4   :  { %v52_v14 = vmul.f32 %v176_v1, %v15_v10  ;;  %v53_v15 = vmul.f32 %v176_v1, %v16_v11  ;;  %v54_v16 = vmul.f32 %v176_v1, %v17_v12  ;;  %v18_v17 = vld [vmem:[%s436_s0 + $0x38] sm:$0xff]  ;;  %v19_v18 = vld [vmem:[%s436_s0 + $0x40] sm:$0xff]  ;;  %v20_v19 = vld [vmem:[%s436_s0 + $0x48] sm:$0xff] }
   0x5   :  { %v85_v13 = vadd.f32 %v181_v2, %v48_v3  ;;  %v86_v20 = vadd.f32 %v181_v2, %v49_v7  ;;  %v87_v21 = vadd.f32 %v181_v2, %v50_v8  ;;  %v88_v22 = vadd.f32 %v181_v2, %v51_v9  ;;  %v21_v24 = vld [vmem:[%s436_s0 + $0x50] sm:$0xff]  ;;  %v22_v25 = vld [vmem:[%s436_s0 + $0x58] sm:$0xff]  ;;  %v23_v26 = vld [vmem:[%s436_s0 + $0x60] sm:$0xff] }
   0x6   :  { %v55_v23 = vmul.f32 %v176_v1, %v18_v17  ;;  %v89_v27 = vadd.f32 %v181_v2, %v52_v14  ;;  %v90_v28 = vadd.f32 %v181_v2, %v53_v15  ;;  %v91_v29 = vadd.f32 %v181_v2, %v54_v16 }
   0x7   :  { %117 = vst [vmem:[%s438_s2] sm:$0xff] %v85_v13  ;;  %v56_v30 = vmul.f32 %v176_v1, %v19_v18  ;;  %v57_v35 = vmul.f32 %v176_v1, %v20_v19  ;;  %v58_v36 = vmul.f32 %v176_v1, %v21_v24  ;;  %v59_v37 = vmul.f32 %v176_v1, %v22_v25 }
   0x8   :  { %v92_v34 = vadd.f32 %v181_v2, %v55_v23  ;;  %v60_v40 = vmul.f32 %v176_v1, %v23_v26 }
   0x9   :  { %v93_v39 = vadd.f32 %v181_v2, %v56_v30  ;;  %v94_v46 = vadd.f32 %v181_v2, %v57_v35  ;;  %v95_v47 = vadd.f32 %v181_v2, %v58_v36  ;;  %v96_v48 = vadd.f32 %v181_v2, %v59_v37 }
   0xa   :  { %v97_v53 = vadd.f32 %v181_v2, %v60_v40 }
   0xe   :  { %v24_v31 = vld [vmem:[%s436_s0 + $0x68] sm:$0xff]  ;;  %v25_v32 = vld [vmem:[%s436_s0 + $0x70] sm:$0xff]  ;;  %v26_v33 = vld [vmem:[%s436_s0 + $0x78] sm:$0xff] }
   0xf   :  { %118 = vst [vmem:[%s438_s2 + $0x8] sm:$0xff] %v86_v20  ;;  %119 = vst [vmem:[%s438_s2 + $0x10] sm:$0xff] %v87_v21  ;;  %v61_v41 = vmul.f32 %v176_v1, %v24_v31  ;;  %v62_v42 = vmul.f32 %v176_v1, %v25_v32  ;;  %v63_v49 = vmul.f32 %v176_v1, %v26_v33 }
  0x10   :  { %120 = vst [vmem:[%s438_s2 + $0x18] sm:$0xff] %v88_v22 }
  0x11   :  { %v98_v54 = vadd.f32 %v181_v2, %v61_v41  ;;  %v99_v55 = vadd.f32 %v181_v2, %v62_v42  ;;  %v100_v58 = vadd.f32 %v181_v2, %v63_v49 }
  0x17   :  { %v27_v38 = vld [vmem:[%s436_s0 + $0x80] sm:$0xff] }
  0x18   :  { %121 = vst [vmem:[%s438_s2 + $0x20] sm:$0xff] %v89_v27  ;;  %122 = vst [vmem:[%s438_s2 + $0x28] sm:$0xff] %v90_v28  ;;  %v64_v56 = vmul.f32 %v176_v1, %v27_v38 }
  0x19   :  { %123 = vst [vmem:[%s438_s2 + $0x30] sm:$0xff] %v91_v29 }
  0x1a   :  { %v101_v63 = vadd.f32 %v181_v2, %v64_v56 }
  0x20   :  { %v28_v43 = vld [vmem:[%s436_s0 + $0x88] sm:$0xff]  ;;  %v29_v44 = vld [vmem:[%s436_s0 + $0x90] sm:$0xff]  ;;  %v30_v45 = vld [vmem:[%s436_s0 + $0x98] sm:$0xff] }
  0x21   :  { %124 = vst [vmem:[%s438_s2 + $0x38] sm:$0xff] %v92_v34  ;;  %v65_v59 = vmul.f32 %v176_v1, %v28_v43  ;;  %v66_v60 = vmul.f32 %v176_v1, %v29_v44  ;;  %v67_v61 = vmul.f32 %v176_v1, %v30_v45 }
  0x23   :  { %v102_v8 = vadd.f32 %v181_v2, %v65_v59  ;;  %v103_v9 = vadd.f32 %v181_v2, %v66_v60  ;;  %v104_v10 = vadd.f32 %v181_v2, %v67_v61 }
  0x28   :  { %v31_v50 = vld [vmem:[%s436_s0 + $0xa0] sm:$0xff]  ;;  %v32_v51 = vld [vmem:[%s436_s0 + $0xa8] sm:$0xff]  ;;  %v33_v52 = vld [vmem:[%s436_s0 + $0xb0] sm:$0xff] }
  0x29   :  { %125 = vst [vmem:[%s438_s2 + $0x40] sm:$0xff] %v93_v39  ;;  %v68_v0 = vmul.f32 %v176_v1, %v31_v50  ;;  %v69_v3 = vmul.f32 %v176_v1, %v32_v51  ;;  %v70_v4 = vmul.f32 %v176_v1, %v33_v52 }
  0x2b   :  { %v105_v15 = vadd.f32 %v181_v2, %v68_v0  ;;  %v106_v16 = vadd.f32 %v181_v2, %v69_v3  ;;  %v107_v17 = vadd.f32 %v181_v2, %v70_v4 }
  0x30   :  { %v34_v57 = vld [vmem:[%s436_s0 + $0xb8] sm:$0xff] }
  0x31   :  { %126 = vst [vmem:[%s438_s2 + $0x48] sm:$0xff] %v94_v46  ;;  %127 = vst [vmem:[%s438_s2 + $0x50] sm:$0xff] %v95_v47  ;;  %v71_v11 = vmul.f32 %v176_v1, %v34_v57 }
  0x32   :  { %128 = vst [vmem:[%s438_s2 + $0x58] sm:$0xff] %v96_v48 }
  0x33   :  { %v108_v20 = vadd.f32 %v181_v2, %v71_v11 }
  0x39   :  { %v35_v62 = vld [vmem:[%s436_s0 + $0xc0] sm:$0xff] }
  0x3a   :  { %129 = vst [vmem:[%s438_s2 + $0x60] sm:$0xff] %v97_v53  ;;  %130 = vst [vmem:[%s438_s2 + $0x68] sm:$0xff] %v98_v54  ;;  %v72_v18 = vmul.f32 %v176_v1, %v35_v62 }
  0x3b   :  { %131 = vst [vmem:[%s438_s2 + $0x70] sm:$0xff] %v99_v55 }
  0x3c   :  { %v109_v24 = vadd.f32 %v181_v2, %v72_v18 }
  0x42   :  { %v36_v5 = vld [vmem:[%s436_s0 + $0xc8] sm:$0xff]  ;;  %v37_v6 = vld [vmem:[%s436_s0 + $0xd0] sm:$0xff]  ;;  %v38_v7 = vld [vmem:[%s436_s0 + $0xd8] sm:$0xff] }
  0x43   :  { %132 = vst [vmem:[%s438_s2 + $0x78] sm:$0xff] %v100_v58  ;;  %v73_v21 = vmul.f32 %v176_v1, %v36_v5  ;;  %v74_v22 = vmul.f32 %v176_v1, %v37_v6  ;;  %v75_v23 = vmul.f32 %v176_v1, %v38_v7 }
  0x45   :  { %v110_v28 = vadd.f32 %v181_v2, %v73_v21  ;;  %v111_v29 = vadd.f32 %v181_v2, %v74_v22  ;;  %v112_v30 = vadd.f32 %v181_v2, %v75_v23 }
  0x4a   :  { %v39_v12 = vld [vmem:[%s436_s0 + $0xe0] sm:$0xff]  ;;  %v40_v13 = vld [vmem:[%s436_s0 + $0xe8] sm:$0xff]  ;;  %v41_v14 = vld [vmem:[%s436_s0 + $0xf0] sm:$0xff] }
  0x4b   :  { %133 = vst [vmem:[%s438_s2 + $0x80] sm:$0xff] %v101_v63  ;;  %v76_v25 = vmul.f32 %v176_v1, %v39_v12  ;;  %v77_v26 = vmul.f32 %v176_v1, %v40_v13  ;;  %v78_v27 = vmul.f32 %v176_v1, %v41_v14 }
  0x4d   :  { %v113_v32 = vadd.f32 %v181_v2, %v76_v25  ;;  %v114_v33 = vadd.f32 %v181_v2, %v77_v26  ;;  %v115_v34 = vadd.f32 %v181_v2, %v78_v27 }
  0x52   :  { %v42_v19 = vld [vmem:[%s436_s0 + $0xf8] sm:$0xff] }
  0x53   :  { %134 = vst [vmem:[%s438_s2 + $0x88] sm:$0xff] %v102_v8  ;;  %135 = vst [vmem:[%s438_s2 + $0x90] sm:$0xff] %v103_v9  ;;  %v79_v31 = vmul.f32 %v176_v1, %v42_v19 }
  0x54   :  { %136 = vst [vmem:[%s438_s2 + $0x98] sm:$0xff] %v104_v10  ;;  %137 = vst [vmem:[%s438_s2 + $0xa0] sm:$0xff] %v105_v15 }
  0x55   :  { %138 = vst [vmem:[%s438_s2 + $0xa8] sm:$0xff] %v106_v16  ;;  %139 = vst [vmem:[%s438_s2 + $0xb0] sm:$0xff] %v107_v17  ;;  %v116_v1 = vadd.f32 %v181_v2, %v79_v31 }
  0x56   :  { %140 = vst [vmem:[%s438_s2 + $0xb8] sm:$0xff] %v108_v20  ;;  %141 = vst [vmem:[%s438_s2 + $0xc0] sm:$0xff] %v109_v24 }
  0x57   :  { %142 = vst [vmem:[%s438_s2 + $0xc8] sm:$0xff] %v110_v28  ;;  %143 = vst [vmem:[%s438_s2 + $0xd0] sm:$0xff] %v111_v29 }
  0x58   :  { %144 = vst [vmem:[%s438_s2 + $0xd8] sm:$0xff] %v112_v30  ;;  %145 = vst [vmem:[%s438_s2 + $0xe0] sm:$0xff] %v113_v32 }
  0x59   :  { %146 = vst [vmem:[%s438_s2 + $0xe8] sm:$0xff] %v114_v33  ;;  %147 = vst [vmem:[%s438_s2 + $0xf0] sm:$0xff] %v115_v34 }
  0x5a   :  { %148 = vst [vmem:[%s438_s2 + $0xf8] sm:$0xff] %v116_v1 }

// kernel: basic_block.2
= control target key start
LH: loop header
LB: loop body
LE: loop exit
PB: predicated region body
PF: predicated region fallthrough
CT: control target
= control target key end

     0   :  { %s9911_s1 = inlined_call_operand.vmem [shape: f32[256,128], index: 1, kind: input, shape index: {}]   ;;  %s9912_s0 = inlined_call_operand.vmem [shape: bf16[256,256], index: 0, kind: input, shape index: {}]   ;;  %s9913_s2 = inlined_call_operand.vmem [shape: f32[128,128], index: 2, kind: input, shape index: {}]   ;;  %s9914_s3 = inlined_call_operand.vmem [shape: f32[128,128], index: 3, kind: input, shape index: {}]   ;;  %s9915_s4 = inlined_call_operand.vmem [shape: f32[8,128], index: 4, kind: input, shape index: {}]   ;;  %s9916_s5 = inlined_call_operand.vmem [shape: f32[256,128], index: 5, kind: output, shape index: {0}]   ;;  %s9917_s6 = inlined_call_operand.vmem [shape: f32[1,2,128], index: 6, kind: output, shape index: {1}]  }
   0x1   :  { %v7586_v0 = vld [vmem:[%s9911_s1 + $0x80] sm:$0xff]  ;;  %v7591_v1 = vld [vmem:[%s9911_s1 + $0x88] sm:$0xff]  ;;  %v7608_v5 = vld [vmem:[%s9911_s1 + $0x90] sm:$0xff] }
   0x2   :  { %v7596_v2 = vld [vmem:[%s9911_s1] sm:$0xff]  ;;  %v135_v3 = vpack.c.bf16 %v7591_v1, %v7586_v0  ;;  %v7603_v4 = vld [vmem:[%s9911_s1 + $0x8] sm:$0xff]  ;;  %v114_v6 = vld [vmem:[%s9911_s1 + $0x98] sm:$0xff] }
   0x3   :  { %v127_v7 = vpack.c.bf16 %v7603_v4, %v7596_v2  ;;  %v136_v8 = vpack.c.bf16 %v114_v6, %v7608_v5  ;;  %v7619_v9 = vld [vmem:[%s9911_s1 + $0x10] sm:$0xff]  ;;  %v7624_v10 = vld [vmem:[%s9911_s1 + $0x18] sm:$0xff]  ;;  %v7629_v11 = vld [vmem:[%s9911_s1 + $0xa0] sm:$0xff] }
   0x4   :  { %5058 = vmatprep.subr.bf16.mxu0 %v135_v3  ;;  %v116_v12 = vld [vmem:[%s9911_s1 + $0xa8] sm:$0xff]  ;;  %7090 = vmatprep.subr.bf16.mxu1 %v135_v3  ;;  %v128_v13 = vpack.c.bf16 %v7624_v10, %v7619_v9  ;;  %v7640_v15 = vld [vmem:[%s9911_s1 + $0x20] sm:$0xff]  ;;  %v117_v17 = vld [vmem:[%s9911_s1 + $0xb0] sm:$0xff] }
   0x5   :  { %5059 = vmatpush3.bf16.msra.mxu0 %v127_v7  ;;  %7098 = vmatpush3.bf16.msra.mxu1 %v127_v7  ;;  %v137_v14 = vpack.c.bf16 %v116_v12, %v7629_v11  ;;  %v7645_v16 = vld [vmem:[%s9911_s1 + $0x28] sm:$0xff]  ;;  %v118_v18 = vld [vmem:[%s9911_s1 + $0xb8] sm:$0xff]  ;;  %v7658_v21 = vld [vmem:[%s9911_s1 + $0x30] sm:$0xff] }
   0x6   :  { %5060 = vmatprep.subr.bf16.mxu0 %v136_v8  ;;  %7091 = vmatprep.subr.bf16.mxu1 %v136_v8  ;;  %v129_v19 = vpack.c.bf16 %v7645_v16, %v7640_v15  ;;  %v138_v20 = vpack.c.bf16 %v118_v18, %v117_v17  ;;  %v7663_v22 = vld [vmem:[%s9911_s1 + $0x38] sm:$0xff]  ;;  %v119_v23 = vld [vmem:[%s9911_s1 + $0xc0] sm:$0xff]  ;;  %v120_v24 = vld [vmem:[%s9911_s1 + $0xc8] sm:$0xff] }
   0x7   :  { %v7492_v25 = vld [vmem:[%s9912_s0 + $0x4] ss:$8 sps:$4 sm:$0xff]   ;;  %v130_v26 = vpack.c.bf16 %v7663_v22, %v7658_v21  ;;  %v139_v28 = vpack.c.bf16 %v120_v24, %v119_v23  ;;  %v121_v30 = vld [vmem:[%s9911_s1 + $0xd0] sm:$0xff]  ;;  %v122_v31 = vld [vmem:[%s9911_s1 + $0xd8] sm:$0xff] }
   0x8   :  { %v7679_v27 = vld [vmem:[%s9911_s1 + $0x40] sm:$0xff]  ;;  %v7684_v29 = vld [vmem:[%s9911_s1 + $0x48] sm:$0xff]  ;;  %399 = vmatprep.mubr.bf16.mxu0 %v7492_v25  ;;  %v7695_v32 = vld [vmem:[%s9911_s1 + $0x50] sm:$0xff]  ;;  %v140_v35 = vpack.c.bf16 %v122_v31, %v121_v30 }
   0x9   :  { %5061 = vmatpush3.bf16.msra.mxu0 %v128_v13  ;;  %7099 = vmatpush3.bf16.msra.mxu1 %v128_v13  ;;  %v131_v33 = vpack.c.bf16 %v7684_v29, %v7679_v27  ;;  %v7702_v34 = vld [vmem:[%s9911_s1 + $0x58] sm:$0xff]  ;;  %v7504_v36 = vld [vmem:[%s9912_s0 + $0x84] ss:$8 sps:$4 sm:$0xff]   ;;  %v125_v43 = vld [vmem:[%s9911_s1 + $0xf0] sm:$0xff] }
   0xa   :  { %5062 = vmatprep.subr.bf16.mxu0 %v137_v14  ;;  %7092 = vmatprep.subr.bf16.mxu1 %v137_v14  ;;  %v123_v37 = vld [vmem:[%s9911_s1 + $0xe0] sm:$0xff]  ;;  %v124_v38 = vld [vmem:[%s9911_s1 + $0xe8] sm:$0xff]  ;;  %v132_v39 = vpack.c.bf16 %v7702_v34, %v7695_v32  ;;  %v126_v44 = vld [vmem:[%s9911_s1 + $0xf8] sm:$0xff] }
   0xb   :  { %463 = vmatprep.mubr.bf16.mxu1 %v7504_v36  ;;  %v7718_v40 = vld [vmem:[%s9911_s1 + $0x60] sm:$0xff]  ;;  %v141_v41 = vpack.c.bf16 %v124_v38, %v123_v37  ;;  %v7723_v42 = vld [vmem:[%s9911_s1 + $0x68] sm:$0xff]  ;;  %v7736_v46 = vld [vmem:[%s9911_s1 + $0x70] sm:$0xff]  ;;  %v142_v47 = vpack.c.bf16 %v126_v44, %v125_v43 }
   0xc   :  { %v133_v45 = vpack.c.bf16 %v7723_v42, %v7718_v40  ;;  %v7741_v48 = vld [vmem:[%s9911_s1 + $0x78] sm:$0xff]  ;;  %v7490_v50 = vld [vmem:[%s9912_s0] ss:$8 sps:$4 sm:$0xff]   ;;  %v7770_v56 = vld [vmem:[%s9913_s2 + $0x10] sm:$0xff] }
   0xd   :  { %5063 = vmatpush3.bf16.msra.mxu0 %v129_v19  ;;  %7100 = vmatpush3.bf16.msra.mxu1 %v129_v19  ;;  %v134_v49 = vpack.c.bf16 %v7741_v48, %v7736_v46  ;;  %v7493_v51 = vld [vmem:[%s9912_s0 + $0x14] ss:$8 sps:$4 sm:$0xff]   ;;  %v7502_v52 = vld [vmem:[%s9912_s0 + $0x80] ss:$8 sps:$4 sm:$0xff]   ;;  %v655_v60 = vand.u32 4294901760, %v7770_v56 }
   0xe   :  { %5064 = vmatprep.subr.bf16.mxu0 %v138_v20  ;;  %7093 = vmatprep.subr.bf16.mxu1 %v138_v20  ;;  %v7508_v53 = vld [vmem:[%s9912_s0 + $0x94] ss:$8 sps:$4 sm:$0xff]   ;;  %v7760_v54 = vld [vmem:[%s9913_s2] sm:$0xff]  ;;  %v7765_v55 = vld [vmem:[%s9913_s2 + $0x8] sm:$0xff] }
   0xf   :  { %v649_v57 = vand.u32 4294901760, %v7760_v54  ;;  %v652_v58 = vand.u32 4294901760, %v7765_v55  ;;  %v7777_v59 = vld [vmem:[%s9913_s2 + $0x18] sm:$0xff]  ;;  %v7784_v62 = vld [vmem:[%s9913_s2 + $0x20] sm:$0xff]  ;;  %v7789_v63 = vld [vmem:[%s9913_s2 + $0x28] sm:$0xff] }
  0x10   :  { %v658_v61 = vand.u32 4294901760, %v7777_v59  ;;  %v7806_v7 = vld [vmem:[%s9913_s2 + $0x30] sm:$0xff]  ;;  %v7811_v8 = vld [vmem:[%s9913_s2 + $0x38] sm:$0xff]  ;;  %v661_v12 = vand.u32 4294901760, %v7784_v62  ;;  %v664_v13 = vand.u32 4294901760, %v7789_v63 }
  0x11   :  { %5065 = vmatpush3.bf16.msra.mxu0 %v130_v26  ;;  %7101 = vmatpush3.bf16.msra.mxu1 %v130_v26  ;;  %v7795_v3 = vpack.c.bf16 %v652_v58, %v649_v57  ;;  %v7495_v14 = vld [vmem:[%s9912_s0 + $0x10] ss:$8 sps:$4 sm:$0xff]   ;;  %v667_v18 = vand.u32 4294901760, %v7806_v7  ;;  %v670_v19 = vand.u32 4294901760, %v7811_v8  ;;  %v7496_v20 = vld [vmem:[%s9912_s0 + $0x24] ss:$8 sps:$4 sm:$0xff]  }
  0x12   :  { %5066 = vmatprep.subr.bf16.mxu0 %v139_v28  ;;  %7094 = vmatprep.subr.bf16.mxu1 %v139_v28  ;;  %v7801_v6 = vpack.c.bf16 %v658_v61, %v655_v60  ;;  %v7510_v17 = vld [vmem:[%s9912_s0 + $0x90] ss:$8 sps:$4 sm:$0xff]   ;;  %v7514_v23 = vld [vmem:[%s9912_s0 + $0xa4] ss:$8 sps:$4 sm:$0xff]   ;;  %v7836_v24 = vpack.c.bf16 %v664_v13, %v661_v12  ;;  %v7498_v26 = vld [vmem:[%s9912_s0 + $0x20] ss:$8 sps:$4 sm:$0xff]  }
  0x13   :  { %v7843_v25 = vpack.c.bf16 %v670_v19, %v667_v18  ;;  %v7516_v28 = vld [vmem:[%s9912_s0 + $0xa0] ss:$8 sps:$4 sm:$0xff]   ;;  %v7499_v30 = vld [vmem:[%s9912_s0 + $0x34] ss:$8 sps:$4 sm:$0xff]   ;;  %v7505_v36 = vld [vmem:[%s9912_s0 + $0x44] ss:$8 sps:$4 sm:$0xff]  }
  0x14   :  { %10235 = vst [vmem:[#allocation3_spill] sm:$0xff] %v7801_v6  ;;  %10236 = vst [vmem:[#allocation4_spill] sm:$0xff] %v7836_v24  ;;  %v7520_v31 = vld [vmem:[%s9912_s0 + $0xb4] ss:$8 sps:$4 sm:$0xff]   ;;  %v7526_v37 = vld [vmem:[%s9912_s0 + $0xc4] ss:$8 sps:$4 sm:$0xff]  }
  0x15   :  { %5067 = vmatpush3.bf16.msra.mxu0 %v131_v33  ;;  %7102 = vmatpush3.bf16.msra.mxu1 %v131_v33  ;;  %10237 = vst [vmem:[#allocation5_spill] sm:$0xff] %v7843_v25  ;;  %v7501_v33 = vld [vmem:[%s9912_s0 + $0x30] ss:$8 sps:$4 sm:$0xff]   ;;  %v7507_v38 = vld [vmem:[%s9912_s0 + $0x40] ss:$8 sps:$4 sm:$0xff]  }
  0x16   :  { %5068 = vmatprep.subr.bf16.mxu0 %v140_v35  ;;  %7095 = vmatprep.subr.bf16.mxu1 %v140_v35  ;;  %v7522_v35 = vld [vmem:[%s9912_s0 + $0xb0] ss:$8 sps:$4 sm:$0xff]   ;;  %v7529_v43 = vld [vmem:[%s9912_s0 + $0xd4] ss:$8 sps:$4 sm:$0xff]  }
  0x17   :  { %v7513_v44 = vld [vmem:[%s9912_s0 + $0x50] ss:$8 sps:$4 sm:$0xff]  }
  0x19   :  { %5069 = vmatpush3.bf16.msra.mxu0 %v132_v39  ;;  %7103 = vmatpush3.bf16.msra.mxu1 %v132_v39  ;;  %v7528_v39 = vld [vmem:[%s9912_s0 + $0xc0] ss:$8 sps:$4 sm:$0xff]  }
  0x1a   :  { %5070 = vmatprep.subr.bf16.mxu0 %v141_v41  ;;  %7096 = vmatprep.subr.bf16.mxu1 %v141_v41  ;;  %v7511_v41 = vld [vmem:[%s9912_s0 + $0x54] ss:$8 sps:$4 sm:$0xff]  }
  0x1d   :  { %5071 = vmatpush3.bf16.msra.mxu0 %v133_v45  ;;  %7104 = vmatpush3.bf16.msra.mxu1 %v133_v45  ;;  %v7531_v45 = vld [vmem:[%s9912_s0 + $0xd0] ss:$8 sps:$4 sm:$0xff]  }
  0x1e   :  { %5072 = vmatprep.subr.bf16.mxu0 %v142_v47  ;;  %7097 = vmatprep.subr.bf16.mxu1 %v142_v47  ;;  %v7517_v47 = vld [vmem:[%s9912_s0 + $0x64] ss:$8 sps:$4 sm:$0xff]  }
  0x21   :  { %5073 = vmatpush3.bf16.msra.mxu0 %v134_v49  ;;  %7105 = vmatpush3.bf16.msra.mxu1 %v134_v49  ;;  %v7532_v49 = vld [vmem:[%s9912_s0 + $0xe4] ss:$8 sps:$4 sm:$0xff]  }
  0x22   :  { %6707 = vmatprep.subr.bf16.mxu1 %v7795_v3 }
  0x24   :  { %400 = vmatmul.mubr.bf16.vlgmr.msra.gmra.mrb[0].mxu0 %v7490_v50  ;;  %464 = vmatmul.mubr.bf16.vlgmr.msra.gmra.mrb[0].mxu1 %v7502_v52  ;;  %v7519_v50 = vld [vmem:[%s9912_s0 + $0x60] ss:$8 sps:$4 sm:$0xff]   ;;  %v7523_v52 = vld [vmem:[%s9912_s0 + $0x74] ss:$8 sps:$4 sm:$0xff]  }
  0x25   :  { %407 = vmatprep.mubr.bf16.mxu0 %v7493_v51  ;;  %471 = vmatprep.mubr.bf16.mxu1 %v7508_v53  ;;  %v7534_v51 = vld [vmem:[%s9912_s0 + $0xe0] ss:$8 sps:$4 sm:$0xff]   ;;  %v7535_v53 = vld [vmem:[%s9912_s0 + $0xf4] ss:$8 sps:$4 sm:$0xff]  }
  0x26   :  { %6709 = vmatpush3.bf16.msra.mxu1 %v7795_v3 }
  0x27   :  { %6711 = vmatprep.subr.bf16.mxu1 %v7801_v6 }
  0x2a   :  { %6713 = vmatpush3.bf16.msra.mxu1 %v7801_v6 }
  0x2b   :  { %6715 = vmatprep.subr.bf16.mxu1 %v7836_v24 }
  0x2c   :  { %408 = vmatmul.mubr.bf16.gmra.mrb[4].mxu0 %v7495_v14  ;;  %472 = vmatmul.mubr.bf16.gmra.mrb[4].mxu1 %v7510_v17  ;;  %v7525_v14 = vld [vmem:[%s9912_s0 + $0x70] ss:$8 sps:$4 sm:$0xff]  }
  0x2d   :  { %415 = vmatprep.mubr.bf16.mxu0 %v7496_v20  ;;  %479 = vmatprep.mubr.bf16.mxu1 %v7514_v23  ;;  %v7537_v17 = vld [vmem:[%s9912_s0 + $0xf0] ss:$8 sps:$4 sm:$0xff]   ;;  %v7918_v20 = vld [vmem:[%s9913_s2 + $0x40] sm:$0xff]  ;;  %v7923_v23 = vld [vmem:[%s9913_s2 + $0x48] sm:$0xff] }
  0x2e   :  { %6717 = vmatpush3.bf16.msra.mxu1 %v7836_v24 }
  0x2f   :  { %6719 = vmatprep.subr.bf16.mxu1 %v7843_v25 }
  0x32   :  { %6721 = vmatpush3.bf16.msra.mxu1 %v7843_v25 }
  0x34   :  { %416 = vmatmul.mubr.bf16.gmra.mrb[8].mxu0 %v7498_v26  ;;  %480 = vmatmul.mubr.bf16.gmra.mrb[8].mxu1 %v7516_v28  ;;  %v9927_v26 = vand.u32 4294901760, %v7918_v20  ;;  %v9926_v28 = vand.u32 4294901760, %v7923_v23 }
  0x35   :  { %423 = vmatprep.mubr.bf16.mxu0 %v7499_v30  ;;  %487 = vmatprep.mubr.bf16.mxu1 %v7520_v31  ;;  %v7936_v31 = vld [vmem:[%s9913_s2 + $0x50] sm:$0xff] }
  0x36   :  { %v7931_v30 = vpack.c.bf16 %v9926_v28, %v9927_v26 }
  0x38   :  { %10238 = vst [vmem:[#allocation6_spill] sm:$0xff] %v7931_v30  ;;  %6723 = vmatprep.subr.bf16.mxu1 %v7931_v30 }
  0x39   :  { %6725 = vmatpush3.bf16.msra.mxu1 %v7931_v30 }
  0x3c   :  { %424 = vmatmul.mubr.bf16.gmra.mrb[12].mxu0 %v7501_v33  ;;  %488 = vmatmul.mubr.bf16.gmra.mrb[12].mxu1 %v7522_v35  ;;  %v7941_v33 = vld [vmem:[%s9913_s2 + $0x58] sm:$0xff]  ;;  %v9925_v35 = vand.u32 4294901760, %v7936_v31 }
  0x3d   :  { %431 = vmatprep.mubr.bf16.mxu0 %v7505_v36  ;;  %495 = vmatprep.mubr.bf16.mxu1 %v7526_v37  ;;  %v9924_v36 = vand.u32 4294901760, %v7941_v33 }
  0x3f   :  { %v7951_v37 = vpack.c.bf16 %v9924_v36, %v9925_v35 }
  0x41   :  { %10239 = vst [vmem:[#allocation7_spill] sm:$0xff] %v7951_v37  ;;  %6727 = vmatprep.subr.bf16.mxu1 %v7951_v37 }
  0x42   :  { %6729 = vmatpush3.bf16.msra.mxu1 %v7951_v37 }
  0x44   :  { %432 = vmatmul.mubr.bf16.gmra.mrb[16].mxu0 %v7507_v38  ;;  %496 = vmatmul.mubr.bf16.gmra.mrb[16].mxu1 %v7528_v39  ;;  %v7956_v38 = vld [vmem:[%s9913_s2 + $0x60] sm:$0xff]  ;;  %v7961_v39 = vld [vmem:[%s9913_s2 + $0x68] sm:$0xff] }
  0x45   :  { %439 = vmatprep.mubr.bf16.mxu0 %v7511_v41  ;;  %503 = vmatprep.mubr.bf16.mxu1 %v7529_v43  ;;  %v9923_v41 = vand.u32 4294901760, %v7956_v38  ;;  %v9920_v43 = vand.u32 4294901760, %v7961_v39 }
  0x4c   :  { %440 = vmatmul.mubr.bf16.gmra.mrb[20].mxu0 %v7513_v44  ;;  %504 = vmatmul.mubr.bf16.gmra.mrb[20].mxu1 %v7531_v45  ;;  %v7971_v44 = vpack.c.bf16 %v9920_v43, %v9923_v41  ;;  %v7976_v45 = vld [vmem:[%s9913_s2 + $0x70] sm:$0xff] }
  0x4d   :  { %447 = vmatprep.mubr.bf16.mxu0 %v7517_v47  ;;  %511 = vmatprep.mubr.bf16.mxu1 %v7532_v49  ;;  %v7981_v47 = vld [vmem:[%s9913_s2 + $0x78] sm:$0xff]  ;;  %v9919_v49 = vand.u32 4294901760, %v7976_v45 }
  0x4e   :  { %10240 = vst [vmem:[#allocation8_spill] sm:$0xff] %v7971_v44  ;;  %6731 = vmatprep.subr.bf16.mxu1 %v7971_v44 }
  0x4f   :  { %6733 = vmatpush3.bf16.msra.mxu1 %v7971_v44 }
  0x54   :  { %448 = vmatmul.mubr.bf16.gmra.mrb[24].mxu0 %v7519_v50  ;;  %512 = vmatmul.mubr.bf16.gmra.mrb[24].mxu1 %v7534_v51  ;;  %v9918_v50 = vand.u32 4294901760, %v7981_v47 }
  0x55   :  { %455 = vmatprep.mubr.bf16.mxu0 %v7523_v52  ;;  %519 = vmatprep.mubr.bf16.mxu1 %v7535_v53  ;;  %v7998_v52 = vsub.f32 %v7760_v54, %v649_v57  ;;  %v8003_v53 = vsub.f32 %v7765_v55, %v652_v58  ;;  %v8023_v58 = vsub.f32 %v7770_v56, %v655_v60 }
  0x56   :  { %v7991_v51 = vpack.c.bf16 %v9918_v50, %v9919_v49 }
  0x57   :  { %10242 = vst [vmem:[#allocation10_spill] sm:$0xff] %v7998_v52  ;;  %10243 = vst [vmem:[#allocation11_spill] sm:$0xff] %v8003_v53  ;;  %v8018_v55 = vpack.c.bf16 %v8003_v53, %v7998_v52 }
  0x58   :  { %10241 = vst [vmem:[#allocation9_spill] sm:$0xff] %v7991_v51  ;;  %6735 = vmatprep.subr.bf16.mxu1 %v7991_v51  ;;  %10244 = vst [vmem:[#allocation12_spill] sm:$0xff] %v8023_v58 }
  0x59   :  { %6737 = vmatpush3.bf16.msra.mxu1 %v7991_v51 }
  0x5c   :  { %456 = vmatmul.mubr.bf16.gmra.mrb[28].mxu0 %v7525_v14  ;;  %520 = vmatmul.mubr.bf16.gmra.mrb[28].mxu1 %v7537_v17  ;;  %v9921_v14 = vand.u32 4294901760, %v7998_v52  ;;  %v9922_v17 = vand.u32 4294901760, %v8003_v53 }
  0x5e   :  { %v1053_v50 = vsub.f32 %v7998_v52, %v9921_v14  ;;  %v1060_v49 = vsub.f32 %v8003_v53, %v9922_v17  ;;  %v8028_v14 = vsub.f32 %v7777_v59, %v658_v61 }
  0x60   :  { %v1054_v43 = vand.u32 4294901760, %v1053_v50  ;;  %v1061_v54 = vand.u32 4294901760, %v1060_v49  ;;  %10245 = vst [vmem:[#allocation13_spill] sm:$0xff] %v8028_v14  ;;  %v8037_v49 = vsub.f32 %v7784_v62, %v661_v12  ;;  %v8042_v50 = vsub.f32 %v7789_v63, %v664_v13 }
  0x61   :  { %v8053_v62 = vsub.f32 %v7806_v7, %v667_v18  ;;  %v8058_v63 = vsub.f32 %v7811_v8, %v670_v19  ;;  %v10250_v8 = vand.u32 4294901760, %v8023_v58 }
  0x62   :  { %v8013_v57 = vpack.c.bf16 %v1061_v54, %v1054_v43  ;;  %v8032_v43 = vpack.c.bf16 %v8028_v14, %v8023_v58  ;;  %10246 = vst [vmem:[#allocation14_spill] sm:$0xff] %v8037_v49  ;;  %10247 = vst [vmem:[#allocation15_spill] sm:$0xff] %v8042_v50  ;;  %v8046_v56 = vpack.c.bf16 %v8042_v50, %v8037_v49 }
  0x63   :  { %10248 = vst [vmem:[#allocation16_spill] sm:$0xff] %v8053_v62  ;;  %10249 = vst [vmem:[#allocation17_spill] sm:$0xff] %v8058_v63  ;;  %v8065_v41 = vpack.c.bf16 %v8058_v63, %v8053_v62  ;;  %v1067_v19 = vsub.f32 %v8023_v58, %v10250_v8 }
  0x64   :  { %6739 = vmatprep.subr.bf16.mxu1 %v8013_v57 }
  0xf7   :  { %v5074_v59 = vpop.f32.mrb[0].mxu0  ;;  %v5122_v60 = vpop.f32.mrb[0].mxu1 }
  0xf8   :  { %v5075_v54 = vpop.f32.mrb[1].mxu0  ;;  %v5123_v17 = vpop.f32.mrb[1].mxu1 }
  0xf9   :  { %v5076_v12 = vadd.f32 %v5075_v54, %v5074_v59  ;;  %v5077_v13 = vpop.f32.mrb[2].mxu0  ;;  %v8060_v36 = vadd.f32 %v5123_v17, %v5122_v60  ;;  %v5125_v35 = vpop.f32.mrb[2].mxu1  ;;  %v10251_v17 = vand.u32 4294901760, %v8028_v14  ;;  %v1068_v54 = vand.u32 4294901760, %v1067_v19 }
  0xfa   :  { %v5078_v26 = vpop.f32.mrb[3].mxu0  ;;  %v5126_v61 = vpop.f32.mrb[3].mxu1 }
  0xfb   :  { %v528_v7 = vadd.f32 %v5076_v12, %v7596_v2  ;;  %v5079_v18 = vadd.f32 %v5078_v26, %v5077_v13  ;;  %v8068_v53 = vadd.f32 %v5126_v61, %v5125_v35  ;;  %v1074_v59 = vsub.f32 %v8028_v14, %v10251_v17 }
  0xfc   :  { %v10252_v26 = vand.u32 4294901760, %v8037_v49  ;;  %v10253_v61 = vand.u32 4294901760, %v7918_v20  ;;  %v10255_v13 = vand.u32 4294901760, %v7923_v23  ;;  %v10258_v14 = vand.u32 4294901760, %v8042_v50 }
  0xfd   :  { %v8079_v52 = vand.u32 4294901760, %v528_v7  ;;  %v529_v2 = vadd.f32 %v5079_v18, %v7603_v4 }
  0xfe   :  { %v1081_v35 = vsub.f32 %v8037_v49, %v10252_v26  ;;  %v8088_v12 = vsub.f32 %v7918_v20, %v10253_v61  ;;  %v8093_v8 = vsub.f32 %v7923_v23, %v10255_v13  ;;  %v1075_v49 = vand.u32 4294901760, %v1074_v59 }
  0xff   :  { %v8096_v17 = vsub.f32 %v528_v7, %v8079_v52  ;;  %v8098_v28 = vand.u32 4294901760, %v529_v2  ;;  %v5080_v4 = vpop.f32.mrb[4].mxu0  ;;  %v5128_v18 = vpop.f32.mrb[4].mxu1  ;;  %v1088_v20 = vsub.f32 %v8042_v50, %v10258_v14  ;;  %v10259_v61 = vand.u32 4294901760, %v8053_v62 }
 0x100   :  { %10254 = vst [vmem:[#allocation18_spill] sm:$0xff] %v8088_v12  ;;  %10256 = vst [vmem:[#allocation19_spill] sm:$0xff] %v8093_v8  ;;  %v5081_v60 = vpop.f32.mrb[5].mxu0  ;;  %v5129_v26 = vpop.f32.mrb[5].mxu1  ;;  %v10260_v7 = vand.u32 4294901760, %v8058_v63  ;;  %v1082_v37 = vand.u32 4294901760, %v1081_v35 }
 0x101   :  { %10257 = vst [vmem:[#allocation20_spill] sm:$0xff] %v8096_v17  ;;  %v8106_v23 = vsub.f32 %v8053_v62, %v10259_v61  ;;  %v8114_v58 = vsub.f32 %v529_v2, %v8098_v28  ;;  %v5082_v19 = vadd.f32 %v5081_v60, %v5080_v4  ;;  %v5083_v51 = vpop.f32.mrb[6].mxu0  ;;  %v9946_v59 = vand.u32 4294901760, %v8096_v17  ;;  %v5131_v44 = vpop.f32.mrb[6].mxu1 }
 0x102   :  { %v8111_v13 = vsub.f32 %v8058_v63, %v10260_v7  ;;  %v5084_v14 = vpop.f32.mrb[7].mxu0  ;;  %v8117_v50 = vadd.f32 %v5129_v26, %v5128_v18  ;;  %v5132_v30 = vpop.f32.mrb[7].mxu1  ;;  %v8123_v7 = vpack.c.bf16 %v8093_v8, %v8088_v12  ;;  %v1089_v26 = vand.u32 4294901760, %v1088_v20 }
 0x103   :  { %10261 = vst [vmem:[#allocation21_spill] sm:$0xff] %v8114_v58  ;;  %v9947_v2 = vand.u32 4294901760, %v8114_v58  ;;  %v530_v60 = vadd.f32 %v5082_v19, %v7619_v9  ;;  %v5085_v4 = vadd.f32 %v5084_v14, %v5083_v51  ;;  %v732_v35 = vsub.f32 %v8096_v17, %v9946_v59 }
 0x104   :  { %v8130_v18 = vadd.f32 %v5132_v30, %v5131_v44  ;;  %v10262_v61 = vand.u32 4294901760, %v7936_v31  ;;  %v10264_v63 = vand.u32 4294901760, %v7941_v33  ;;  %v6742_v20 = vpack.c.bf16 %v1075_v49, %v1068_v54 }
 0x105   :  { %v742_v9 = vsub.f32 %v8114_v58, %v9947_v2  ;;  %v8145_v51 = vand.u32 4294901760, %v530_v60  ;;  %v531_v30 = vadd.f32 %v5085_v4, %v7624_v10  ;;  %v733_v44 = vand.u32 4294901760, %v732_v35 }
 0x106   :  { %v8135_v62 = vsub.f32 %v7936_v31, %v10262_v61  ;;  %v8140_v25 = vsub.f32 %v7941_v33, %v10264_v63  ;;  %v1096_v19 = vand.u32 4294901760, %v8106_v23  ;;  %v10266_v31 = vand.u32 4294901760, %v8088_v12 }
 0x107   :  { %v10267_v61 = vand.u32 4294901760, %v8093_v8  ;;  %v743_v63 = vand.u32 4294901760, %v742_v9  ;;  %v8156_v59 = vsub.f32 %v530_v60, %v8145_v51  ;;  %v8158_v2 = vand.u32 4294901760, %v531_v30  ;;  %v5086_v24 = vpop.f32.mrb[8].mxu0  ;;  %5778 = vmatprep.mubr.f32.mxu1 %v733_v44  ;;  %v5134_v10 = vpop.f32.mrb[8].mxu1 }
 0x108   :  { %10263 = vst [vmem:[#allocation22_spill] sm:$0xff] %v8135_v62  ;;  %10265 = vst [vmem:[#allocation23_spill] sm:$0xff] %v8140_v25  ;;  %v1109_v14 = vsub.f32 %v8088_v12, %v10266_v31  ;;  %v1103_v49 = vand.u32 4294901760, %v8111_v13  ;;  %v5087_v54 = vpop.f32.mrb[9].mxu0  ;;  %v5135_v23 = vpop.f32.mrb[9].mxu1  ;;  %v6746_v4 = vpack.c.bf16 %v1089_v26, %v1082_v37 }
 0x109   :  { %v1116_v33 = vsub.f32 %v8093_v8, %v10267_v61  ;;  %10268 = vst [vmem:[#allocation24_spill] sm:$0xff] %v8156_v59  ;;  %v10269_v61 = vand.u32 4294901760, %v7956_v38  ;;  %v8169_v60 = vsub.f32 %v531_v30, %v8158_v2  ;;  %v5088_v8 = vadd.f32 %v5087_v54, %v5086_v24  ;;  %v5089_v44 = vpop.f32.mrb[10].mxu0  ;;  %5779 = vmatmul.mubr.f32.vlgmr.msra.gmra.mrb[32].mxu1 %v743_v63  ;;  %v5137_v37 = vpop.f32.mrb[10].mxu1 }
 0x10a   :  { %v9954_v13 = vand.u32 4294901760, %v8156_v59  ;;  %v8172_v12 = vadd.f32 %v5135_v23, %v5134_v10  ;;  %v5090_v26 = vpop.f32.mrb[11].mxu0  ;;  %v5138_v35 = vpop.f32.mrb[11].mxu1  ;;  %6741 = vmatpush3.bf16.msra.mxu1 %v8013_v57  ;;  %v1110_v31 = vand.u32 4294901760, %v1109_v14  ;;  %v8182_v24 = vpack.c.bf16 %v8140_v25, %v8135_v62 }
 0x10b   :  { %v8166_v9 = vsub.f32 %v7956_v38, %v10269_v61  ;;  %10271 = vst [vmem:[#allocation26_spill] sm:$0xff] %v8169_v60  ;;  %v1117_v6 = vand.u32 4294901760, %v1116_v33  ;;  %v10272_v38 = vand.u32 4294901760, %v7961_v39  ;;  %v532_v30 = vadd.f32 %v5088_v8, %v7640_v15  ;;  %6743 = vmatprep.subr.bf16.mxu1 %v6742_v20 }
 0x10c   :  { %v5091_v63 = vadd.f32 %v5090_v26, %v5089_v44  ;;  %v752_v10 = vsub.f32 %v8156_v59, %v9954_v13  ;;  %v9955_v57 = vand.u32 4294901760, %v8169_v60  ;;  %v8189_v14 = vadd.f32 %v5138_v35, %v5137_v37 }
 0x10d   :  { %10270 = vst [vmem:[#allocation25_spill] sm:$0xff] %v8166_v9  ;;  %v8178_v61 = vsub.f32 %v7961_v39, %v10272_v38  ;;  %v10274_v33 = vand.u32 4294901760, %v8135_v62  ;;  %v10275_v54 = vand.u32 4294901760, %v8140_v25  ;;  %v8198_v8 = vand.u32 4294901760, %v532_v30 }
 0x10e   :  { %v533_v44 = vadd.f32 %v5091_v63, %v7645_v16  ;;  %v753_v26 = vand.u32 4294901760, %v752_v10  ;;  %v762_v35 = vsub.f32 %v8169_v60, %v9955_v57  ;;  %6745 = vmatpush3.bf16.msra.mxu1 %v6742_v20  ;;  %v10276_v38 = vand.u32 4294901760, %v7976_v45 }
 0x10f   :  { %10273 = vst [vmem:[#allocation27_spill] sm:$0xff] %v8178_v61  ;;  %v1123_v39 = vsub.f32 %v8135_v62, %v10274_v33  ;;  %v1130_v23 = vsub.f32 %v8140_v25, %v10275_v54  ;;  %v10277_v54 = vand.u32 4294901760, %v7981_v47  ;;  %v8216_v16 = vsub.f32 %v532_v30, %v8198_v8  ;;  %v5092_v10 = vpop.f32.mrb[12].mxu0  ;;  %v5140_v57 = vpop.f32.mrb[12].mxu1  ;;  %6747 = vmatprep.subr.bf16.mxu1 %v6746_v4 }
 0x110   :  { %v8208_v33 = vsub.f32 %v7976_v45, %v10276_v38  ;;  %v8218_v63 = vand.u32 4294901760, %v533_v44  ;;  %5781 = vmatprep.mubr.f32.mxu1 %v753_v26  ;;  %v763_v20 = vand.u32 4294901760, %v762_v35  ;;  %v6750_v37 = vpack.c.bf16 %v1103_v49, %v1096_v19  ;;  %v5093_v15 = vpop.f32.mrb[13].mxu0  ;;  %v5141_v25 = vpop.f32.mrb[13].mxu1 }
 0x111   :  { %v8213_v13 = vsub.f32 %v7981_v47, %v10277_v54  ;;  %10278 = vst [vmem:[#allocation28_spill] sm:$0xff] %v8216_v16  ;;  %v6754_v45 = vpack.c.bf16 %v1117_v6, %v1110_v31  ;;  %v1124_v38 = vand.u32 4294901760, %v1123_v39  ;;  %v1131_v62 = vand.u32 4294901760, %v1130_v23  ;;  %v5095_v59 = vpop.f32.mrb[14].mxu0  ;;  %v5143_v19 = vpop.f32.mrb[14].mxu1 }
 0x112   :  { %v10279_v60 = vand.u32 4294901760, %v8166_v9  ;;  %v8224_v30 = vsub.f32 %v533_v44, %v8218_v63  ;;  %v5094_v54 = vadd.f32 %v5093_v15, %v5092_v10  ;;  %5782 = vmatmul.mubr.f32.gmra.mrb[34].mxu1 %v763_v20  ;;  %v9965_v26 = vand.u32 4294901760, %v8216_v16  ;;  %v5096_v49 = vpop.f32.mrb[15].mxu0  ;;  %v5144_v58 = vpop.f32.mrb[15].mxu1 }
 0x113   :  { %v8227_v35 = vadd.f32 %v5141_v25, %v5140_v57  ;;  %6749 = vmatpush3.bf16.msra.mxu1 %v6746_v4  ;;  %v10281_v6 = vand.u32 4294901760, %v8178_v61  ;;  %v8236_v23 = vpack.c.bf16 %v8178_v61, %v8166_v9  ;;  %v5097_v25 = vadd.f32 %v5096_v49, %v5095_v59 }
 0x114   :  { %v1137_v47 = vsub.f32 %v8166_v9, %v10279_v60  ;;  %10280 = vst [vmem:[#allocation29_spill] sm:$0xff] %v8224_v30  ;;  %v9966_v60 = vand.u32 4294901760, %v8208_v33  ;;  %v534_v15 = vadd.f32 %v5094_v54, %v7658_v21  ;;  %v772_v57 = vsub.f32 %v8216_v16, %v9965_v26  ;;  %6751 = vmatprep.subr.bf16.mxu1 %v6750_v37 }
 0x115   :  { %v1144_v31 = vsub.f32 %v8178_v61, %v10281_v6  ;;  %v9964_v4 = vand.u32 4294901760, %v8224_v30  ;;  %v8243_v44 = vadd.f32 %v5144_v58, %v5143_v19  ;;  %v535_v20 = vadd.f32 %v5097_v25, %v7663_v22 }
 0x116   :  { %v8245_v10 = vand.u32 4294901760, %v534_v15  ;;  %v773_v6 = vand.u32 4294901760, %v772_v57  ;;  %v1138_v21 = vand.u32 4294901760, %v1137_v47  ;;  %v1151_v54 = vsub.f32 %v8208_v33, %v9966_v60 }
 0x117   :  { %v782_v39 = vsub.f32 %v8224_v30, %v9964_v4  ;;  %6753 = vmatpush3.bf16.msra.mxu1 %v6750_v37  ;;  %v1145_v59 = vand.u32 4294901760, %v1144_v31  ;;  %v10282_v49 = vand.u32 4294901760, %v8213_v13  ;;  %v8260_v22 = vand.u32 4294901760, %v535_v20  ;;  %v5098_v25 = vpop.f32.mrb[16].mxu0  ;;  %v5146_v4 = vpop.f32.mrb[16].mxu1 }
 0x118   :  { %v8258_v19 = vsub.f32 %v534_v15, %v8245_v10  ;;  %5784 = vmatprep.mubr.f32.mxu1 %v773_v6  ;;  %6755 = vmatprep.subr.bf16.mxu1 %v6754_v45  ;;  %v6758_v37 = vpack.c.bf16 %v1131_v62, %v1124_v38  ;;  %v5099_v47 = vpop.f32.mrb[17].mxu0  ;;  %v5147_v31 = vpop.f32.mrb[17].mxu1  ;;  %v1152_v6 = vand.u32 4294901760, %v1151_v54 }
 0x119   :  { %v1158_v58 = vsub.f32 %v8213_v13, %v10282_v49  ;;  %v783_v57 = vand.u32 4294901760, %v782_v39  ;;  %v8263_v26 = vsub.f32 %v535_v20, %v8260_v22  ;;  %v5100_v60 = vadd.f32 %v5099_v47, %v5098_v25  ;;  %v5101_v61 = vpop.f32.mrb[18].mxu0  ;;  %v5149_v9 = vpop.f32.mrb[18].mxu1 }
 0x11a   :  { %v9978_v49 = vand.u32 4294901760, %v8258_v19  ;;  %v8266_v15 = vadd.f32 %v5147_v31, %v5146_v4  ;;  %v5102_v30 = vpop.f32.mrb[19].mxu0  ;;  %v5150_v16 = vpop.f32.mrb[19].mxu1  ;;  %v6762_v39 = vpack.c.bf16 %v1145_v59, %v1138_v21 }
 0x11b   :  { %10283 = vst [vmem:[#allocation30_spill] sm:$0xff] %v8263_v26  ;;  %5785 = vmatmul.mubr.f32.gmra.mrb[36].mxu1 %v783_v57  ;;  %v1159_v17 = vand.u32 4294901760, %v1158_v58  ;;  %v536_v62 = vadd.f32 %v5100_v60, %v7679_v27  ;;  %v5103_v38 = vadd.f32 %v5102_v30, %v5101_v61  ;;  %v9975_v25 = vand.u32 4294901760, %v8263_v26 }
 0x11c   :  { %6757 = vmatpush3.bf16.msra.mxu1 %v6754_v45  ;;  %v792_v20 = vsub.f32 %v8258_v19, %v9978_v49  ;;  %v8273_v57 = vadd.f32 %v5150_v16, %v5149_v9 }
 0x11d   :  { %6759 = vmatprep.subr.bf16.mxu1 %v6758_v37  ;;  %v8275_v4 = vand.u32 4294901760, %v536_v62  ;;  %v537_v47 = vadd.f32 %v5103_v38, %v7684_v29  ;;  %v802_v21 = vsub.f32 %v8263_v26, %v9975_v25  ;;  %v6766_v16 = vpack.c.bf16 %v1159_v17, %v1152_v6 }
 0x11e   :  { %v793_v45 = vand.u32 4294901760, %v792_v20 }
 0x11f   :  { %v8282_v27 = vsub.f32 %v536_v62, %v8275_v4  ;;  %v8284_v61 = vand.u32 4294901760, %v537_v47  ;;  %v5104_v30 = vpop.f32.mrb[20].mxu0  ;;  %v803_v60 = vand.u32 4294901760, %v802_v21  ;;  %v5152_v9 = vpop.f32.mrb[20].mxu1 }
 0x120   :  { %6761 = vmatpush3.bf16.msra.mxu1 %v6758_v37  ;;  %5787 = vmatprep.mubr.f32.mxu1 %v793_v45  ;;  %v5105_v59 = vpop.f32.mrb[21].mxu0  ;;  %v5153_v54 = vpop.f32.mrb[21].mxu1 }
 0x121   :  { %10284 = vst [vmem:[#allocation31_spill] sm:$0xff] %v8282_v27  ;;  %6763 = vmatprep.subr.bf16.mxu1 %v6762_v39  ;;  %v8287_v29 = vsub.f32 %v537_v47, %v8284_v61  ;;  %v5106_v58 = vadd.f32 %v5105_v59, %v5104_v30  ;;  %v5107_v31 = vpop.f32.mrb[22].mxu0  ;;  %5788 = vmatmul.mubr.f32.gmra.mrb[38].mxu1 %v803_v60  ;;  %v9977_v37 = vand.u32 4294901760, %v8282_v27  ;;  %v5155_v38 = vpop.f32.mrb[22].mxu1 }
 0x122   :  { %v8290_v62 = vadd.f32 %v5153_v54, %v5152_v9  ;;  %v5108_v20 = vpop.f32.mrb[23].mxu0  ;;  %v5156_v25 = vpop.f32.mrb[23].mxu1 }
 0x123   :  { %10285 = vst [vmem:[#allocation32_spill] sm:$0xff] %v8287_v29  ;;  %v538_v45 = vadd.f32 %v5106_v58, %v7695_v32  ;;  %v5109_v21 = vadd.f32 %v5108_v20, %v5107_v31  ;;  %v812_v17 = vsub.f32 %v8282_v27, %v9977_v37  ;;  %v9976_v6 = vand.u32 4294901760, %v8287_v29 }
 0x124   :  { %6765 = vmatpush3.bf16.msra.mxu1 %v6762_v39  ;;  %v8297_v47 = vadd.f32 %v5156_v25, %v5155_v38 }
 0x125   :  { %6767 = vmatprep.subr.bf16.mxu1 %v6766_v16  ;;  %v8299_v30 = vand.u32 4294901760, %v538_v45  ;;  %v539_v60 = vadd.f32 %v5109_v21, %v7702_v34  ;;  %v813_v9 = vand.u32 4294901760, %v812_v17  ;;  %v822_v39 = vsub.f32 %v8287_v29, %v9976_v6 }
 0x127   :  { %v8306_v32 = vsub.f32 %v538_v45, %v8299_v30  ;;  %v8308_v59 = vand.u32 4294901760, %v539_v60  ;;  %v5110_v54 = vpop.f32.mrb[24].mxu0  ;;  %5790 = vmatprep.mubr.f32.mxu1 %v813_v9  ;;  %v823_v58 = vand.u32 4294901760, %v822_v39  ;;  %v5158_v25 = vpop.f32.mrb[24].mxu1 }
 0x128   :  { %6769 = vmatpush3.bf16.msra.mxu1 %v6766_v16  ;;  %v5111_v31 = vpop.f32.mrb[25].mxu0  ;;  %v5159_v38 = vpop.f32.mrb[25].mxu1 }
 0x129   :  { %10286 = vst [vmem:[#allocation33_spill] sm:$0xff] %v8306_v32  ;;  %10287 = vst [vmem:[#allocation34_spill] sm:$0xff] %v8308_v59  ;;  %6771 = vmatprep.subr.bf16.mxu1 %v8018_v55  ;;  %v8312_v34 = vsub.f32 %v539_v60, %v8308_v59  ;;  %v5112_v20 = vadd.f32 %v5111_v31, %v5110_v54  ;;  %v5113_v21 = vpop.f32.mrb[26].mxu0  ;;  %5791 = vmatmul.mubr.f32.gmra.mrb[40].mxu1 %v823_v58  ;;  %v9980_v16 = vand.u32 4294901760, %v8306_v32  ;;  %v5161_v17 = vpop.f32.mrb[26].mxu1 }
 0x12a   :  { %v8315_v45 = vadd.f32 %v5159_v38, %v5158_v25  ;;  %v5114_v6 = vpop.f32.mrb[27].mxu0  ;;  %v5162_v37 = vpop.f32.mrb[27].mxu1  ;;  %v544_v54 = vadd.f32 %v8060_v36, %v7586_v0 }
 0x12b   :  { %10288 = vst [vmem:[#allocation35_spill] sm:$0xff] %v8312_v34  ;;  %v540_v9 = vadd.f32 %v5112_v20, %v7718_v40  ;;  %v5115_v39 = vadd.f32 %v5114_v6, %v5113_v21  ;;  %v832_v49 = vsub.f32 %v8306_v32, %v9980_v16  ;;  %v9979_v60 = vand.u32 4294901760, %v8312_v34 }
 0x12c   :  { %v8324_v58 = vadd.f32 %v5162_v37, %v5161_v17  ;;  %v545_v6 = vadd.f32 %v8068_v53, %v7591_v1  ;;  %v8339_v17 = vand.u32 4294901760, %v544_v54 }
 0x12d   :  { %v8326_v31 = vand.u32 4294901760, %v540_v9  ;;  %v541_v25 = vadd.f32 %v5115_v39, %v7723_v42  ;;  %v833_v38 = vand.u32 4294901760, %v832_v49  ;;  %v842_v40 = vsub.f32 %v8312_v34, %v9979_v60  ;;  %v7538_v34 = vld [vmem:[%s9911_s1 + $0x98] sm:$0xff] }
 0x12e   :  { %10292 = vst [vmem:[#allocation39_spill] sm:$0xff] %v8339_v17  ;;  %v546_v42 = vadd.f32 %v8117_v50, %v7608_v5  ;;  %v547_v5 = vadd.f32 %v7538_v34, %v8130_v18  ;;  %v548_v50 = vadd.f32 %v8172_v12, %v7629_v11  ;;  %v8363_v32 = vsub.f32 %v544_v54, %v8339_v17  ;;  %v7539_v54 = vld [vmem:[%s9911_s1 + $0xa8] sm:$0xff] }
 0x12f   :  { %10289 = vst [vmem:[#allocation36_spill] sm:$0xff] %v8326_v31  ;;  %v8335_v20 = vsub.f32 %v540_v9, %v8326_v31  ;;  %v8337_v21 = vand.u32 4294901760, %v541_v25  ;;  %v5116_v0 = vpop.f32.mrb[28].mxu0  ;;  %5793 = vmatprep.mubr.f32.mxu1 %v833_v38  ;;  %v843_v36 = vand.u32 4294901760, %v842_v40  ;;  %v5164_v37 = vpop.f32.mrb[28].mxu1  ;;  %v8349_v40 = vand.u32 4294901760, %v545_v6 }
 0x130   :  { %v5117_v49 = vpop.f32.mrb[29].mxu0  ;;  %v5165_v39 = vpop.f32.mrb[29].mxu1  ;;  %10295 = vst [vmem:[#allocation42_spill] sm:$0xff] %v8363_v32  ;;  %v8365_v29 = vand.u32 4294901760, %v546_v42 }
 0x131   :  { %10290 = vst [vmem:[#allocation37_spill] sm:$0xff] %v8335_v20  ;;  %10291 = vst [vmem:[#allocation38_spill] sm:$0xff] %v8337_v21  ;;  %v8344_v60 = vsub.f32 %v541_v25, %v8337_v21  ;;  %v5118_v1 = vadd.f32 %v5117_v49, %v5116_v0  ;;  %v5119_v53 = vpop.f32.mrb[30].mxu0  ;;  %5794 = vmatmul.mubr.f32.gmra.mrb[42].mxu1 %v843_v36  ;;  %v9988_v9 = vand.u32 4294901760, %v8335_v20  ;;  %v5167_v38 = vpop.f32.mrb[30].mxu1 }
 0x132   :  { %v8347_v16 = vadd.f32 %v5165_v39, %v5164_v37  ;;  %10294 = vst [vmem:[#allocation41_spill] sm:$0xff] %v8349_v40  ;;  %v5120_v25 = vpop.f32.mrb[31].mxu0  ;;  %v5168_v0 = vpop.f32.mrb[31].mxu1  ;;  %10296 = vst [vmem:[#allocation43_spill] sm:$0xff] %v8365_v29 }
 0x133   :  { %10293 = vst [vmem:[#allocation40_spill] sm:$0xff] %v8344_v60  ;;  %v542_v36 = vadd.f32 %v5118_v1, %v7736_v46  ;;  %v5121_v49 = vadd.f32 %v5120_v25, %v5119_v53  ;;  %v852_v37 = vsub.f32 %v8335_v20, %v9988_v9  ;;  %v9987_v39 = vand.u32 4294901760, %v8344_v60 }
 0x134   :  { %v8367_v18 = vadd.f32 %v5168_v0, %v5167_v38  ;;  %v8376_v1 = vsub.f32 %v545_v6, %v8349_v40  ;;  %v8378_v53 = vand.u32 4294901760, %v547_v5  ;;  %v549_v38 = vadd.f32 %v7539_v54, %v8189_v14  ;;  %v7542_v14 = vld [vmem:[%s9911_s1 + $0xc0] sm:$0xff] }
 0x135   :  { %v8369_v34 = vand.u32 4294901760, %v542_v36  ;;  %v543_v11 = vadd.f32 %v5121_v49, %v7741_v48  ;;  %v853_v12 = vand.u32 4294901760, %v852_v37  ;;  %v862_v46 = vsub.f32 %v8344_v60, %v9987_v39  ;;  %v7540_v48 = vld [vmem:[%s9911_s1 + $0xb0] sm:$0xff] }
 0x136   :  { %10298 = vst [vmem:[#allocation45_spill] sm:$0xff] %v8376_v1  ;;  %10299 = vst [vmem:[#allocation46_spill] sm:$0xff] %v8378_v53  ;;  %v550_v25 = vadd.f32 %v7540_v48, %v8227_v35  ;;  %v8388_v0 = vand.u32 4294901760, %v548_v50  ;;  %v8396_v39 = vsub.f32 %v546_v42, %v8365_v29  ;;  %v8404_v48 = vsub.f32 %v547_v5, %v8378_v53  ;;  %v7541_v42 = vld [vmem:[%s9911_s1 + $0xb8] sm:$0xff] }
 0x137   :  { %10297 = vst [vmem:[#allocation44_spill] sm:$0xff] %v8369_v34  ;;  %v8391_v49 = vsub.f32 %v542_v36, %v8369_v34  ;;  %v8393_v6 = vand.u32 4294901760, %v543_v11  ;;  %5796 = vmatprep.mubr.f32.mxu1 %v853_v12  ;;  %v863_v37 = vand.u32 4294901760, %v862_v46  ;;  %v8406_v36 = vand.u32 4294901760, %v549_v38 }
 0x138   :  { %10300 = vst [vmem:[#allocation47_spill] sm:$0xff] %v8388_v0  ;;  %10303 = vst [vmem:[#allocation50_spill] sm:$0xff] %v8396_v39  ;;  %v8408_v9 = vand.u32 4294901760, %v550_v25  ;;  %v551_v12 = vadd.f32 %v7541_v42, %v8243_v44  ;;  %v8415_v46 = vsub.f32 %v548_v50, %v8388_v0  ;;  %v552_v60 = vadd.f32 %v7542_v14, %v8266_v15  ;;  %v7544_v15 = vld [vmem:[%s9911_s1 + $0xd0] sm:$0xff] }
 0x139   :  { %10301 = vst [vmem:[#allocation48_spill] sm:$0xff] %v8391_v49  ;;  %10302 = vst [vmem:[#allocation49_spill] sm:$0xff] %v8393_v6  ;;  %v8400_v54 = vsub.f32 %v543_v11, %v8393_v6  ;;  %5797 = vmatmul.mubr.f32.gmra.mrb[44].mxu1 %v863_v37  ;;  %v9993_v35 = vand.u32 4294901760, %v8391_v49  ;;  %v10309_v20 = vand.u32 4294901760, %v8363_v32  ;;  %v10315_v26 = vand.u32 4294901760, %v8396_v39 }
 0x13a   :  { %10305 = vst [vmem:[#allocation52_spill] sm:$0xff] %v8404_v48  ;;  %10306 = vst [vmem:[#allocation53_spill] sm:$0xff] %v8406_v36  ;;  %v8437_v37 = vsub.f32 %v550_v25, %v8408_v9  ;;  %v8439_v27 = vand.u32 4294901760, %v551_v12  ;;  %v8450_v25 = vand.u32 4294901760, %v552_v60 }
 0x13b   :  { %10304 = vst [vmem:[#allocation51_spill] sm:$0xff] %v8400_v54  ;;  %10307 = vst [vmem:[#allocation54_spill] sm:$0xff] %v8408_v9  ;;  %v872_v11 = vsub.f32 %v8391_v49, %v9993_v35  ;;  %v9998_v5 = vand.u32 4294901760, %v8400_v54  ;;  %v892_v44 = vsub.f32 %v8363_v32, %v10309_v20  ;;  %v8434_v49 = vsub.f32 %v549_v38, %v8406_v36  ;;  %v7543_v20 = vld [vmem:[%s9911_s1 + $0xc8] sm:$0xff] }
 0x13c   :  { %10308 = vst [vmem:[#allocation55_spill] sm:$0xff] %v8415_v46  ;;  %10311 = vst [vmem:[#allocation57_spill] sm:$0xff] %v8437_v37  ;;  %v553_v14 = vadd.f32 %v7543_v20, %v8273_v57  ;;  %v554_v32 = vadd.f32 %v7544_v15, %v8290_v62  ;;  %v912_v57 = vsub.f32 %v8396_v39, %v10315_v26  ;;  %v7545_v62 = vld [vmem:[%s9911_s1 + $0xd8] sm:$0xff] }
 0x13d   :  { %v873_v42 = vand.u32 4294901760, %v872_v11  ;;  %v882_v35 = vsub.f32 %v8400_v54, %v9998_v5  ;;  %10310 = vst [vmem:[#allocation56_spill] sm:$0xff] %v8434_v49  ;;  %10312 = vst [vmem:[#allocation58_spill] sm:$0xff] %v8439_v27  ;;  %v10313_v5 = vand.u32 4294901760, %v8376_v1  ;;  %v893_v54 = vand.u32 4294901760, %v892_v44 }
 0x13e   :  { %10314 = vst [vmem:[#allocation59_spill] sm:$0xff] %v8450_v25  ;;  %v555_v26 = vadd.f32 %v7545_v62, %v8297_v47  ;;  %v8477_v15 = vsub.f32 %v552_v60, %v8450_v25  ;;  %v913_v20 = vand.u32 4294901760, %v912_v57  ;;  %v59_v47 = vld [vmem:[%s9911_s1 + $0xf0] sm:$0xff]  ;;  %v10320_v62 = vand.u32 4294901760, %v8434_v49 }
 0x13f   :  { %5799 = vmatprep.mubr.f32.mxu1 %v873_v42  ;;  %v883_v11 = vand.u32 4294901760, %v882_v35  ;;  %v902_v38 = vsub.f32 %v8376_v1, %v10313_v5  ;;  %v8460_v35 = vsub.f32 %v551_v12, %v8439_v27  ;;  %v10316_v5 = vand.u32 4294901760, %v8404_v48 }
 0x140   :  { %v8467_v1 = vand.u32 4294901760, %v553_v14  ;;  %v10318_v12 = vand.u32 4294901760, %v8415_v46  ;;  %v942_v60 = vsub.f32 %v8434_v49, %v10320_v62  ;;  %v8498_v57 = vand.u32 4294901760, %v555_v26 }
 0x141   :  { %5800 = vmatmul.mubr.f32.gmra.mrb[46].mxu1 %v883_v11  ;;  %v922_v42 = vsub.f32 %v8404_v48, %v10316_v5  ;;  %v903_v44 = vand.u32 4294901760, %v902_v38  ;;  %v8479_v11 = vand.u32 4294901760, %v554_v32  ;;  %v7546_v5 = vld [vmem:[%s9911_s1 + $0xe0] sm:$0xff]  ;;  %v10017_v48 = vand.u32 4294901760, %v8477_v15 }
 0x142   :  { %5802 = vmatprep.mubr.f32.mxu1 %v893_v54  ;;  %10317 = vst [vmem:[#allocation60_spill] sm:$0xff] %v8467_v1  ;;  %v932_v54 = vsub.f32 %v8415_v46, %v10318_v12  ;;  %v556_v50 = vadd.f32 %v7546_v5, %v8315_v45  ;;  %v10321_v12 = vand.u32 4294901760, %v8437_v37  ;;  %v8496_v45 = vsub.f32 %v553_v14, %v8467_v1  ;;  %v60_v14 = vld [vmem:[%s9911_s1 + $0xf8] sm:$0xff] }
 0x143   :  { %10319 = vst [vmem:[#allocation61_spill] sm:$0xff] %v8479_v11  ;;  %v923_v38 = vand.u32 4294901760, %v922_v42  ;;  %10323 = vst [vmem:[#allocation63_spill] sm:$0xff] %v8498_v57  ;;  %v8505_v5 = vsub.f32 %v554_v32, %v8479_v11  ;;  %v8518_v32 = vsub.f32 %v555_v26, %v8498_v57 }
 0x144   :  { %v952_v46 = vsub.f32 %v8437_v37, %v10321_v12  ;;  %10322 = vst [vmem:[#allocation62_spill] sm:$0xff] %v8496_v45  ;;  %v8507_v62 = vand.u32 4294901760, %v556_v50  ;;  %v558_v12 = vadd.f32 %v8347_v16, %v59_v47  ;;  %v943_v37 = vand.u32 4294901760, %v942_v60 }
 0x145   :  { %5803 = vmatmul.mubr.f32.gmra.mrb[48].mxu1 %v903_v44  ;;  %v933_v44 = vand.u32 4294901760, %v932_v54  ;;  %v559_v16 = vadd.f32 %v8367_v18, %v60_v14  ;;  %v10018_v47 = vand.u32 4294901760, %v8496_v45  ;;  %v10021_v60 = vand.u32 4294901760, %v8505_v5 }
 0x146   :  { %5805 = vmatprep.mubr.f32.mxu1 %v913_v20  ;;  %v7547_v20 = vld [vmem:[%s9911_s1 + $0xe8] sm:$0xff]  ;;  %10324 = vst [vmem:[#allocation64_spill] sm:$0xff] %v8507_v62  ;;  %v953_v49 = vand.u32 4294901760, %v952_v46  ;;  %v8525_v39 = vsub.f32 %v556_v50, %v8507_v62  ;;  %v972_v46 = vsub.f32 %v8477_v15, %v10017_v48  ;;  %v10022_v14 = vand.u32 4294901760, %v8518_v32 }
 0x147   :  { %v557_v42 = vadd.f32 %v7547_v20, %v8324_v58  ;;  %v10325_v58 = vand.u32 4294901760, %v8460_v35  ;;  %v8536_v18 = vand.u32 4294901760, %v559_v16  ;;  %v982_v50 = vsub.f32 %v8496_v45, %v10018_v47 }
 0x148   :  { %v973_v48 = vand.u32 4294901760, %v972_v46  ;;  %v1002_v47 = vsub.f32 %v8518_v32, %v10022_v14 }
 0x149   :  { %5806 = vmatmul.mubr.f32.gmra.mrb[50].mxu1 %v923_v38  ;;  %v962_v54 = vsub.f32 %v8460_v35, %v10325_v58  ;;  %v8520_v20 = vand.u32 4294901760, %v557_v42  ;;  %v8527_v38 = vand.u32 4294901760, %v558_v12  ;;  %10328 = vst [vmem:[#allocation67_spill] sm:$0xff] %v8536_v18 }
 0x14a   :  { %5808 = vmatprep.mubr.f32.mxu1 %v933_v44 }
 0x14b   :  { %10326 = vst [vmem:[#allocation65_spill] sm:$0xff] %v8520_v20  ;;  %10327 = vst [vmem:[#allocation66_spill] sm:$0xff] %v8527_v38  ;;  %v963_v26 = vand.u32 4294901760, %v962_v54  ;;  %v8534_v44 = vsub.f32 %v557_v42, %v8520_v20  ;;  %v8543_v58 = vsub.f32 %v558_v12, %v8527_v38  ;;  %v8550_v42 = vsub.f32 %v559_v16, %v8536_v18 }
 0x14c   :  { %v983_v54 = vand.u32 4294901760, %v982_v50 }
 0x14d   :  { %5809 = vmatmul.mubr.f32.gmra.mrb[52].mxu1 %v943_v37  ;;  %v10026_v37 = vand.u32 4294901760, %v8525_v39  ;;  %v10025_v12 = vand.u32 4294901760, %v8534_v44 }
 0x14e   :  { %5811 = vmatprep.mubr.f32.mxu1 %v953_v49  ;;  %v992_v49 = vsub.f32 %v8505_v5, %v10021_v60  ;;  %v10024_v60 = vand.u32 4294901760, %v8543_v58 }
 0x14f   :  { %v1012_v46 = vsub.f32 %v8525_v39, %v10026_v37  ;;  %v1022_v16 = vsub.f32 %v8534_v44, %v10025_v12  ;;  %v10347_v12 = vld [vmem:[#allocation40_spill] sm:$0xff] }
 0x150   :  { %v993_v45 = vand.u32 4294901760, %v992_v49  ;;  %v1032_v49 = vsub.f32 %v8543_v58, %v10024_v60  ;;  %v10346_v60 = vld [vmem:[#allocation8_spill] sm:$0xff] }
 0x151   :  { %5812 = vmatmul.mubr.f32.gmra.mrb[54].mxu1 %v963_v26  ;;  %v10023_v26 = vand.u32 4294901760, %v8550_v42  ;;  %v1013_v50 = vand.u32 4294901760, %v1012_v46  ;;  %v1023_v14 = vand.u32 4294901760, %v1022_v16  ;;  %v10336_v46 = vld [vmem:[#allocation29_spill] sm:$0xff]  ;;  %v10338_v16 = vld [vmem:[#allocation30_spill] sm:$0xff]  ;;  %v10348_v37 = vld [vmem:[#allocation48_spill] sm:$0xff] }
 0x152   :  { %5814 = vmatprep.mubr.f32.mxu1 %v973_v48  ;;  %v1003_v48 = vand.u32 4294901760, %v1002_v47 }
 0x155   :  { %5815 = vmatmul.mubr.f32.gmra.mrb[56].mxu1 %v983_v54  ;;  %v1042_v54 = vsub.f32 %v8550_v42, %v10023_v26  ;;  %v10345_v26 = vld [vmem:[#allocation37_spill] sm:$0xff] }
 0x156   :  { %5817 = vmatprep.mubr.f32.mxu1 %v993_v45  ;;  %v1033_v45 = vand.u32 4294901760, %v1032_v49  ;;  %v10340_v49 = vld [vmem:[#allocation6_spill] sm:$0xff] }
 0x157   :  { %v1043_v47 = vand.u32 4294901760, %v1042_v54  ;;  %v10341_v54 = vld [vmem:[#allocation32_spill] sm:$0xff] }
 0x159   :  { %5818 = vmatmul.mubr.f32.gmra.mrb[58].mxu1 %v1003_v48  ;;  %v10337_v48 = vld [vmem:[#allocation5_spill] sm:$0xff] }
 0x15a   :  { %5820 = vmatprep.mubr.f32.mxu1 %v1013_v50  ;;  %v10339_v50 = vld [vmem:[#allocation31_spill] sm:$0xff] }
 0x15d   :  { %5821 = vmatmul.mubr.f32.gmra.mrb[60].mxu1 %v1023_v14  ;;  %v10335_v14 = vld [vmem:[#allocation4_spill] sm:$0xff] }
 0x15e   :  { %5823 = vmatprep.mubr.f32.mxu1 %v1033_v45  ;;  %v10342_v45 = vld [vmem:[#allocation33_spill] sm:$0xff] }
 0x161   :  { %5824 = vmatmul.mubr.f32.gmra.mrb[62].mxu1 %v1043_v47  ;;  %v10343_v47 = vld [vmem:[#allocation7_spill] sm:$0xff] }
 0x162   :  { %5858 = vmatprep.mubr.f32.mxu1 %v8079_v52 }
 0x165   :  { %5859 = vmatmul.mubr.f32.vlgmr.msra.gmra.mrb[32].mxu1 %v8098_v28 }
 0x166   :  { %6773 = vmatpush3.bf16.msra.mxu1 %v8018_v55  ;;  %5861 = vmatprep.mubr.f32.mxu1 %v8145_v51  ;;  %v10329_v55 = vld [vmem:[#allocation20_spill] sm:$0xff] }
 0x167   :  { %6775 = vmatprep.subr.bf16.mxu1 %v8032_v43 }
 0x169   :  { %5862 = vmatmul.mubr.f32.gmra.mrb[34].mxu1 %v8158_v2 }
 0x16a   :  { %5864 = vmatprep.mubr.f32.mxu1 %v8198_v8  ;;  %6777 = vmatpush3.bf16.msra.mxu1 %v8032_v43  ;;  %v10330_v43 = vld [vmem:[#allocation21_spill] sm:$0xff] }
 0x16b   :  { %6779 = vmatprep.subr.bf16.mxu1 %v8046_v56 }
 0x16d   :  { %5865 = vmatmul.mubr.f32.gmra.mrb[36].mxu1 %v8218_v63 }
 0x16e   :  { %5867 = vmatprep.mubr.f32.mxu1 %v8245_v10  ;;  %6781 = vmatpush3.bf16.msra.mxu1 %v8046_v56  ;;  %v10331_v56 = vld [vmem:[#allocation24_spill] sm:$0xff] }
 0x16f   :  { %6783 = vmatprep.subr.bf16.mxu1 %v8065_v41 }
 0x171   :  { %5868 = vmatmul.mubr.f32.gmra.mrb[38].mxu1 %v8260_v22 }
 0x172   :  { %5870 = vmatprep.mubr.f32.mxu1 %v8275_v4  ;;  %6785 = vmatpush3.bf16.msra.mxu1 %v8065_v41  ;;  %v6798_v41 = vpack.c.bf16 %v8213_v13, %v8208_v33 }
 0x173   :  { %6787 = vmatprep.subr.bf16.mxu1 %v8123_v7 }
 0x175   :  { %5871 = vmatmul.mubr.f32.gmra.mrb[40].mxu1 %v8284_v61 }
 0x176   :  { %5873 = vmatprep.mubr.f32.mxu1 %v8299_v30  ;;  %6789 = vmatpush3.bf16.msra.mxu1 %v8123_v7  ;;  %v10332_v7 = vld [vmem:[#allocation3_spill] sm:$0xff] }
 0x177   :  { %6791 = vmatprep.subr.bf16.mxu1 %v8182_v24 }
 0x179   :  { %5874 = vmatmul.mubr.f32.gmra.mrb[42].mxu1 %v8308_v59 }
 0x17a   :  { %5876 = vmatprep.mubr.f32.mxu1 %v8326_v31  ;;  %6793 = vmatpush3.bf16.msra.mxu1 %v8182_v24  ;;  %v10333_v24 = vld [vmem:[#allocation26_spill] sm:$0xff]  ;;  %v10372_v31 = vld [vmem:[#allocation15_spill] sm:$0xff] }
 0x17b   :  { %6795 = vmatprep.subr.bf16.mxu1 %v8236_v23  ;;  %v10373_v59 = vand.u32 4294901760, %v10372_v31 }
 0x17d   :  { %5877 = vmatmul.mubr.f32.gmra.mrb[44].mxu1 %v8337_v21  ;;  %v10370_v21 = vld [vmem:[#allocation14_spill] sm:$0xff] }
 0x17e   :  { %5879 = vmatprep.mubr.f32.mxu1 %v8369_v34  ;;  %6797 = vmatpush3.bf16.msra.mxu1 %v8236_v23  ;;  %v10334_v23 = vld [vmem:[#allocation28_spill] sm:$0xff]  ;;  %v10369_v34 = vand.u32 4294901760, %v10331_v56 }
 0x17f   :  { %6799 = vmatprep.subr.bf16.mxu1 %v6798_v41 }
 0x181   :  { %5880 = vmatmul.mubr.f32.gmra.mrb[46].mxu1 %v8393_v6 }
 0x182   :  { %5882 = vmatprep.mubr.f32.mxu1 %v8339_v17  ;;  %6801 = vmatpush3.bf16.msra.mxu1 %v6798_v41  ;;  %v10344_v41 = vld [vmem:[#allocation35_spill] sm:$0xff] }
 0x183   :  { %6803 = vmatprep.subr.bf16.mxu1 %v7795_v3 }
 0x185   :  { %5883 = vmatmul.mubr.f32.gmra.mrb[48].mxu1 %v8349_v40  ;;  %v10366_v40 = vld [vmem:[#allocation13_spill] sm:$0xff] }
 0x186   :  { %5885 = vmatprep.mubr.f32.mxu1 %v8365_v29  ;;  %v10367_v17 = vand.u32 4294901760, %v10366_v40  ;;  %v10378_v40 = vld [vmem:[#allocation17_spill] sm:$0xff] }
 0x189   :  { %5886 = vmatmul.mubr.f32.gmra.mrb[50].mxu1 %v8378_v53  ;;  %v10360_v53 = vld [vmem:[#allocation56_spill] sm:$0xff] }
 0x18a   :  { %5888 = vmatprep.mubr.f32.mxu1 %v8388_v0  ;;  %v10359_v0 = vld [vmem:[#allocation55_spill] sm:$0xff] }
 0x18d   :  { %5889 = vmatmul.mubr.f32.gmra.mrb[52].mxu1 %v8406_v36  ;;  %v10358_v36 = vld [vmem:[#allocation52_spill] sm:$0xff] }
 0x18e   :  { %5891 = vmatprep.mubr.f32.mxu1 %v8408_v9  ;;  %v10357_v9 = vld [vmem:[#allocation50_spill] sm:$0xff] }
 0x191   :  { %5892 = vmatmul.mubr.f32.gmra.mrb[54].mxu1 %v8439_v27  ;;  %v10356_v27 = vld [vmem:[#allocation45_spill] sm:$0xff] }
 0x192   :  { %5894 = vmatprep.mubr.f32.mxu1 %v8450_v25  ;;  %v10355_v25 = vld [vmem:[#allocation42_spill] sm:$0xff] }
 0x195   :  { %5895 = vmatmul.mubr.f32.gmra.mrb[56].mxu1 %v8467_v1  ;;  %v10354_v1 = vld [vmem:[#allocation51_spill] sm:$0xff] }
 0x196   :  { %5897 = vmatprep.mubr.f32.mxu1 %v8479_v11 }
 0x199   :  { %5898 = vmatmul.mubr.f32.gmra.mrb[58].mxu1 %v8498_v57 }
 0x19a   :  { %5900 = vmatprep.mubr.f32.mxu1 %v8507_v62  ;;  %v10352_v62 = vld [vmem:[#allocation11_spill] sm:$0xff] }
 0x19b   :  { %v10353_v57 = vand.u32 4294901760, %v10352_v62  ;;  %v10363_v62 = vand.u32 4294901760, %v10329_v55 }
 0x19d   :  { %5901 = vmatmul.mubr.f32.gmra.mrb[60].mxu1 %v8520_v20 }
 0x19e   :  { %5903 = vmatprep.mubr.f32.mxu1 %v8527_v38  ;;  %v10350_v38 = vld [vmem:[#allocation10_spill] sm:$0xff] }
 0x19f   :  { %v10351_v20 = vand.u32 4294901760, %v10350_v38  ;;  %v10361_v38 = vld [vmem:[#allocation57_spill] sm:$0xff] }
 0x1a1   :  { %5904 = vmatmul.mubr.f32.gmra.mrb[62].mxu1 %v8536_v18  ;;  %v10349_v18 = vld [vmem:[#allocation9_spill] sm:$0xff]  ;;  %v6834_v11 = vpack.c.bf16 %v10353_v57, %v10351_v20  ;;  %v10362_v57 = vld [vmem:[#allocation62_spill] sm:$0xff]  ;;  %v10364_v20 = vld [vmem:[#allocation12_spill] sm:$0xff] }
 0x1a2   :  { %5938 = vmatprep.mubr.f32.mxu1 %v10329_v55  ;;  %v10365_v29 = vand.u32 4294901760, %v10364_v20  ;;  %v10374_v55 = vand.u32 4294901760, %v10333_v24  ;;  %v10390_v20 = vld [vmem:[#allocation23_spill] sm:$0xff] }
 0x1a4   :  { %v6838_v6 = vpack.c.bf16 %v10367_v17, %v10365_v29  ;;  %v10376_v29 = vld [vmem:[#allocation16_spill] sm:$0xff] }
 0x1a5   :  { %5939 = vmatmul.mubr.f32.vlgmr.msra.gmra.mrb[32].mxu1 %v10330_v43  ;;  %v10377_v17 = vand.u32 4294901760, %v10376_v29 }
 0x1a6   :  { %6805 = vmatpush3.bf16.msra.mxu1 %v7795_v3  ;;  %5941 = vmatprep.mubr.f32.mxu1 %v10331_v56 }
 0x1a7   :  { %6807 = vmatprep.subr.bf16.mxu1 %v10332_v7 }
 0x1a9   :  { %5942 = vmatmul.mubr.f32.gmra.mrb[34].mxu1 %v10333_v24  ;;  %v10387_v24 = vand.u32 4294901760, %v10339_v50 }
 0x1aa   :  { %5944 = vmatprep.mubr.f32.mxu1 %v10334_v23  ;;  %6809 = vmatpush3.bf16.msra.mxu1 %v10332_v7 }
 0x1ab   :  { %6811 = vmatprep.subr.bf16.mxu1 %v10335_v14 }
 0x1ad   :  { %5945 = vmatmul.mubr.f32.gmra.mrb[36].mxu1 %v10336_v46 }
 0x1ae   :  { %5947 = vmatprep.mubr.f32.mxu1 %v8258_v19  ;;  %6813 = vmatpush3.bf16.msra.mxu1 %v10335_v14 }
 0x1af   :  { %6815 = vmatprep.subr.bf16.mxu1 %v10337_v48 }
 0x1b1   :  { %5948 = vmatmul.mubr.f32.gmra.mrb[38].mxu1 %v10338_v16 }
 0x1b2   :  { %5950 = vmatprep.mubr.f32.mxu1 %v10339_v50  ;;  %6817 = vmatpush3.bf16.msra.mxu1 %v10337_v48 }
 0x1b3   :  { %6819 = vmatprep.subr.bf16.mxu1 %v10340_v49 }
 0x1b5   :  { %5951 = vmatmul.mubr.f32.gmra.mrb[40].mxu1 %v10341_v54 }
 0x1b6   :  { %5953 = vmatprep.mubr.f32.mxu1 %v10342_v45  ;;  %6821 = vmatpush3.bf16.msra.mxu1 %v10340_v49 }
 0x1b7   :  { %6823 = vmatprep.subr.bf16.mxu1 %v10343_v47 }
 0x1b9   :  { %5954 = vmatmul.mubr.f32.gmra.mrb[42].mxu1 %v10344_v41 }
 0x1ba   :  { %5956 = vmatprep.mubr.f32.mxu1 %v10345_v26  ;;  %6825 = vmatpush3.bf16.msra.mxu1 %v10343_v47 }
 0x1bb   :  { %6827 = vmatprep.subr.bf16.mxu1 %v10346_v60 }
 0x1bd   :  { %5957 = vmatmul.mubr.f32.gmra.mrb[44].mxu1 %v10347_v12 }
 0x1be   :  { %5959 = vmatprep.mubr.f32.mxu1 %v10348_v37  ;;  %6829 = vmatpush3.bf16.msra.mxu1 %v10346_v60  ;;  %v10371_v60 = vand.u32 4294901760, %v10370_v21  ;;  %v10381_v21 = vand.u32 4294901760, %v8258_v19  ;;  %v10391_v19 = vand.u32 4294901760, %v10390_v20  ;;  %v8817_v20 = vld [vmem:[%s9914_s3 + $0x30] sm:$0xff] }
 0x1bf   :  { %6831 = vmatprep.subr.bf16.mxu1 %v10349_v18 }
 0x1c0   :  { %v6842_v47 = vpack.c.bf16 %v10373_v59, %v10371_v60  ;;  %v10382_v59 = vld [vmem:[#allocation18_spill] sm:$0xff]  ;;  %v10384_v60 = vld [vmem:[#allocation19_spill] sm:$0xff] }
 0x1c1   :  { %5960 = vmatmul.mubr.f32.gmra.mrb[46].mxu1 %v10354_v1  ;;  %v10383_v31 = vand.u32 4294901760, %v10382_v59  ;;  %v10403_v59 = vand.u32 4294901760, %v10348_v37  ;;  %v10408_v37 = vand.u32 4294901760, %v10358_v36 }
 0x1c2   :  { %5962 = vmatprep.mubr.f32.mxu1 %v10355_v25  ;;  %6833 = vmatpush3.bf16.msra.mxu1 %v10349_v18  ;;  %v10368_v18 = vand.u32 4294901760, %v10330_v43  ;;  %v10385_v43 = vand.u32 4294901760, %v10384_v60  ;;  %v8789_v60 = vld [vmem:[%s9914_s3 + $0x20] sm:$0xff] }
 0x1c3   :  { %6835 = vmatprep.subr.bf16.mxu1 %v6834_v11 }
 0x1c4   :  { %v6850_v56 = vpack.c.bf16 %v10385_v43, %v10383_v31  ;;  %v10412_v31 = vand.u32 4294901760, %v8460_v35  ;;  %v8794_v43 = vld [vmem:[%s9914_s3 + $0x28] sm:$0xff] }
 0x1c5   :  { %5963 = vmatmul.mubr.f32.gmra.mrb[48].mxu1 %v10356_v27 }
 0x1c6   :  { %5965 = vmatprep.mubr.f32.mxu1 %v10357_v9 }
 0x1c9   :  { %5966 = vmatmul.mubr.f32.gmra.mrb[50].mxu1 %v10358_v36  ;;  %v10415_v36 = vand.u32 4294901760, %v8505_v5 }
 0x1ca   :  { %5968 = vmatprep.mubr.f32.mxu1 %v10359_v0 }
 0x1cd   :  { %5969 = vmatmul.mubr.f32.gmra.mrb[52].mxu1 %v10360_v53 }
 0x1ce   :  { %5971 = vmatprep.mubr.f32.mxu1 %v10361_v38 }
 0x1d1   :  { %5972 = vmatmul.mubr.f32.gmra.mrb[54].mxu1 %v8460_v35  ;;  %v10419_v35 = vand.u32 4294901760, %v8543_v58 }
 0x1d2   :  { %5974 = vmatprep.mubr.f32.mxu1 %v8477_v15 }
 0x1d5   :  { %5975 = vmatmul.mubr.f32.gmra.mrb[56].mxu1 %v10362_v57 }
 0x1d6   :  { %5977 = vmatprep.mubr.f32.mxu1 %v8505_v5  ;;  %v8766_v5 = vld [vmem:[%s9914_s3] sm:$0xff] }
 0x1d9   :  { %5978 = vmatmul.mubr.f32.gmra.mrb[58].mxu1 %v8518_v32 }
 0x1da   :  { %5980 = vmatprep.mubr.f32.mxu1 %v8525_v39 }
 0x1dd   :  { %5981 = vmatmul.mubr.f32.gmra.mrb[60].mxu1 %v8534_v44 }
 0x1de   :  { %5983 = vmatprep.mubr.f32.mxu1 %v8543_v58 }
 0x1e1   :  { %5984 = vmatmul.mubr.f32.gmra.mrb[62].mxu1 %v8550_v42 }
 0x1e2   :  { %6018 = vmatprep.mubr.f32.mxu1 %v10363_v62  ;;  %v10375_v62 = vand.u32 4294901760, %v10334_v23  ;;  %v10388_v23 = vld [vmem:[#allocation22_spill] sm:$0xff] }
 0x1e5   :  { %6019 = vmatmul.mubr.f32.vlgmr.msra.gmra.mrb[32].mxu1 %v10368_v18 }
 0x1e6   :  { %6837 = vmatpush3.bf16.msra.mxu1 %v6834_v11  ;;  %6021 = vmatprep.mubr.f32.mxu1 %v10369_v34  ;;  %v10379_v11 = vand.u32 4294901760, %v10378_v40  ;;  %v10380_v34 = vand.u32 4294901760, %v10336_v46  ;;  %v10389_v46 = vand.u32 4294901760, %v10388_v23  ;;  %v2691_v23 = vand.u32 4294901760, %v8794_v43 }
 0x1e7   :  { %6839 = vmatprep.subr.bf16.mxu1 %v6838_v6 }
 0x1e8   :  { %v6846_v18 = vpack.c.bf16 %v10379_v11, %v10377_v17  ;;  %v10396_v17 = vld [vmem:[#allocation27_spill] sm:$0xff]  ;;  %v10398_v11 = vand.u32 4294901760, %v10344_v41  ;;  %v10404_v41 = vand.u32 4294901760, %v10354_v1  ;;  %v10410_v1 = vand.u32 4294901760, %v10360_v53 }
 0x1e9   :  { %6022 = vmatmul.mubr.f32.gmra.mrb[34].mxu1 %v10374_v55  ;;  %v6854_v55 = vpack.c.bf16 %v10391_v19, %v10389_v46  ;;  %v10397_v50 = vand.u32 4294901760, %v10396_v17  ;;  %v10417_v53 = vand.u32 4294901760, %v8525_v39  ;;  %v8771_v39 = vld [vmem:[%s9914_s3 + $0x8] sm:$0xff]  ;;  %v8822_v19 = vld [vmem:[%s9914_s3 + $0x38] sm:$0xff] }
 0x1ea   :  { %6024 = vmatprep.mubr.f32.mxu1 %v10375_v62  ;;  %6841 = vmatpush3.bf16.msra.mxu1 %v6838_v6  ;;  %v10386_v6 = vand.u32 4294901760, %v10338_v16  ;;  %v10393_v62 = vand.u32 4294901760, %v10342_v45  ;;  %v10394_v16 = vld [vmem:[#allocation25_spill] sm:$0xff]  ;;  %v10401_v45 = vand.u32 4294901760, %v8213_v13  ;;  %v10406_v13 = vand.u32 4294901760, %v10356_v27 }
 0x1eb   :  { %6843 = vmatprep.subr.bf16.mxu1 %v6842_v47  ;;  %v10395_v29 = vand.u32 4294901760, %v10394_v16  ;;  %v10413_v27 = vand.u32 4294901760, %v8477_v15  ;;  %v10420_v15 = vand.u32 4294901760, %v8550_v42  ;;  %v2679_v58 = vand.u32 4294901760, %v8771_v39  ;;  %v8783_v42 = vld [vmem:[%s9914_s3 + $0x18] sm:$0xff]  ;;  %v8847_v16 = vld [vmem:[%s9914_s3 + $0x48] sm:$0xff] }
 0x1ec   :  { %v2703_v17 = vand.u32 4294901760, %v8847_v16 }
 0x1ed   :  { %6025 = vmatmul.mubr.f32.gmra.mrb[36].mxu1 %v10380_v34  ;;  %v6858_v40 = vpack.c.bf16 %v10397_v50, %v10395_v29  ;;  %v8866_v50 = vld [vmem:[%s9914_s3 + $0x50] sm:$0xff] }
 0x1ee   :  { %6027 = vmatprep.mubr.f32.mxu1 %v10381_v21  ;;  %6845 = vmatpush3.bf16.msra.mxu1 %v6842_v47  ;;  %v10392_v47 = vand.u32 4294901760, %v10341_v54  ;;  %v10400_v54 = vand.u32 4294901760, %v8208_v33  ;;  %v10402_v21 = vand.u32 4294901760, %v10347_v12  ;;  %v10407_v33 = vand.u32 4294901760, %v10357_v9 }
 0x1ef   :  { %6847 = vmatprep.subr.bf16.mxu1 %v6846_v18  ;;  %v10409_v12 = vand.u32 4294901760, %v10359_v0  ;;  %v10414_v9 = vand.u32 4294901760, %v10362_v57  ;;  %v10416_v0 = vand.u32 4294901760, %v8518_v32  ;;  %v8776_v32 = vld [vmem:[%s9914_s3 + $0x10] sm:$0xff] }
 0x1f0   :  { %v6862_v34 = vpack.c.bf16 %v10401_v45, %v10400_v54  ;;  %v2682_v57 = vand.u32 4294901760, %v8776_v32  ;;  %v10425_v45 = vld [vmem:[#allocation7_spill] sm:$0xff] }
 0x1f1   :  { %6028 = vmatmul.mubr.f32.gmra.mrb[38].mxu1 %v10386_v6 }
 0x1f2   :  { %6030 = vmatprep.mubr.f32.mxu1 %v10387_v24  ;;  %6849 = vmatpush3.bf16.msra.mxu1 %v6846_v18  ;;  %v10399_v18 = vand.u32 4294901760, %v10345_v26  ;;  %v10405_v26 = vand.u32 4294901760, %v10355_v25  ;;  %v10411_v25 = vand.u32 4294901760, %v10361_v38  ;;  %v10418_v38 = vand.u32 4294901760, %v8534_v44 }
 0x1f3   :  { %6851 = vmatprep.subr.bf16.mxu1 %v6850_v56  ;;  %v2676_v44 = vand.u32 4294901760, %v8766_v5  ;;  %v2688_v24 = vand.u32 4294901760, %v8789_v60 }
 0x1f5   :  { %6031 = vmatmul.mubr.f32.gmra.mrb[40].mxu1 %v10392_v47  ;;  %v8802_v6 = vpack.c.bf16 %v2679_v58, %v2676_v44  ;;  %v2697_v47 = vand.u32 4294901760, %v8822_v19 }
 0x1f6   :  { %6033 = vmatprep.mubr.f32.mxu1 %v10393_v62  ;;  %6853 = vmatpush3.bf16.msra.mxu1 %v6850_v56  ;;  %v2685_v56 = vand.u32 4294901760, %v8783_v42  ;;  %v8842_v62 = vld [vmem:[%s9914_s3 + $0x40] sm:$0xff] }
 0x1f7   :  { %6855 = vmatprep.subr.bf16.mxu1 %v6854_v55  ;;  %6899 = vmatprep.subr.bf16.mxu0 %v8802_v6  ;;  %v2700_v29 = vand.u32 4294901760, %v8842_v62 }
 0x1f8   :  { %v8812_v46 = vpack.c.bf16 %v2685_v56, %v2682_v57  ;;  %6901 = vmatpush3.bf16.msra.mxu0 %v8802_v6 }
 0x1f9   :  { %6034 = vmatmul.mubr.f32.gmra.mrb[42].mxu1 %v10398_v11  ;;  %v2706_v11 = vand.u32 4294901760, %v8866_v50 }
 0x1fa   :  { %6036 = vmatprep.mubr.f32.mxu1 %v10399_v18  ;;  %6857 = vmatpush3.bf16.msra.mxu1 %v6854_v55  ;;  %v2694_v55 = vand.u32 4294901760, %v8817_v20 }
 0x1fb   :  { %6859 = vmatprep.subr.bf16.mxu1 %v6858_v40  ;;  %6903 = vmatprep.subr.bf16.mxu0 %v8812_v46 }
 0x1fc   :  { %6905 = vmatpush3.bf16.msra.mxu0 %v8812_v46 }
 0x1fd   :  { %6037 = vmatmul.mubr.f32.gmra.mrb[44].mxu1 %v10402_v21  ;;  %v10428_v21 = vld [vmem:[#allocation8_spill] sm:$0xff] }
 0x1fe   :  { %6039 = vmatprep.mubr.f32.mxu1 %v10403_v59  ;;  %6861 = vmatpush3.bf16.msra.mxu1 %v6858_v40  ;;  %v8871_v40 = vld [vmem:[%s9914_s3 + $0x58] sm:$0xff] }
 0x1ff   :  { %6863 = vmatprep.subr.bf16.mxu1 %v6862_v34  ;;  %v2709_v18 = vand.u32 4294901760, %v8871_v40  ;;  %v10429_v59 = vld [vmem:[#allocation38_spill] sm:$0xff] }
 0x201   :  { %6040 = vmatmul.mubr.f32.gmra.mrb[46].mxu1 %v10404_v41  ;;  %v8895_v54 = vpack.c.bf16 %v2709_v18, %v2706_v11  ;;  %v10430_v41 = vld [vmem:[#allocation44_spill] sm:$0xff] }
 0x202   :  { %6042 = vmatprep.mubr.f32.mxu1 %v10405_v26  ;;  %6865 = vmatpush3.bf16.msra.mxu1 %v6862_v34  ;;  %v10427_v34 = vld [vmem:[#allocation36_spill] sm:$0xff]  ;;  %v10432_v26 = vld [vmem:[#allocation49_spill] sm:$0xff] }
 0x203   :  { %6867 = vmatprep.subr.bf16.mxu1 %v7795_v3  ;;  %10424 = vst [vmem:[#allocation3_spill] sm:$0xff] %v8895_v54 }
 0x205   :  { %6043 = vmatmul.mubr.f32.gmra.mrb[48].mxu1 %v10406_v13  ;;  %v10433_v13 = vld [vmem:[#allocation39_spill] sm:$0xff] }
 0x206   :  { %6045 = vmatprep.mubr.f32.mxu1 %v10407_v33  ;;  %v10434_v33 = vld [vmem:[#allocation41_spill] sm:$0xff] }
 0x209   :  { %6046 = vmatmul.mubr.f32.gmra.mrb[50].mxu1 %v10408_v37  ;;  %v10435_v37 = vld [vmem:[#allocation43_spill] sm:$0xff] }
 0x20a   :  { %6048 = vmatprep.mubr.f32.mxu1 %v10409_v12  ;;  %v10436_v12 = vld [vmem:[#allocation46_spill] sm:$0xff] }
 0x20d   :  { %6049 = vmatmul.mubr.f32.gmra.mrb[52].mxu1 %v10410_v1  ;;  %v10437_v1 = vld [vmem:[#allocation47_spill] sm:$0xff] }
 0x20e   :  { %6051 = vmatprep.mubr.f32.mxu1 %v10411_v25  ;;  %v10438_v25 = vld [vmem:[#allocation53_spill] sm:$0xff] }
 0x211   :  { %6052 = vmatmul.mubr.f32.gmra.mrb[54].mxu1 %v10412_v31  ;;  %v10439_v31 = vld [vmem:[#allocation54_spill] sm:$0xff] }
 0x212   :  { %6054 = vmatprep.mubr.f32.mxu1 %v10413_v27  ;;  %v10440_v27 = vld [vmem:[#allocation58_spill] sm:$0xff] }
 0x215   :  { %6055 = vmatmul.mubr.f32.gmra.mrb[56].mxu1 %v10414_v9  ;;  %v10441_v9 = vld [vmem:[#allocation59_spill] sm:$0xff] }
 0x216   :  { %6057 = vmatprep.mubr.f32.mxu1 %v10415_v36  ;;  %v10442_v36 = vld [vmem:[#allocation60_spill] sm:$0xff] }
 0x219   :  { %6058 = vmatmul.mubr.f32.gmra.mrb[58].mxu1 %v10416_v0  ;;  %v10443_v0 = vld [vmem:[#allocation61_spill] sm:$0xff] }
 0x21a   :  { %6060 = vmatprep.mubr.f32.mxu1 %v10417_v53  ;;  %v10444_v53 = vld [vmem:[#allocation63_spill] sm:$0xff] }
 0x21d   :  { %6061 = vmatmul.mubr.f32.gmra.mrb[60].mxu1 %v10418_v38  ;;  %v10445_v38 = vld [vmem:[#allocation64_spill] sm:$0xff] }
 0x21e   :  { %6063 = vmatprep.mubr.f32.mxu1 %v10419_v35  ;;  %v10446_v35 = vld [vmem:[#allocation65_spill] sm:$0xff] }
 0x221   :  { %6064 = vmatmul.mubr.f32.gmra.mrb[62].mxu1 %v10420_v15  ;;  %v10447_v15 = vld [vmem:[#allocation66_spill] sm:$0xff] }
 0x222   :  { %6098 = vmatprep.mubr.f32.mxu1 %v8079_v52 }
 0x225   :  { %6099 = vmatmul.mubr.f32.vlgmr.msra.gmra.mrb[32].mxu1 %v8098_v28 }
 0x226   :  { %6869 = vmatpush3.bf16.msra.mxu1 %v7795_v3  ;;  %6101 = vmatprep.mubr.f32.mxu1 %v8145_v51  ;;  %v8833_v3 = vpack.c.bf16 %v2691_v23, %v2688_v24 }
 0x227   :  { %6871 = vmatprep.subr.bf16.mxu1 %v10332_v7 }
 0x228   :  { %10421 = vst [vmem:[#allocation20_spill] sm:$0xff] %v8833_v3  ;;  %6907 = vmatprep.subr.bf16.mxu0 %v8833_v3 }
 0x229   :  { %6102 = vmatmul.mubr.f32.gmra.mrb[34].mxu1 %v8158_v2  ;;  %6909 = vmatpush3.bf16.msra.mxu0 %v8833_v3 }
 0x22a   :  { %6104 = vmatprep.mubr.f32.mxu1 %v8198_v8  ;;  %6873 = vmatpush3.bf16.msra.mxu1 %v10332_v7  ;;  %v8857_v7 = vpack.c.bf16 %v2697_v47, %v2694_v55 }
 0x22b   :  { %6875 = vmatprep.subr.bf16.mxu1 %v10335_v14 }
 0x22c   :  { %10422 = vst [vmem:[#allocation21_spill] sm:$0xff] %v8857_v7  ;;  %6911 = vmatprep.subr.bf16.mxu0 %v8857_v7 }
 0x22d   :  { %6105 = vmatmul.mubr.f32.gmra.mrb[36].mxu1 %v8218_v63  ;;  %6913 = vmatpush3.bf16.msra.mxu0 %v8857_v7 }
 0x22e   :  { %6107 = vmatprep.mubr.f32.mxu1 %v8245_v10  ;;  %6877 = vmatpush3.bf16.msra.mxu1 %v10335_v14  ;;  %v8881_v14 = vpack.c.bf16 %v2703_v17, %v2700_v29 }
 0x22f   :  { %6879 = vmatprep.subr.bf16.mxu1 %v10337_v48 }
 0x230   :  { %10423 = vst [vmem:[#allocation24_spill] sm:$0xff] %v8881_v14  ;;  %6915 = vmatprep.subr.bf16.mxu0 %v8881_v14 }
 0x231   :  { %6108 = vmatmul.mubr.f32.gmra.mrb[38].mxu1 %v8260_v22  ;;  %6917 = vmatpush3.bf16.msra.mxu0 %v8881_v14 }
 0x232   :  { %6110 = vmatprep.mubr.f32.mxu1 %v8275_v4  ;;  %6881 = vmatpush3.bf16.msra.mxu1 %v10337_v48  ;;  %v10426_v48 = vld [vmem:[#allocation34_spill] sm:$0xff] }
 0x233   :  { %6883 = vmatprep.subr.bf16.mxu1 %v10340_v49  ;;  %6919 = vmatprep.subr.bf16.mxu0 %v8895_v54 }
 0x235   :  { %6111 = vmatmul.mubr.f32.gmra.mrb[40].mxu1 %v8284_v61  ;;  %6921 = vmatpush3.bf16.msra.mxu0 %v8895_v54 }
 0x236   :  { %6113 = vmatprep.mubr.f32.mxu1 %v8299_v30  ;;  %6885 = vmatpush3.bf16.msra.mxu1 %v10340_v49  ;;  %v10431_v49 = vld [vmem:[#allocation9_spill] sm:$0xff] }
 0x237   :  { %6887 = vmatprep.subr.bf16.mxu1 %v10425_v45 }
 0x239   :  { %6114 = vmatmul.mubr.f32.gmra.mrb[42].mxu1 %v10426_v48 }
 0x23a   :  { %6116 = vmatprep.mubr.f32.mxu1 %v10427_v34  ;;  %6889 = vmatpush3.bf16.msra.mxu1 %v10425_v45  ;;  %v10448_v45 = vld [vmem:[#allocation67_spill] sm:$0xff] }
 0x23b   :  { %6891 = vmatprep.subr.bf16.mxu1 %v10428_v21 }
 0x23d   :  { %6117 = vmatmul.mubr.f32.gmra.mrb[44].mxu1 %v10429_v59 }
 0x23e   :  { %6119 = vmatprep.mubr.f32.mxu1 %v10430_v41  ;;  %6893 = vmatpush3.bf16.msra.mxu1 %v10428_v21 }
 0x23f   :  { %6895 = vmatprep.subr.bf16.mxu1 %v10431_v49 }
 0x241   :  { %6120 = vmatmul.mubr.f32.gmra.mrb[46].mxu1 %v10432_v26 }
 0x242   :  { %6122 = vmatprep.mubr.f32.mxu1 %v10433_v13  ;;  %6897 = vmatpush3.bf16.msra.mxu1 %v10431_v49 }
 0x245   :  { %6123 = vmatmul.mubr.f32.gmra.mrb[48].mxu1 %v10434_v33 }
 0x246   :  { %6125 = vmatprep.mubr.f32.mxu1 %v10435_v37 }
 0x249   :  { %6126 = vmatmul.mubr.f32.gmra.mrb[50].mxu1 %v10436_v12 }
 0x24a   :  { %6128 = vmatprep.mubr.f32.mxu1 %v10437_v1 }
 0x24d   :  { %6129 = vmatmul.mubr.f32.gmra.mrb[52].mxu1 %v10438_v25 }
 0x24e   :  { %6131 = vmatprep.mubr.f32.mxu1 %v10439_v31 }
 0x251   :  { %6132 = vmatmul.mubr.f32.gmra.mrb[54].mxu1 %v10440_v27 }
 0x252   :  { %6134 = vmatprep.mubr.f32.mxu1 %v10441_v9 }
 0x255   :  { %6135 = vmatmul.mubr.f32.gmra.mrb[56].mxu1 %v10442_v36 }
 0x256   :  { %6137 = vmatprep.mubr.f32.mxu1 %v10443_v0 }
 0x259   :  { %6138 = vmatmul.mubr.f32.gmra.mrb[58].mxu1 %v10444_v53 }
 0x25a   :  { %6140 = vmatprep.mubr.f32.mxu1 %v10445_v38 }
 0x25d   :  { %6141 = vmatmul.mubr.f32.gmra.mrb[60].mxu1 %v10446_v35 }
 0x25e   :  { %6143 = vmatprep.mubr.f32.mxu1 %v10447_v15 }
 0x261   :  { %6144 = vmatmul.mubr.f32.gmra.mrb[62].mxu1 %v10448_v45 }
 0x262   :  { %6178 = vmatprep.mubr.f32.mxu1 %v8079_v52  ;;  %v2667_v52 = vld [vmem:[%s9914_s3 + $0x68] sm:$0xff] }
 0x265   :  { %6179 = vmatmul.mubr.f32.vlgmr.msra.gmra.mrb[32].mxu1 %v8098_v28  ;;  %v2666_v28 = vld [vmem:[%s9914_s3 + $0x60] sm:$0xff] }
 0x266   :  { %6181 = vmatprep.mubr.f32.mxu1 %v8145_v51  ;;  %v2715_v51 = vand.u32 4294901760, %v2667_v52 }
 0x269   :  { %6182 = vmatmul.mubr.f32.gmra.mrb[34].mxu1 %v8158_v2  ;;  %v2712_v2 = vand.u32 4294901760, %v2666_v28 }
 0x26a   :  { %6184 = vmatprep.mubr.f32.mxu1 %v8198_v8 }
 0x26b   :  { %v8967_v8 = vpack.c.bf16 %v2715_v51, %v2712_v2 }
 0x26d   :  { %6185 = vmatmul.mubr.f32.gmra.mrb[36].mxu1 %v8218_v63  ;;  %10449 = vst [vmem:[#allocation26_spill] sm:$0xff] %v8967_v8  ;;  %v2668_v63 = vld [vmem:[%s9914_s3 + $0x70] sm:$0xff]  ;;  %6923 = vmatprep.subr.bf16.mxu0 %v8967_v8 }
 0x26e   :  { %6187 = vmatprep.mubr.f32.mxu1 %v8245_v10  ;;  %v2669_v10 = vld [vmem:[%s9914_s3 + $0x78] sm:$0xff]  ;;  %6925 = vmatpush3.bf16.msra.mxu0 %v8967_v8 }
 0x271   :  { %6188 = vmatmul.mubr.f32.gmra.mrb[38].mxu1 %v8260_v22  ;;  %v2718_v22 = vand.u32 4294901760, %v2668_v63 }
 0x272   :  { %6190 = vmatprep.mubr.f32.mxu1 %v8275_v4  ;;  %v2721_v4 = vand.u32 4294901760, %v2669_v10 }
 0x275   :  { %6191 = vmatmul.mubr.f32.gmra.mrb[40].mxu1 %v8284_v61  ;;  %v8977_v61 = vpack.c.bf16 %v2721_v4, %v2718_v22 }
 0x276   :  { %6193 = vmatprep.mubr.f32.mxu1 %v8299_v30  ;;  %v8984_v30 = vsub.f32 %v8766_v5, %v2676_v44 }
 0x277   :  { %10450 = vst [vmem:[#allocation28_spill] sm:$0xff] %v8977_v61  ;;  %6927 = vmatprep.subr.bf16.mxu0 %v8977_v61 }
 0x278   :  { %6929 = vmatpush3.bf16.msra.mxu0 %v8977_v61  ;;  %10451 = vst [vmem:[#allocation4_spill] sm:$0xff] %v8984_v30 }
 0x279   :  { %6194 = vmatmul.mubr.f32.gmra.mrb[42].mxu1 %v10426_v48  ;;  %v8989_v48 = vsub.f32 %v8771_v39, %v2679_v58  ;;  %v9002_v39 = vsub.f32 %v2666_v28, %v2712_v2  ;;  %v9004_v58 = vsub.f32 %v2667_v52, %v2715_v51 }
 0x27a   :  { %6196 = vmatprep.mubr.f32.mxu1 %v10427_v34  ;;  %v10085_v34 = vand.u32 4294901760, %v8984_v30 }
 0x27b   :  { %10452 = vst [vmem:[#allocation29_spill] sm:$0xff] %v8989_v48  ;;  %v10083_v21 = vand.u32 4294901760, %v8989_v48  ;;  %10453 = vst [vmem:[#allocation5_spill] sm:$0xff] %v9002_v39 }
 0x27c   :  { %10454 = vst [vmem:[#allocation30_spill] sm:$0xff] %v9004_v58 }
 0x27d   :  { %6197 = vmatmul.mubr.f32.gmra.mrb[44].mxu1 %v10429_v59  ;;  %v3080_v59 = vsub.f32 %v8984_v30, %v10085_v34 }
 0x27e   :  { %6199 = vmatprep.mubr.f32.mxu1 %v10430_v41  ;;  %v3087_v41 = vsub.f32 %v8989_v48, %v10083_v21 }
 0x27f   :  { %v3081_v49 = vand.u32 4294901760, %v3080_v59 }
 0x280   :  { %v3088_v5 = vand.u32 4294901760, %v3087_v41 }
 0x281   :  { %6200 = vmatmul.mubr.f32.gmra.mrb[46].mxu1 %v10432_v26  ;;  %v10073_v26 = vand.u32 4294901760, %v9002_v39 }
 0x282   :  { %6202 = vmatprep.mubr.f32.mxu1 %v10433_v13  ;;  %v8999_v44 = vpack.c.bf16 %v3088_v5, %v3081_v49  ;;  %v10072_v13 = vand.u32 4294901760, %v9004_v58 }
 0x284   :  { %6931 = vmatprep.subr.bf16.mxu0 %v8999_v44 }
 0x285   :  { %6203 = vmatmul.mubr.f32.gmra.mrb[48].mxu1 %v10434_v33  ;;  %v3164_v33 = vsub.f32 %v9002_v39, %v10073_v26 }
 0x286   :  { %6205 = vmatprep.mubr.f32.mxu1 %v10435_v37  ;;  %v9011_v37 = vsub.f32 %v2668_v63, %v2718_v22 }
 0x289   :  { %6206 = vmatmul.mubr.f32.gmra.mrb[50].mxu1 %v10436_v12  ;;  %v9013_v12 = vsub.f32 %v2669_v10, %v2721_v4 }
 0x28a   :  { %6208 = vmatprep.mubr.f32.mxu1 %v10437_v1  ;;  %v3171_v1 = vsub.f32 %v9004_v58, %v10072_v13 }
 0x28d   :  { %6209 = vmatmul.mubr.f32.gmra.mrb[52].mxu1 %v10438_v25  ;;  %v3165_v25 = vand.u32 4294901760, %v3164_v33 }
 0x28e   :  { %6211 = vmatprep.mubr.f32.mxu1 %v10439_v31  ;;  %v3172_v31 = vand.u32 4294901760, %v3171_v1 }
 0x291   :  { %6212 = vmatmul.mubr.f32.gmra.mrb[54].mxu1 %v10440_v27  ;;  %v9018_v27 = vpack.c.bf16 %v3172_v31, %v3165_v25 }
 0x292   :  { %6214 = vmatprep.mubr.f32.mxu1 %v10441_v9  ;;  %v9022_v9 = vpack.c.bf16 %v8989_v48, %v8984_v30 }
 0x295   :  { %6215 = vmatmul.mubr.f32.gmra.mrb[56].mxu1 %v10442_v36  ;;  %v9027_v36 = vsub.f32 %v8776_v32, %v2682_v57  ;;  %v9060_v57 = vsub.f32 %v8822_v19, %v2697_v47 }
 0x296   :  { %6217 = vmatprep.mubr.f32.mxu1 %v10443_v0  ;;  %v9032_v0 = vsub.f32 %v8783_v42, %v2685_v56  ;;  %v9055_v42 = vsub.f32 %v8817_v20, %v2694_v55  ;;  %v9074_v56 = vsub.f32 %v8847_v16, %v2703_v17  ;;  %v9088_v20 = vsub.f32 %v8871_v40, %v2709_v18 }
 0x297   :  { %10455 = vst [vmem:[#allocation31_spill] sm:$0xff] %v9027_v36  ;;  %10460 = vst [vmem:[#allocation37_spill] sm:$0xff] %v9060_v57  ;;  %v10081_v55 = vand.u32 4294901760, %v9027_v36  ;;  %v10074_v17 = vand.u32 4294901760, %v9060_v57  ;;  %v9113_v18 = vpack.c.bf16 %v9004_v58, %v9002_v39 }
 0x298   :  { %10456 = vst [vmem:[#allocation6_spill] sm:$0xff] %v9032_v0  ;;  %10459 = vst [vmem:[#allocation35_spill] sm:$0xff] %v9055_v42  ;;  %v10080_v47 = vand.u32 4294901760, %v9032_v0  ;;  %v10076_v33 = vand.u32 4294901760, %v9074_v56 }
 0x299   :  { %6218 = vmatmul.mubr.f32.gmra.mrb[58].mxu1 %v10444_v53  ;;  %v9036_v53 = vpack.c.bf16 %v9032_v0, %v9027_v36  ;;  %10462 = vst [vmem:[#allocation48_spill] sm:$0xff] %v9074_v56  ;;  %10464 = vst [vmem:[#allocation11_spill] sm:$0xff] %v9088_v20  ;;  %v3094_v40 = vsub.f32 %v9027_v36, %v10081_v55  ;;  %v3129_v2 = vsub.f32 %v9060_v57, %v10074_v17 }
 0x29a   :  { %6220 = vmatprep.mubr.f32.mxu1 %v10445_v38  ;;  %v9041_v38 = vsub.f32 %v8789_v60, %v2688_v24  ;;  %v9064_v60 = vpack.c.bf16 %v9060_v57, %v9055_v42 }
 0x29b   :  { %v3095_v22 = vand.u32 4294901760, %v3094_v40  ;;  %v3130_v13 = vand.u32 4294901760, %v3129_v2 }
 0x29c   :  { %10457 = vst [vmem:[#allocation32_spill] sm:$0xff] %v9041_v38 }
 0x29d   :  { %6221 = vmatmul.mubr.f32.gmra.mrb[60].mxu1 %v10446_v35  ;;  %v9046_v35 = vsub.f32 %v8794_v43, %v2691_v23  ;;  %v9069_v43 = vsub.f32 %v8842_v62, %v2700_v29  ;;  %v9083_v23 = vsub.f32 %v8866_v50, %v2706_v11  ;;  %v10079_v62 = vand.u32 4294901760, %v9041_v38  ;;  %v9103_v50 = vld [vmem:[%s9915_s4] ss:$0 sm:$0xff] }
 0x29e   :  { %6223 = vmatprep.mubr.f32.mxu1 %v10447_v15  ;;  %v10075_v29 = vand.u32 4294901760, %v9055_v42  ;;  %v3101_v11 = vsub.f32 %v9032_v0, %v10080_v47 }
 0x29f   :  { %10458 = vst [vmem:[#allocation33_spill] sm:$0xff] %v9046_v35  ;;  %v9050_v32 = vpack.c.bf16 %v9046_v35, %v9041_v38  ;;  %10461 = vst [vmem:[#allocation40_spill] sm:$0xff] %v9069_v43  ;;  %v9078_v24 = vpack.c.bf16 %v9074_v56, %v9069_v43  ;;  %v9092_v19 = vpack.c.bf16 %v9088_v20, %v9083_v23  ;;  %v10078_v16 = vand.u32 4294901760, %v9046_v35 }
 0x2a0   :  { %10463 = vst [vmem:[#allocation10_spill] sm:$0xff] %v9083_v23  ;;  %v3108_v15 = vsub.f32 %v9041_v38, %v10079_v62  ;;  %v3122_v52 = vsub.f32 %v9055_v42, %v10075_v29  ;;  %v3102_v4 = vand.u32 4294901760, %v3101_v11  ;;  %v10077_v59 = vand.u32 4294901760, %v9069_v43 }
 0x2a1   :  { %6224 = vmatmul.mubr.f32.gmra.mrb[62].mxu1 %v10448_v45  ;;  %v3115_v45 = vsub.f32 %v9046_v35, %v10078_v16 }
 0x2a2   :  { %v3109_v49 = vand.u32 4294901760, %v3108_v15  ;;  %v3123_v31 = vand.u32 4294901760, %v3122_v52  ;;  %v9137_v11 = vpack.c.bf16 %v3102_v4, %v3095_v22  ;;  %v9142_v15 = vsub.f32 %v9069_v43, %v10077_v59 }
 0x2a3   :  { %v3116_v5 = vand.u32 4294901760, %v3115_v45  ;;  %v10087_v4 = vand.u32 4294901760, %v9083_v23 }
 0x2a4   :  { %v9157_v22 = vpack.c.bf16 %v3130_v13, %v3123_v31  ;;  %v3137_v13 = vand.u32 4294901760, %v9142_v15 }
 0x2a5   :  { %v9147_v2 = vpack.c.bf16 %v3116_v5, %v3109_v49  ;;  %v3150_v15 = vsub.f32 %v9083_v23, %v10087_v4 }
 0x338   :  { %v6180_v28 = vpop.f32.mrb[32].mxu1 }
 0x339   :  { %v7106_v51 = vadd.f32 %v6180_v28, %v9103_v50  ;;  %v2432_v63 = vpop.f32.mrb[33].mxu1 }
 0x33a   :  { %v7107_v10 = vadd.f32 %v9103_v50, %v2432_v63 }
 0x33b   :  { %v2623_v41 = vmax.f32 %v7106_v51, 0.0  ;;  %v9152_v51 = vsub.f32 %v9074_v56, %v10076_v33 }
 0x33c   :  { %v2622_v1 = vmax.f32 %v7107_v10, 0.0  ;;  %v6183_v25 = vpop.f32.mrb[34].mxu1 }
 0x33d   :  { %v9131_v26 = vand.u32 4294901760, %v2623_v41  ;;  %v7108_v28 = vadd.f32 %v6183_v25, %v9103_v50  ;;  %v2444_v17 = vpop.f32.mrb[35].mxu1 }
 0x33e   :  { %v9134_v29 = vand.u32 4294901760, %v2622_v1  ;;  %v7109_v40 = vadd.f32 %v9103_v50, %v2444_v17 }
 0x33f   :  { %v9145_v45 = vsub.f32 %v2623_v41, %v9131_v26  ;;  %v2625_v52 = vmax.f32 %v7108_v28, 0.0  ;;  %v10090_v28 = vand.u32 4294901760, %v9088_v20 }
 0x340   :  { %v9155_v17 = vsub.f32 %v2622_v1, %v9134_v29  ;;  %v2624_v63 = vmax.f32 %v7109_v40, 0.0  ;;  %v6186_v10 = vpop.f32.mrb[36].mxu1 }
 0x341   :  { %v10082_v41 = vand.u32 4294901760, %v9145_v45  ;;  %v9161_v25 = vand.u32 4294901760, %v2625_v52  ;;  %v7110_v49 = vadd.f32 %v6186_v10, %v9103_v50  ;;  %v2456_v5 = vpop.f32.mrb[37].mxu1  ;;  %v3144_v10 = vand.u32 4294901760, %v9152_v51 }
 0x342   :  { %v9165_v33 = vand.u32 4294901760, %v2624_v63  ;;  %v7111_v1 = vadd.f32 %v9103_v50, %v2456_v5  ;;  %v10084_v40 = vand.u32 4294901760, %v9155_v17 }
 0x343   :  { %v2769_v31 = vsub.f32 %v9145_v45, %v10082_v41  ;;  %v9174_v59 = vsub.f32 %v2625_v52, %v9161_v25  ;;  %v2627_v16 = vmax.f32 %v7110_v49, 0.0 }
 0x344   :  { %v9178_v62 = vsub.f32 %v2624_v63, %v9165_v33  ;;  %v2626_v47 = vmax.f32 %v7111_v1, 0.0  ;;  %v6189_v55 = vpop.f32.mrb[38].mxu1  ;;  %v2759_v5 = vsub.f32 %v9155_v17, %v10084_v40  ;;  %v3157_v63 = vsub.f32 %v9088_v20, %v10090_v28 }
 0x345   :  { %v9186_v41 = vand.u32 4294901760, %v2627_v16  ;;  %v7112_v52 = vadd.f32 %v6189_v55, %v9103_v50  ;;  %v2468_v49 = vpop.f32.mrb[39].mxu1  ;;  %v10093_v51 = vand.u32 4294901760, %v9174_v59  ;;  %v2770_v58 = vand.u32 4294901760, %v2769_v31 }
 0x346   :  { %v9193_v1 = vand.u32 4294901760, %v2626_v47  ;;  %v7113_v21 = vadd.f32 %v9103_v50, %v2468_v49  ;;  %v2760_v40 = vand.u32 4294901760, %v2759_v5  ;;  %v10095_v34 = vand.u32 4294901760, %v9178_v62 }
 0x347   :  { %v9198_v4 = vsub.f32 %v2627_v16, %v9186_v41  ;;  %v2629_v39 = vmax.f32 %v7112_v52, 0.0  ;;  %v2789_v55 = vsub.f32 %v9174_v59, %v10093_v51  ;;  %v3151_v49 = vand.u32 4294901760, %v3150_v15 }
 0x348   :  { %v9204_v23 = vsub.f32 %v2626_v47, %v9193_v1  ;;  %v2628_v28 = vmax.f32 %v7113_v21, 0.0  ;;  %v6192_v20 = vpop.f32.mrb[40].mxu1  ;;  %6258 = vmatprep.mubr.f32.mxu0 %v2760_v40  ;;  %v2779_v5 = vsub.f32 %v9178_v62, %v10095_v34  ;;  %v3158_v51 = vand.u32 4294901760, %v3157_v63 }
 0x349   :  { %10465 = vst [vmem:[#allocation51_spill] sm:$0xff] %v9198_v4  ;;  %v9209_v31 = vand.u32 4294901760, %v2629_v39  ;;  %v7114_v16 = vadd.f32 %v6192_v20, %v9103_v50  ;;  %v2480_v52 = vpop.f32.mrb[41].mxu1  ;;  %6259 = vmatmul.mubr.f32.vlgmr.msra.gmra.mrb[32].mxu0 %v2770_v58  ;;  %v10097_v56 = vand.u32 4294901760, %v9198_v4  ;;  %v2790_v57 = vand.u32 4294901760, %v2789_v55 }
 0x34a   :  { %10466 = vst [vmem:[#allocation42_spill] sm:$0xff] %v9204_v23  ;;  %v9213_v43 = vand.u32 4294901760, %v2628_v28  ;;  %v7115_v21 = vadd.f32 %v9103_v50, %v2480_v52  ;;  %6933 = vmatpush3.bf16.msra.mxu0 %v8999_v44  ;;  %v2780_v47 = vand.u32 4294901760, %v2779_v5  ;;  %v10099_v40 = vand.u32 4294901760, %v9204_v23 }
 0x34b   :  { %v9219_v15 = vsub.f32 %v2629_v39, %v9209_v31  ;;  %v2631_v34 = vmax.f32 %v7114_v16, 0.0  ;;  %6935 = vmatprep.subr.bf16.mxu0 %v9137_v11  ;;  %v2809_v58 = vsub.f32 %v9198_v4, %v10097_v56  ;;  %v9231_v39 = vpack.c.bf16 %v3144_v10, %v3137_v13 }
 0x34c   :  { %v9226_v20 = vsub.f32 %v2628_v28, %v9213_v43  ;;  %v2630_v63 = vmax.f32 %v7115_v21, 0.0  ;;  %v6195_v52 = vpop.f32.mrb[42].mxu1  ;;  %6261 = vmatprep.mubr.f32.mxu0 %v2780_v47  ;;  %v2799_v44 = vsub.f32 %v9204_v23, %v10099_v40  ;;  %v9237_v42 = vpack.c.bf16 %v3158_v51, %v3151_v49 }
 0x34d   :  { %10467 = vst [vmem:[#allocation45_spill] sm:$0xff] %v9219_v15  ;;  %v9233_v5 = vand.u32 4294901760, %v2631_v34  ;;  %v7116_v55 = vadd.f32 %v6195_v52, %v9103_v50  ;;  %v2492_v16 = vpop.f32.mrb[43].mxu1  ;;  %6262 = vmatmul.mubr.f32.gmra.mrb[34].mxu0 %v2790_v57  ;;  %v10100_v56 = vand.u32 4294901760, %v9219_v15  ;;  %v2810_v52 = vand.u32 4294901760, %v2809_v58 }
 0x34e   :  { %10468 = vst [vmem:[#allocation50_spill] sm:$0xff] %v9226_v20  ;;  %v9239_v28 = vand.u32 4294901760, %v2630_v63  ;;  %v7117_v21 = vadd.f32 %v9103_v50, %v2492_v16  ;;  %v2800_v47 = vand.u32 4294901760, %v2799_v44  ;;  %6937 = vmatpush3.bf16.msra.mxu0 %v9137_v11  ;;  %v10103_v13 = vand.u32 4294901760, %v9226_v20 }
 0x34f   :  { %v9245_v10 = vsub.f32 %v2631_v34, %v9233_v5  ;;  %v2633_v40 = vmax.f32 %v7116_v55, 0.0  ;;  %v2829_v57 = vsub.f32 %v9219_v15, %v10100_v56  ;;  %6939 = vmatprep.subr.bf16.mxu0 %v9147_v2 }
 0x350   :  { %v9252_v51 = vsub.f32 %v2630_v63, %v9239_v28  ;;  %v2632_v49 = vmax.f32 %v7117_v21, 0.0  ;;  %v6198_v44 = vpop.f32.mrb[44].mxu1  ;;  %6264 = vmatprep.mubr.f32.mxu0 %v2800_v47  ;;  %v2819_v11 = vsub.f32 %v9226_v20, %v10103_v13 }
 0x351   :  { %10469 = vst [vmem:[#allocation52_spill] sm:$0xff] %v9245_v10  ;;  %v9258_v55 = vand.u32 4294901760, %v2633_v40  ;;  %v7118_v58 = vadd.f32 %v6198_v44, %v9103_v50  ;;  %v2504_v16 = vpop.f32.mrb[45].mxu1  ;;  %6265 = vmatmul.mubr.f32.gmra.mrb[36].mxu0 %v2810_v52  ;;  %v10104_v56 = vand.u32 4294901760, %v9245_v10  ;;  %v2830_v44 = vand.u32 4294901760, %v2829_v57 }
 0x352   :  { %10470 = vst [vmem:[#allocation55_spill] sm:$0xff] %v9252_v51  ;;  %v9263_v35 = vand.u32 4294901760, %v2632_v49  ;;  %v7119_v21 = vadd.f32 %v9103_v50, %v2504_v16  ;;  %v2820_v47 = vand.u32 4294901760, %v2819_v11  ;;  %v10107_v38 = vand.u32 4294901760, %v9252_v51  ;;  %6941 = vmatpush3.bf16.msra.mxu0 %v9147_v2 }
 0x353   :  { %10471 = vst [vmem:[#allocation56_spill] sm:$0xff] %v9258_v55  ;;  %v9269_v13 = vsub.f32 %v2633_v40, %v9258_v55  ;;  %v2635_v34 = vmax.f32 %v7118_v58, 0.0  ;;  %v2849_v52 = vsub.f32 %v9245_v10, %v10104_v56  ;;  %6943 = vmatprep.subr.bf16.mxu0 %v9157_v22  ;;  %v10474_v40 = vand.u32 4294901760, %v9011_v37 }
 0x354   :  { %v9276_v63 = vsub.f32 %v2632_v49, %v9263_v35  ;;  %v2634_v16 = vmax.f32 %v7119_v21, 0.0  ;;  %v6201_v11 = vpop.f32.mrb[46].mxu1  ;;  %6267 = vmatprep.mubr.f32.mxu0 %v2820_v47  ;;  %v2839_v2 = vsub.f32 %v9252_v51, %v10107_v38  ;;  %v10476_v21 = vand.u32 4294901760, %v9013_v12 }
 0x355   :  { %10472 = vst [vmem:[#allocation57_spill] sm:$0xff] %v9269_v13  ;;  %v3178_v57 = vsub.f32 %v9011_v37, %v10474_v40  ;;  %v9284_v58 = vand.u32 4294901760, %v2635_v34  ;;  %v7120_v56 = vadd.f32 %v6201_v11, %v9103_v50  ;;  %v2516_v0 = vpop.f32.mrb[47].mxu1  ;;  %6268 = vmatmul.mubr.f32.gmra.mrb[38].mxu0 %v2830_v44  ;;  %v10114_v49 = vand.u32 4294901760, %v9269_v13 }
 0x356   :  { %10473 = vst [vmem:[#allocation62_spill] sm:$0xff] %v9276_v63  ;;  %v3185_v47 = vsub.f32 %v9013_v12, %v10476_v21  ;;  %v9291_v36 = vand.u32 4294901760, %v2634_v16  ;;  %v7121_v38 = vadd.f32 %v9103_v50, %v2516_v0  ;;  %v2840_v48 = vand.u32 4294901760, %v2839_v2  ;;  %6945 = vmatpush3.bf16.msra.mxu0 %v9157_v22 }
 0x357   :  { %10475 = vst [vmem:[#allocation12_spill] sm:$0xff] %v9284_v58  ;;  %v10119_v30 = vand.u32 4294901760, %v9276_v63  ;;  %v9297_v40 = vsub.f32 %v2635_v34, %v9284_v58  ;;  %v2637_v11 = vmax.f32 %v7120_v56, 0.0  ;;  %v2850_v44 = vand.u32 4294901760, %v2849_v52  ;;  %6947 = vmatprep.subr.bf16.mxu0 %v9231_v39 }
 0x358   :  { %10477 = vst [vmem:[#allocation13_spill] sm:$0xff] %v9291_v36  ;;  %v2869_v61 = vsub.f32 %v9269_v13, %v10114_v49  ;;  %v9304_v21 = vsub.f32 %v2634_v16, %v9291_v36  ;;  %v2636_v0 = vmax.f32 %v7121_v38, 0.0  ;;  %v6204_v2 = vpop.f32.mrb[48].mxu1  ;;  %6270 = vmatprep.mubr.f32.mxu0 %v2840_v48  ;;  %v3179_v34 = vand.u32 4294901760, %v3178_v57 }
 0x359   :  { %10478 = vst [vmem:[#allocation14_spill] sm:$0xff] %v9297_v40  ;;  %v2859_v22 = vsub.f32 %v9276_v63, %v10119_v30  ;;  %v9309_v8 = vand.u32 4294901760, %v2637_v11  ;;  %v7122_v56 = vadd.f32 %v6204_v2, %v9103_v50  ;;  %v2528_v52 = vpop.f32.mrb[49].mxu1  ;;  %6271 = vmatmul.mubr.f32.gmra.mrb[40].mxu0 %v2850_v44  ;;  %v10122_v49 = vand.u32 4294901760, %v9297_v40 }
 0x35a   :  { %10479 = vst [vmem:[#allocation15_spill] sm:$0xff] %v9304_v21  ;;  %v3186_v13 = vand.u32 4294901760, %v3185_v47  ;;  %v9313_v54 = vand.u32 4294901760, %v2636_v0  ;;  %v7123_v38 = vadd.f32 %v9103_v50, %v2528_v52  ;;  %v10125_v48 = vand.u32 4294901760, %v9304_v21  ;;  %6949 = vmatpush3.bf16.msra.mxu0 %v9231_v39 }
 0x35b   :  { %10480 = vst [vmem:[#allocation16_spill] sm:$0xff] %v9309_v8  ;;  %v2860_v16 = vand.u32 4294901760, %v2859_v22  ;;  %v9319_v57 = vsub.f32 %v2637_v11, %v9309_v8  ;;  %v2639_v30 = vmax.f32 %v7122_v56, 0.0  ;;  %v2870_v63 = vand.u32 4294901760, %v2869_v61  ;;  %6951 = vmatprep.subr.bf16.mxu0 %v9237_v42 }
 0x35c   :  { %10481 = vst [vmem:[#allocation17_spill] sm:$0xff] %v9313_v54  ;;  %v2889_v44 = vsub.f32 %v9297_v40, %v10122_v49  ;;  %v9326_v47 = vsub.f32 %v2636_v0, %v9313_v54  ;;  %v2638_v2 = vmax.f32 %v7123_v38, 0.0  ;;  %v6207_v22 = vpop.f32.mrb[50].mxu1  ;;  %v2879_v39 = vsub.f32 %v9304_v21, %v10125_v48 }
 0x35d   :  { %10482 = vst [vmem:[#allocation18_spill] sm:$0xff] %v9319_v57  ;;  %6273 = vmatprep.mubr.f32.mxu0 %v2860_v16  ;;  %v9331_v11 = vand.u32 4294901760, %v2639_v30  ;;  %v7124_v61 = vadd.f32 %v6207_v22, %v9103_v50  ;;  %v2540_v56 = vpop.f32.mrb[51].mxu1  ;;  %v10130_v52 = vand.u32 4294901760, %v9319_v57  ;;  %v6958_v49 = vpack.c.bf16 %v3186_v13, %v3179_v34 }
 0x35e   :  { %10483 = vst [vmem:[#allocation19_spill] sm:$0xff] %v9326_v47  ;;  %6274 = vmatmul.mubr.f32.gmra.mrb[42].mxu0 %v2870_v63  ;;  %v9335_v40 = vand.u32 4294901760, %v2638_v2  ;;  %v7125_v0 = vadd.f32 %v9103_v50, %v2540_v56  ;;  %v2880_v38 = vand.u32 4294901760, %v2879_v39  ;;  %v10131_v16 = vand.u32 4294901760, %v9326_v47 }
 0x35f   :  { %10484 = vst [vmem:[#allocation22_spill] sm:$0xff] %v9331_v11  ;;  %6953 = vmatpush3.bf16.msra.mxu0 %v9237_v42  ;;  %v9341_v48 = vsub.f32 %v2639_v30, %v9331_v11  ;;  %v2641_v21 = vmax.f32 %v7124_v61, 0.0  ;;  %v2890_v10 = vand.u32 4294901760, %v2889_v44  ;;  %v2909_v63 = vsub.f32 %v9319_v57, %v10130_v52 }
 0x360   :  { %10485 = vst [vmem:[#allocation23_spill] sm:$0xff] %v9335_v40  ;;  %6955 = vmatprep.subr.bf16.mxu0 %v9018_v27  ;;  %v9348_v13 = vsub.f32 %v2638_v2, %v9335_v40  ;;  %v2640_v34 = vmax.f32 %v7125_v0, 0.0  ;;  %v6210_v22 = vpop.f32.mrb[52].mxu1  ;;  %6276 = vmatprep.mubr.f32.mxu0 %v2880_v38  ;;  %v2899_v42 = vsub.f32 %v9326_v47, %v10131_v16 }
 0x361   :  { %10486 = vst [vmem:[#allocation25_spill] sm:$0xff] %v9341_v48  ;;  %v9353_v30 = vand.u32 4294901760, %v2641_v21  ;;  %v7126_v44 = vadd.f32 %v6210_v22, %v9103_v50  ;;  %v2552_v39 = vpop.f32.mrb[53].mxu1  ;;  %v10136_v61 = vand.u32 4294901760, %v9341_v48  ;;  %v2910_v57 = vand.u32 4294901760, %v2909_v63 }
 0x362   :  { %10487 = vst [vmem:[#allocation27_spill] sm:$0xff] %v9348_v13  ;;  %6277 = vmatmul.mubr.f32.gmra.mrb[44].mxu0 %v2890_v10  ;;  %v9357_v56 = vand.u32 4294901760, %v2640_v34  ;;  %v7127_v2 = vadd.f32 %v9103_v50, %v2552_v39  ;;  %v2900_v52 = vand.u32 4294901760, %v2899_v42  ;;  %v10139_v0 = vand.u32 4294901760, %v9348_v13 }
 0x363   :  { %10488 = vst [vmem:[#allocation7_spill] sm:$0xff] %v9353_v30  ;;  %6957 = vmatpush3.bf16.msra.mxu0 %v9018_v27  ;;  %v9363_v38 = vsub.f32 %v2641_v21, %v9353_v30  ;;  %v2643_v16 = vmax.f32 %v7126_v44, 0.0  ;;  %v2929_v10 = vsub.f32 %v9341_v48, %v10136_v61 }
 0x364   :  { %10489 = vst [vmem:[#allocation34_spill] sm:$0xff] %v9357_v56  ;;  %6959 = vmatprep.subr.bf16.mxu0 %v6958_v49  ;;  %v9369_v22 = vsub.f32 %v2640_v34, %v9357_v56  ;;  %v2642_v47 = vmax.f32 %v7127_v2, 0.0  ;;  %v6213_v39 = vpop.f32.mrb[54].mxu1  ;;  %6279 = vmatprep.mubr.f32.mxu0 %v2900_v52  ;;  %v2919_v27 = vsub.f32 %v9348_v13, %v10139_v0 }
 0x365   :  { %10490 = vst [vmem:[#allocation36_spill] sm:$0xff] %v9363_v38  ;;  %v9374_v42 = vand.u32 4294901760, %v2643_v16  ;;  %v7128_v21 = vadd.f32 %v6213_v39, %v9103_v50  ;;  %v2564_v63 = vpop.f32.mrb[55].mxu1  ;;  %v10144_v44 = vand.u32 4294901760, %v9363_v38  ;;  %v2930_v13 = vand.u32 4294901760, %v2929_v10 }
 0x366   :  { %10491 = vst [vmem:[#allocation8_spill] sm:$0xff] %v9369_v22  ;;  %6280 = vmatmul.mubr.f32.gmra.mrb[46].mxu0 %v2910_v57  ;;  %v9378_v61 = vand.u32 4294901760, %v2642_v47  ;;  %v7129_v34 = vadd.f32 %v9103_v50, %v2564_v63  ;;  %v2920_v48 = vand.u32 4294901760, %v2919_v27  ;;  %v10149_v2 = vand.u32 4294901760, %v9369_v22 }
 0x367   :  { %10492 = vst [vmem:[#allocation38_spill] sm:$0xff] %v9374_v42  ;;  %6961 = vmatpush3.bf16.msra.mxu0 %v6958_v49  ;;  %v9383_v52 = vsub.f32 %v2643_v16, %v9374_v42  ;;  %v2645_v0 = vmax.f32 %v7128_v21, 0.0  ;;  %v2949_v39 = vsub.f32 %v9363_v38, %v10144_v44 }
 0x368   :  { %10493 = vst [vmem:[#allocation44_spill] sm:$0xff] %v9378_v61  ;;  %6963 = vmatprep.subr.bf16.mxu0 %v9022_v9  ;;  %v9390_v57 = vsub.f32 %v2642_v47, %v9378_v61  ;;  %v2644_v14 = vmax.f32 %v7129_v34, 0.0  ;;  %v6216_v63 = vpop.f32.mrb[56].mxu1  ;;  %6282 = vmatprep.mubr.f32.mxu0 %v2920_v48  ;;  %v2939_v49 = vsub.f32 %v9369_v22, %v10149_v2 }
 0x369   :  { %10494 = vst [vmem:[#allocation9_spill] sm:$0xff] %v9383_v52  ;;  %v9395_v16 = vand.u32 4294901760, %v2645_v0  ;;  %v7130_v10 = vadd.f32 %v6216_v63, %v9103_v50  ;;  %v2576_v27 = vpop.f32.mrb[57].mxu1  ;;  %v10156_v21 = vand.u32 4294901760, %v9383_v52  ;;  %v2950_v2 = vand.u32 4294901760, %v2949_v39 }
 0x36a   :  { %10495 = vst [vmem:[#allocation49_spill] sm:$0xff] %v9390_v57  ;;  %6283 = vmatmul.mubr.f32.gmra.mrb[48].mxu0 %v2930_v13  ;;  %v9399_v44 = vand.u32 4294901760, %v2644_v14  ;;  %v7131_v47 = vadd.f32 %v9103_v50, %v2576_v27  ;;  %v2940_v38 = vand.u32 4294901760, %v2939_v49  ;;  %v10159_v34 = vand.u32 4294901760, %v9390_v57 }
 0x36b   :  { %10496 = vst [vmem:[#allocation39_spill] sm:$0xff] %v9395_v16  ;;  %v9404_v48 = vsub.f32 %v2645_v0, %v9395_v16  ;;  %v2647_v51 = vmax.f32 %v7130_v10, 0.0  ;;  %v2969_v63 = vsub.f32 %v9383_v52, %v10156_v21 }
 0x36c   :  { %10497 = vst [vmem:[#allocation41_spill] sm:$0xff] %v9399_v44  ;;  %v9410_v13 = vsub.f32 %v2644_v14, %v9399_v44  ;;  %v2646_v22 = vmax.f32 %v7131_v47, 0.0  ;;  %v6219_v15 = vpop.f32.mrb[58].mxu1  ;;  %6285 = vmatprep.mubr.f32.mxu0 %v2940_v38  ;;  %v2959_v49 = vsub.f32 %v9390_v57, %v10159_v34 }
 0x36d   :  { %10498 = vst [vmem:[#allocation43_spill] sm:$0xff] %v9404_v48  ;;  %v9415_v27 = vand.u32 4294901760, %v2647_v51  ;;  %v7132_v0 = vadd.f32 %v6219_v15, %v9103_v50  ;;  %v2588_v10 = vpop.f32.mrb[59].mxu1  ;;  %v10166_v39 = vand.u32 4294901760, %v9404_v48  ;;  %v2970_v34 = vand.u32 4294901760, %v2969_v63 }
 0x36e   :  { %10499 = vst [vmem:[#allocation46_spill] sm:$0xff] %v9410_v13  ;;  %6286 = vmatmul.mubr.f32.gmra.mrb[50].mxu0 %v2950_v2  ;;  %v9419_v7 = vand.u32 4294901760, %v2646_v22  ;;  %v7133_v14 = vadd.f32 %v9103_v50, %v2588_v10  ;;  %v2960_v21 = vand.u32 4294901760, %v2959_v49  ;;  %v10169_v47 = vand.u32 4294901760, %v9410_v13 }
 0x36f   :  { %10500 = vst [vmem:[#allocation47_spill] sm:$0xff] %v9415_v27  ;;  %v9424_v38 = vsub.f32 %v2647_v51, %v9415_v27  ;;  %v2649_v52 = vmax.f32 %v7132_v0, 0.0  ;;  %v2989_v15 = vsub.f32 %v9404_v48, %v10166_v39 }
 0x370   :  { %10501 = vst [vmem:[#allocation53_spill] sm:$0xff] %v9419_v7  ;;  %v9430_v2 = vsub.f32 %v2646_v22, %v9419_v7  ;;  %v2648_v57 = vmax.f32 %v7133_v14, 0.0  ;;  %v6222_v20 = vpop.f32.mrb[60].mxu1  ;;  %6288 = vmatprep.mubr.f32.mxu0 %v2960_v21  ;;  %v2979_v49 = vsub.f32 %v9410_v13, %v10169_v47 }
 0x371   :  { %10502 = vst [vmem:[#allocation54_spill] sm:$0xff] %v9424_v38  ;;  %v9435_v10 = vand.u32 4294901760, %v2649_v52  ;;  %v7134_v51 = vadd.f32 %v6222_v20, %v9103_v50  ;;  %v2600_v0 = vpop.f32.mrb[61].mxu1  ;;  %v10176_v63 = vand.u32 4294901760, %v9424_v38  ;;  %v2990_v47 = vand.u32 4294901760, %v2989_v15 }
 0x372   :  { %10503 = vst [vmem:[#allocation58_spill] sm:$0xff] %v9430_v2  ;;  %6289 = vmatmul.mubr.f32.gmra.mrb[52].mxu0 %v2970_v34  ;;  %v9439_v4 = vand.u32 4294901760, %v2648_v57  ;;  %v7135_v22 = vadd.f32 %v9103_v50, %v2600_v0  ;;  %v2980_v39 = vand.u32 4294901760, %v2979_v49  ;;  %v10179_v14 = vand.u32 4294901760, %v9430_v2 }
 0x373   :  { %10504 = vst [vmem:[#allocation59_spill] sm:$0xff] %v9435_v10  ;;  %v9444_v21 = vsub.f32 %v2649_v52, %v9435_v10  ;;  %v2651_v48 = vmax.f32 %v7134_v51, 0.0  ;;  %v3009_v20 = vsub.f32 %v9424_v38, %v10176_v63 }
 0x374   :  { %10505 = vst [vmem:[#allocation60_spill] sm:$0xff] %v9439_v4  ;;  %v9450_v34 = vsub.f32 %v2648_v57, %v9439_v4  ;;  %v2650_v13 = vmax.f32 %v7135_v22, 0.0  ;;  %v6225_v3 = vpop.f32.mrb[62].mxu1  ;;  %6291 = vmatprep.mubr.f32.mxu0 %v2980_v39  ;;  %v2999_v49 = vsub.f32 %v9430_v2, %v10179_v14 }
 0x375   :  { %10506 = vst [vmem:[#allocation61_spill] sm:$0xff] %v9444_v21  ;;  %v9455_v0 = vand.u32 4294901760, %v2651_v48  ;;  %v7136_v52 = vadd.f32 %v6225_v3, %v9103_v50  ;;  %v2612_v51 = vpop.f32.mrb[63].mxu1  ;;  %v10182_v15 = vand.u32 4294901760, %v9444_v21  ;;  %v3010_v14 = vand.u32 4294901760, %v3009_v20 }
 0x376   :  { %6292 = vmatmul.mubr.f32.gmra.mrb[54].mxu0 %v2990_v47  ;;  %v9459_v23 = vand.u32 4294901760, %v2650_v13  ;;  %v7137_v57 = vadd.f32 %v9103_v50, %v2612_v51  ;;  %v3000_v63 = vand.u32 4294901760, %v2999_v49  ;;  %v10183_v22 = vand.u32 4294901760, %v9450_v34 }
 0x377   :  { %10507 = vst [vmem:[#allocation63_spill] sm:$0xff] %v9455_v0  ;;  %v9464_v39 = vsub.f32 %v2651_v48, %v9455_v0  ;;  %v2653_v38 = vmax.f32 %v7136_v52, 0.0  ;;  %v3029_v3 = vsub.f32 %v9444_v21, %v10182_v15 }
 0x378   :  { %10508 = vst [vmem:[#allocation64_spill] sm:$0xff] %v9459_v23  ;;  %v9470_v47 = vsub.f32 %v2650_v13, %v9459_v23  ;;  %v2652_v2 = vmax.f32 %v7137_v57, 0.0  ;;  %6294 = vmatprep.mubr.f32.mxu0 %v3000_v63  ;;  %v3019_v50 = vsub.f32 %v9450_v34, %v10183_v22 }
 0x379   :  { %v9475_v49 = vand.u32 4294901760, %v2653_v38  ;;  %v10186_v48 = vand.u32 4294901760, %v9464_v39  ;;  %v3030_v13 = vand.u32 4294901760, %v3029_v3 }
 0x37a   :  { %6295 = vmatmul.mubr.f32.gmra.mrb[56].mxu0 %v3010_v14  ;;  %v9478_v52 = vand.u32 4294901760, %v2652_v2  ;;  %v3020_v20 = vand.u32 4294901760, %v3019_v50  ;;  %v10189_v51 = vand.u32 4294901760, %v9470_v47 }
 0x37b   :  { %10509 = vst [vmem:[#allocation65_spill] sm:$0xff] %v9475_v49  ;;  %v9482_v15 = vsub.f32 %v2653_v38, %v9475_v49  ;;  %v3049_v63 = vsub.f32 %v9464_v39, %v10186_v48 }
 0x37c   :  { %10510 = vst [vmem:[#allocation66_spill] sm:$0xff] %v9478_v52  ;;  %v9488_v57 = vsub.f32 %v2652_v2, %v9478_v52  ;;  %6297 = vmatprep.mubr.f32.mxu0 %v3020_v20  ;;  %v3039_v14 = vsub.f32 %v9470_v47, %v10189_v51 }
 0x37d   :  { %v10187_v50 = vand.u32 4294901760, %v9482_v15  ;;  %v3050_v21 = vand.u32 4294901760, %v3049_v63  ;;  %v10521_v63 = vld [vmem:[#allocation3_spill] sm:$0xff] }
 0x37e   :  { %6298 = vmatmul.mubr.f32.gmra.mrb[58].mxu0 %v3030_v13  ;;  %v3040_v22 = vand.u32 4294901760, %v3039_v14  ;;  %v10188_v38 = vand.u32 4294901760, %v9488_v57  ;;  %v10520_v13 = vld [vmem:[#allocation62_spill] sm:$0xff]  ;;  %v10522_v14 = vld [vmem:[#allocation57_spill] sm:$0xff] }
 0x37f   :  { %v3069_v3 = vsub.f32 %v9482_v15, %v10187_v50  ;;  %v10527_v50 = vld [vmem:[#allocation28_spill] sm:$0xff] }
 0x380   :  { %6300 = vmatprep.mubr.f32.mxu0 %v3040_v22  ;;  %v3059_v2 = vsub.f32 %v9488_v57, %v10188_v38  ;;  %v10518_v22 = vld [vmem:[#allocation24_spill] sm:$0xff] }
 0x381   :  { %v3070_v48 = vand.u32 4294901760, %v3069_v3  ;;  %v10523_v3 = vld [vmem:[#allocation15_spill] sm:$0xff]  ;;  %v10528_v38 = vld [vmem:[#allocation4_spill] sm:$0xff] }
 0x382   :  { %6301 = vmatmul.mubr.f32.gmra.mrb[60].mxu0 %v3050_v21  ;;  %v3060_v20 = vand.u32 4294901760, %v3059_v2  ;;  %v10517_v21 = vld [vmem:[#allocation55_spill] sm:$0xff]  ;;  %v10524_v2 = vld [vmem:[#allocation26_spill] sm:$0xff]  ;;  %v10529_v51 = vand.u32 4294901760, %v10528_v38 }
 0x383   :  { %v10539_v38 = vld [vmem:[#allocation46_spill] sm:$0xff] }
 0x384   :  { %6303 = vmatprep.mubr.f32.mxu0 %v3060_v20  ;;  %v10525_v20 = vld [vmem:[#allocation14_spill] sm:$0xff] }
 0x386   :  { %6304 = vmatmul.mubr.f32.gmra.mrb[62].mxu0 %v3070_v48  ;;  %v10519_v48 = vld [vmem:[#allocation52_spill] sm:$0xff] }
 0x387   :  { %6338 = vmatprep.mubr.f32.mxu0 %v9134_v29 }
 0x38a   :  { %6339 = vmatmul.mubr.f32.vlgmr.msra.gmra.mrb[32].mxu0 %v9131_v26 }
 0x38b   :  { %6965 = vmatpush3.bf16.msra.mxu0 %v9022_v9  ;;  %6341 = vmatprep.mubr.f32.mxu0 %v9165_v33  ;;  %v6990_v9 = vpack.c.bf16 %v9013_v12, %v9011_v37 }
 0x38c   :  { %6967 = vmatprep.subr.bf16.mxu0 %v9036_v53 }
 0x38e   :  { %6342 = vmatmul.mubr.f32.gmra.mrb[34].mxu0 %v9161_v25 }
 0x38f   :  { %6344 = vmatprep.mubr.f32.mxu0 %v9193_v1  ;;  %6969 = vmatpush3.bf16.msra.mxu0 %v9036_v53  ;;  %v10511_v53 = vld [vmem:[#allocation42_spill] sm:$0xff] }
 0x390   :  { %6971 = vmatprep.subr.bf16.mxu0 %v9050_v32 }
 0x392   :  { %6345 = vmatmul.mubr.f32.gmra.mrb[36].mxu0 %v9186_v41 }
 0x393   :  { %6347 = vmatprep.mubr.f32.mxu0 %v9213_v43  ;;  %6973 = vmatpush3.bf16.msra.mxu0 %v9050_v32  ;;  %v10512_v32 = vld [vmem:[#allocation20_spill] sm:$0xff] }
 0x394   :  { %6975 = vmatprep.subr.bf16.mxu0 %v9064_v60 }
 0x396   :  { %6348 = vmatmul.mubr.f32.gmra.mrb[38].mxu0 %v9209_v31 }
 0x397   :  { %6350 = vmatprep.mubr.f32.mxu0 %v9239_v28  ;;  %6977 = vmatpush3.bf16.msra.mxu0 %v9064_v60  ;;  %v10513_v60 = vld [vmem:[#allocation51_spill] sm:$0xff] }
 0x398   :  { %6979 = vmatprep.subr.bf16.mxu0 %v9078_v24 }
 0x39a   :  { %6351 = vmatmul.mubr.f32.gmra.mrb[40].mxu0 %v9233_v5 }
 0x39b   :  { %6353 = vmatprep.mubr.f32.mxu0 %v9263_v35  ;;  %6981 = vmatpush3.bf16.msra.mxu0 %v9078_v24  ;;  %v10514_v24 = vld [vmem:[#allocation50_spill] sm:$0xff] }
 0x39c   :  { %6983 = vmatprep.subr.bf16.mxu0 %v9092_v19 }
 0x39e   :  { %6354 = vmatmul.mubr.f32.gmra.mrb[42].mxu0 %v9258_v55 }
 0x39f   :  { %6356 = vmatprep.mubr.f32.mxu0 %v9291_v36  ;;  %6985 = vmatpush3.bf16.msra.mxu0 %v9092_v19  ;;  %v10515_v19 = vld [vmem:[#allocation21_spill] sm:$0xff] }
 0x3a0   :  { %6987 = vmatprep.subr.bf16.mxu0 %v9113_v18  ;;  %v10553_v36 = vld [vmem:[#allocation33_spill] sm:$0xff] }
 0x3a1   :  { %v10554_v55 = vand.u32 4294901760, %v10553_v36  ;;  %v10563_v36 = vld [vmem:[#allocation40_spill] sm:$0xff] }
 0x3a2   :  { %6357 = vmatmul.mubr.f32.gmra.mrb[44].mxu0 %v9284_v58  ;;  %v10551_v58 = vld [vmem:[#allocation32_spill] sm:$0xff] }
 0x3a3   :  { %6359 = vmatprep.mubr.f32.mxu0 %v9313_v54  ;;  %6989 = vmatpush3.bf16.msra.mxu0 %v9113_v18  ;;  %v10516_v18 = vld [vmem:[#allocation45_spill] sm:$0xff]  ;;  %v10550_v54 = vand.u32 4294901760, %v9178_v62 }
 0x3a4   :  { %6991 = vmatprep.subr.bf16.mxu0 %v6990_v9 }
 0x3a6   :  { %6360 = vmatmul.mubr.f32.gmra.mrb[46].mxu0 %v9309_v8 }
 0x3a7   :  { %6362 = vmatprep.mubr.f32.mxu0 %v9335_v40  ;;  %6993 = vmatpush3.bf16.msra.mxu0 %v6990_v9  ;;  %v10526_v9 = vld [vmem:[#allocation19_spill] sm:$0xff] }
 0x3a8   :  { %6995 = vmatprep.subr.bf16.mxu0 %v8802_v6 }
 0x3aa   :  { %6363 = vmatmul.mubr.f32.gmra.mrb[48].mxu0 %v9331_v11  ;;  %v10547_v11 = vld [vmem:[#allocation6_spill] sm:$0xff] }
 0x3ab   :  { %6365 = vmatprep.mubr.f32.mxu0 %v9357_v56  ;;  %v10548_v40 = vand.u32 4294901760, %v10547_v11  ;;  %v10559_v11 = vld [vmem:[#allocation37_spill] sm:$0xff] }
 0x3ae   :  { %6366 = vmatmul.mubr.f32.gmra.mrb[50].mxu0 %v9353_v30  ;;  %v10545_v30 = vld [vmem:[#allocation31_spill] sm:$0xff] }
 0x3af   :  { %6368 = vmatprep.mubr.f32.mxu0 %v9378_v61  ;;  %v10544_v61 = vand.u32 4294901760, %v9155_v17  ;;  %v10546_v56 = vand.u32 4294901760, %v10545_v30  ;;  %v10556_v30 = vand.u32 4294901760, %v10511_v53 }
 0x3b1   :  { %v7030_v8 = vpack.c.bf16 %v10548_v40, %v10546_v56 }
 0x3b2   :  { %6369 = vmatmul.mubr.f32.gmra.mrb[52].mxu0 %v9374_v42  ;;  %v10543_v42 = vld [vmem:[#allocation61_spill] sm:$0xff] }
 0x3b3   :  { %6371 = vmatprep.mubr.f32.mxu0 %v9399_v44  ;;  %v10538_v44 = vld [vmem:[#allocation9_spill] sm:$0xff] }
 0x3b6   :  { %6372 = vmatmul.mubr.f32.gmra.mrb[54].mxu0 %v9395_v16  ;;  %v10537_v16 = vld [vmem:[#allocation49_spill] sm:$0xff] }
 0x3b7   :  { %6374 = vmatprep.mubr.f32.mxu0 %v9419_v7  ;;  %v10536_v7 = vld [vmem:[#allocation36_spill] sm:$0xff] }
 0x3ba   :  { %6375 = vmatmul.mubr.f32.gmra.mrb[56].mxu0 %v9415_v27  ;;  %v10535_v27 = vld [vmem:[#allocation8_spill] sm:$0xff] }
 0x3bb   :  { %6377 = vmatprep.mubr.f32.mxu0 %v9439_v4  ;;  %v10534_v4 = vld [vmem:[#allocation25_spill] sm:$0xff] }
 0x3be   :  { %6378 = vmatmul.mubr.f32.gmra.mrb[58].mxu0 %v9435_v10  ;;  %v10533_v10 = vld [vmem:[#allocation27_spill] sm:$0xff] }
 0x3bf   :  { %6380 = vmatprep.mubr.f32.mxu0 %v9459_v23  ;;  %v10532_v23 = vld [vmem:[#allocation18_spill] sm:$0xff] }
 0x3c2   :  { %6381 = vmatmul.mubr.f32.gmra.mrb[60].mxu0 %v9455_v0 }
 0x3c3   :  { %6383 = vmatprep.mubr.f32.mxu0 %v9478_v52 }
 0x3c6   :  { %6384 = vmatmul.mubr.f32.gmra.mrb[62].mxu0 %v9475_v49  ;;  %v10530_v49 = vld [vmem:[#allocation29_spill] sm:$0xff] }
 0x3c7   :  { %6418 = vmatprep.mubr.f32.mxu0 %v9155_v17  ;;  %v10531_v52 = vand.u32 4294901760, %v10530_v49  ;;  %v10540_v49 = vld [vmem:[#allocation43_spill] sm:$0xff]  ;;  %v10555_v17 = vand.u32 4294901760, %v9174_v59 }
 0x3c9   :  { %v7026_v0 = vpack.c.bf16 %v10531_v52, %v10529_v51  ;;  %v10541_v52 = vld [vmem:[#allocation58_spill] sm:$0xff] }
 0x3ca   :  { %6419 = vmatmul.mubr.f32.vlgmr.msra.gmra.mrb[32].mxu0 %v9145_v45  ;;  %v10542_v51 = vld [vmem:[#allocation54_spill] sm:$0xff] }
 0x3cb   :  { %6997 = vmatpush3.bf16.msra.mxu0 %v8802_v6  ;;  %6421 = vmatprep.mubr.f32.mxu0 %v9178_v62 }
 0x3cc   :  { %6999 = vmatprep.subr.bf16.mxu0 %v8812_v46 }
 0x3ce   :  { %6422 = vmatmul.mubr.f32.gmra.mrb[34].mxu0 %v9174_v59  ;;  %v10564_v59 = vand.u32 4294901760, %v10563_v36  ;;  %v10584_v36 = vand.u32 4294901760, %v10526_v9 }
 0x3cf   :  { %6424 = vmatprep.mubr.f32.mxu0 %v10511_v53  ;;  %7001 = vmatpush3.bf16.msra.mxu0 %v8812_v46  ;;  %v10569_v53 = vld [vmem:[#allocation10_spill] sm:$0xff] }
 0x3d0   :  { %7003 = vmatprep.subr.bf16.mxu0 %v10512_v32 }
 0x3d2   :  { %6425 = vmatmul.mubr.f32.gmra.mrb[36].mxu0 %v10513_v60 }
 0x3d3   :  { %6427 = vmatprep.mubr.f32.mxu0 %v10514_v24  ;;  %7005 = vmatpush3.bf16.msra.mxu0 %v10512_v32 }
 0x3d4   :  { %7007 = vmatprep.subr.bf16.mxu0 %v10515_v19 }
 0x3d6   :  { %6428 = vmatmul.mubr.f32.gmra.mrb[38].mxu0 %v10516_v18 }
 0x3d7   :  { %6430 = vmatprep.mubr.f32.mxu0 %v10517_v21  ;;  %7009 = vmatpush3.bf16.msra.mxu0 %v10515_v19 }
 0x3d8   :  { %7011 = vmatprep.subr.bf16.mxu0 %v10518_v22 }
 0x3da   :  { %6431 = vmatmul.mubr.f32.gmra.mrb[40].mxu0 %v10519_v48 }
 0x3db   :  { %6433 = vmatprep.mubr.f32.mxu0 %v10520_v13  ;;  %7013 = vmatpush3.bf16.msra.mxu0 %v10518_v22 }
 0x3dc   :  { %7015 = vmatprep.subr.bf16.mxu0 %v10521_v63 }
 0x3de   :  { %6434 = vmatmul.mubr.f32.gmra.mrb[42].mxu0 %v10522_v14 }
 0x3df   :  { %6436 = vmatprep.mubr.f32.mxu0 %v10523_v3  ;;  %7017 = vmatpush3.bf16.msra.mxu0 %v10521_v63 }
 0x3e0   :  { %7019 = vmatprep.subr.bf16.mxu0 %v10524_v2 }
 0x3e2   :  { %6437 = vmatmul.mubr.f32.gmra.mrb[44].mxu0 %v10525_v20 }
 0x3e3   :  { %6439 = vmatprep.mubr.f32.mxu0 %v10526_v9  ;;  %7021 = vmatpush3.bf16.msra.mxu0 %v10524_v2  ;;  %v10552_v2 = vand.u32 4294901760, %v10551_v58  ;;  %v10562_v58 = vand.u32 4294901760, %v10514_v24  ;;  %v10590_v9 = vand.u32 4294901760, %v10537_v16 }
 0x3e4   :  { %7023 = vmatprep.subr.bf16.mxu0 %v10527_v50 }
 0x3e5   :  { %v7034_v63 = vpack.c.bf16 %v10554_v55, %v10552_v2  ;;  %v10565_v55 = vld [vmem:[#allocation48_spill] sm:$0xff]  ;;  %v10571_v2 = vld [vmem:[#allocation11_spill] sm:$0xff] }
 0x3e6   :  { %6440 = vmatmul.mubr.f32.gmra.mrb[46].mxu0 %v10532_v23  ;;  %v10566_v56 = vand.u32 4294901760, %v10565_v55  ;;  %v10572_v24 = vand.u32 4294901760, %v10571_v2  ;;  %v10614_v55 = vld [vmem:[#allocation44_spill] sm:$0xff]  ;;  %v10621_v2 = vld [vmem:[#allocation59_spill] sm:$0xff] }
 0x3e7   :  { %6442 = vmatprep.mubr.f32.mxu0 %v10533_v10  ;;  %7025 = vmatpush3.bf16.msra.mxu0 %v10527_v50  ;;  %v10549_v50 = vand.u32 4294901760, %v9145_v45  ;;  %v10557_v45 = vld [vmem:[#allocation35_spill] sm:$0xff] }
 0x3e8   :  { %7027 = vmatprep.subr.bf16.mxu0 %v7026_v0  ;;  %v10558_v40 = vand.u32 4294901760, %v10557_v45 }
 0x3ea   :  { %6443 = vmatmul.mubr.f32.gmra.mrb[48].mxu0 %v10534_v4 }
 0x3eb   :  { %6445 = vmatprep.mubr.f32.mxu0 %v10535_v27 }
 0x3ee   :  { %6446 = vmatmul.mubr.f32.gmra.mrb[50].mxu0 %v10536_v7 }
 0x3ef   :  { %6448 = vmatprep.mubr.f32.mxu0 %v10537_v16  ;;  %v10597_v16 = vand.u32 4294901760, %v10543_v42 }
 0x3f2   :  { %6449 = vmatmul.mubr.f32.gmra.mrb[52].mxu0 %v10538_v44 }
 0x3f3   :  { %6451 = vmatprep.mubr.f32.mxu0 %v10539_v38 }
 0x3f6   :  { %6452 = vmatmul.mubr.f32.gmra.mrb[54].mxu0 %v10540_v49 }
 0x3f7   :  { %6454 = vmatprep.mubr.f32.mxu0 %v10541_v52 }
 0x3fa   :  { %6455 = vmatmul.mubr.f32.gmra.mrb[56].mxu0 %v10542_v51 }
 0x3fb   :  { %6457 = vmatprep.mubr.f32.mxu0 %v9450_v34 }
 0x3fe   :  { %6458 = vmatmul.mubr.f32.gmra.mrb[58].mxu0 %v10543_v42  ;;  %v10604_v42 = vld [vmem:[#allocation13_spill] sm:$0xff] }
 0x3ff   :  { %6460 = vmatprep.mubr.f32.mxu0 %v9470_v47 }
 0x402   :  { %6461 = vmatmul.mubr.f32.gmra.mrb[60].mxu0 %v9464_v39 }
 0x403   :  { %6463 = vmatprep.mubr.f32.mxu0 %v9488_v57 }
 0x406   :  { %6464 = vmatmul.mubr.f32.gmra.mrb[62].mxu0 %v9482_v15 }
 0x407   :  { %6498 = vmatprep.mubr.f32.mxu0 %v10544_v61  ;;  %v10560_v61 = vand.u32 4294901760, %v10559_v11 }
 0x409   :  { %v7038_v62 = vpack.c.bf16 %v10560_v61, %v10558_v40  ;;  %v10577_v40 = vld [vmem:[#allocation30_spill] sm:$0xff]  ;;  %v10579_v61 = vand.u32 4294901760, %v10522_v14  ;;  %v10585_v14 = vand.u32 4294901760, %v10532_v23  ;;  %v10591_v23 = vand.u32 4294901760, %v10538_v44 }
 0x40a   :  { %6499 = vmatmul.mubr.f32.vlgmr.msra.gmra.mrb[32].mxu0 %v10549_v50  ;;  %v10568_v50 = vand.u32 4294901760, %v10517_v21  ;;  %v10578_v21 = vand.u32 4294901760, %v10577_v40  ;;  %v10598_v44 = vand.u32 4294901760, %v9470_v47  ;;  %v10608_v47 = vld [vmem:[#allocation28_spill] sm:$0xff] }
 0x40b   :  { %7029 = vmatpush3.bf16.msra.mxu0 %v7026_v0  ;;  %6501 = vmatprep.mubr.f32.mxu0 %v10550_v54  ;;  %v10561_v54 = vand.u32 4294901760, %v10513_v60  ;;  %v7042_v0 = vpack.c.bf16 %v10566_v56, %v10564_v59  ;;  %v10570_v60 = vand.u32 4294901760, %v10569_v53  ;;  %v10593_v59 = vand.u32 4294901760, %v10540_v49  ;;  %v10615_v56 = vld [vmem:[#allocation38_spill] sm:$0xff]  ;;  %v10619_v53 = vld [vmem:[#allocation47_spill] sm:$0xff] }
 0x40c   :  { %7031 = vmatprep.subr.bf16.mxu0 %v7030_v8  ;;  %v10600_v49 = vand.u32 4294901760, %v9488_v57  ;;  %v10609_v57 = vld [vmem:[#allocation16_spill] sm:$0xff] }
 0x40e   :  { %6502 = vmatmul.mubr.f32.gmra.mrb[34].mxu0 %v10555_v17  ;;  %v7046_v17 = vpack.c.bf16 %v10572_v24, %v10570_v60  ;;  %v10620_v60 = vld [vmem:[#allocation60_spill] sm:$0xff] }
 0x40f   :  { %6504 = vmatprep.mubr.f32.mxu0 %v10556_v30  ;;  %7033 = vmatpush3.bf16.msra.mxu0 %v7030_v8  ;;  %v10567_v8 = vand.u32 4294901760, %v10516_v18  ;;  %v10574_v30 = vand.u32 4294901760, %v10520_v13  ;;  %v10575_v18 = vld [vmem:[#allocation5_spill] sm:$0xff]  ;;  %v10582_v13 = vand.u32 4294901760, %v9013_v12  ;;  %v10588_v12 = vand.u32 4294901760, %v10535_v27  ;;  %v10622_v24 = vld [vmem:[#allocation64_spill] sm:$0xff] }
 0x410   :  { %7035 = vmatprep.subr.bf16.mxu0 %v7034_v63  ;;  %v10576_v45 = vand.u32 4294901760, %v10575_v18  ;;  %v10595_v27 = vand.u32 4294901760, %v10542_v51  ;;  %v10613_v51 = vld [vmem:[#allocation7_spill] sm:$0xff] }
 0x412   :  { %6505 = vmatmul.mubr.f32.gmra.mrb[36].mxu0 %v10561_v54  ;;  %v7050_v11 = vpack.c.bf16 %v10578_v21, %v10576_v45 }
 0x413   :  { %6507 = vmatprep.mubr.f32.mxu0 %v10562_v58  ;;  %7037 = vmatpush3.bf16.msra.mxu0 %v7034_v63  ;;  %v10573_v63 = vand.u32 4294901760, %v10519_v48  ;;  %v10581_v48 = vand.u32 4294901760, %v9011_v37  ;;  %v10583_v58 = vand.u32 4294901760, %v10525_v20  ;;  %v10587_v37 = vand.u32 4294901760, %v10534_v4 }
 0x414   :  { %7039 = vmatprep.subr.bf16.mxu0 %v7038_v62  ;;  %v10589_v20 = vand.u32 4294901760, %v10536_v7  ;;  %v10594_v4 = vand.u32 4294901760, %v10541_v52  ;;  %v10596_v7 = vand.u32 4294901760, %v9450_v34  ;;  %v10601_v52 = vand.u32 4294901760, %v9482_v15  ;;  %v10605_v34 = vld [vmem:[#allocation26_spill] sm:$0xff]  ;;  %v10606_v15 = vld [vmem:[#allocation12_spill] sm:$0xff] }
 0x415   :  { %v7054_v54 = vpack.c.bf16 %v10582_v13, %v10581_v48 }
 0x416   :  { %6508 = vmatmul.mubr.f32.gmra.mrb[38].mxu0 %v10567_v8  ;;  %v10617_v8 = vld [vmem:[#allocation39_spill] sm:$0xff] }
 0x417   :  { %6510 = vmatprep.mubr.f32.mxu0 %v10568_v50  ;;  %7041 = vmatpush3.bf16.msra.mxu0 %v7038_v62  ;;  %v10580_v62 = vand.u32 4294901760, %v10523_v3  ;;  %v10586_v3 = vand.u32 4294901760, %v10533_v10  ;;  %v10592_v10 = vand.u32 4294901760, %v10539_v38  ;;  %v10599_v38 = vand.u32 4294901760, %v9464_v39  ;;  %v10607_v39 = vld [vmem:[#allocation17_spill] sm:$0xff] }
 0x418   :  { %7043 = vmatprep.subr.bf16.mxu0 %v7042_v0  ;;  %v10618_v50 = vld [vmem:[#allocation53_spill] sm:$0xff] }
 0x41a   :  { %6511 = vmatmul.mubr.f32.gmra.mrb[40].mxu0 %v10573_v63  ;;  %v10624_v63 = vld [vmem:[#allocation66_spill] sm:$0xff] }
 0x41b   :  { %6513 = vmatprep.mubr.f32.mxu0 %v10574_v30  ;;  %7045 = vmatpush3.bf16.msra.mxu0 %v7042_v0  ;;  %v10616_v0 = vld [vmem:[#allocation41_spill] sm:$0xff] }
 0x41c   :  { %7047 = vmatprep.subr.bf16.mxu0 %v7046_v17  ;;  %v10625_v30 = vld [vmem:[#allocation65_spill] sm:$0xff] }
 0x41e   :  { %6514 = vmatmul.mubr.f32.gmra.mrb[42].mxu0 %v10579_v61 }
 0x41f   :  { %6516 = vmatprep.mubr.f32.mxu0 %v10580_v62  ;;  %7049 = vmatpush3.bf16.msra.mxu0 %v7046_v17  ;;  %v10623_v17 = vld [vmem:[#allocation63_spill] sm:$0xff] }
 0x420   :  { %7051 = vmatprep.subr.bf16.mxu0 %v7050_v11 }
 0x422   :  { %6517 = vmatmul.mubr.f32.gmra.mrb[44].mxu0 %v10583_v58 }
 0x423   :  { %6519 = vmatprep.mubr.f32.mxu0 %v10584_v36  ;;  %7053 = vmatpush3.bf16.msra.mxu0 %v7050_v11 }
 0x424   :  { %7055 = vmatprep.subr.bf16.mxu0 %v7054_v54 }
 0x426   :  { %6520 = vmatmul.mubr.f32.gmra.mrb[46].mxu0 %v10585_v14 }
 0x427   :  { %6522 = vmatprep.mubr.f32.mxu0 %v10586_v3  ;;  %7057 = vmatpush3.bf16.msra.mxu0 %v7054_v54 }
 0x428   :  { %7059 = vmatprep.subr.bf16.mxu0 %v8802_v6 }
 0x42a   :  { %6523 = vmatmul.mubr.f32.gmra.mrb[48].mxu0 %v10587_v37 }
 0x42b   :  { %6525 = vmatprep.mubr.f32.mxu0 %v10588_v12 }
 0x42e   :  { %6526 = vmatmul.mubr.f32.gmra.mrb[50].mxu0 %v10589_v20 }
 0x42f   :  { %6528 = vmatprep.mubr.f32.mxu0 %v10590_v9 }
 0x432   :  { %6529 = vmatmul.mubr.f32.gmra.mrb[52].mxu0 %v10591_v23 }
 0x433   :  { %6531 = vmatprep.mubr.f32.mxu0 %v10592_v10 }
 0x436   :  { %6532 = vmatmul.mubr.f32.gmra.mrb[54].mxu0 %v10593_v59 }
 0x437   :  { %6534 = vmatprep.mubr.f32.mxu0 %v10594_v4 }
 0x43a   :  { %6535 = vmatmul.mubr.f32.gmra.mrb[56].mxu0 %v10595_v27 }
 0x43b   :  { %6537 = vmatprep.mubr.f32.mxu0 %v10596_v7 }
 0x43e   :  { %6538 = vmatmul.mubr.f32.gmra.mrb[58].mxu0 %v10597_v16 }
 0x43f   :  { %6540 = vmatprep.mubr.f32.mxu0 %v10598_v44 }
 0x442   :  { %6541 = vmatmul.mubr.f32.gmra.mrb[60].mxu0 %v10599_v38 }
 0x443   :  { %6543 = vmatprep.mubr.f32.mxu0 %v10600_v49 }
 0x446   :  { %6544 = vmatmul.mubr.f32.gmra.mrb[62].mxu0 %v10601_v52 }
 0x447   :  { %6578 = vmatprep.mubr.f32.mxu0 %v9134_v29 }
 0x44a   :  { %6579 = vmatmul.mubr.f32.vlgmr.msra.gmra.mrb[32].mxu0 %v9131_v26 }
 0x44b   :  { %7061 = vmatpush3.bf16.msra.mxu0 %v8802_v6  ;;  %6581 = vmatprep.mubr.f32.mxu0 %v9165_v33  ;;  %v10602_v6 = vld [vmem:[#allocation3_spill] sm:$0xff] }
 0x44c   :  { %7063 = vmatprep.subr.bf16.mxu0 %v8812_v46 }
 0x44e   :  { %6582 = vmatmul.mubr.f32.gmra.mrb[34].mxu0 %v9161_v25 }
 0x44f   :  { %6584 = vmatprep.mubr.f32.mxu0 %v9193_v1  ;;  %7065 = vmatpush3.bf16.msra.mxu0 %v8812_v46  ;;  %v10603_v46 = vld [vmem:[#allocation56_spill] sm:$0xff] }
 0x450   :  { %7067 = vmatprep.subr.bf16.mxu0 %v10512_v32 }
 0x452   :  { %6585 = vmatmul.mubr.f32.gmra.mrb[36].mxu0 %v9186_v41 }
 0x453   :  { %6587 = vmatprep.mubr.f32.mxu0 %v9213_v43  ;;  %7069 = vmatpush3.bf16.msra.mxu0 %v10512_v32  ;;  %v10610_v32 = vld [vmem:[#allocation23_spill] sm:$0xff] }
 0x454   :  { %7071 = vmatprep.subr.bf16.mxu0 %v10515_v19 }
 0x456   :  { %6588 = vmatmul.mubr.f32.gmra.mrb[38].mxu0 %v9209_v31 }
 0x457   :  { %6590 = vmatprep.mubr.f32.mxu0 %v9239_v28  ;;  %7073 = vmatpush3.bf16.msra.mxu0 %v10515_v19  ;;  %v10611_v19 = vld [vmem:[#allocation22_spill] sm:$0xff] }
 0x458   :  { %7075 = vmatprep.subr.bf16.mxu0 %v10518_v22 }
 0x45a   :  { %6591 = vmatmul.mubr.f32.gmra.mrb[40].mxu0 %v9233_v5 }
 0x45b   :  { %6593 = vmatprep.mubr.f32.mxu0 %v9263_v35  ;;  %7077 = vmatpush3.bf16.msra.mxu0 %v10518_v22  ;;  %v10612_v22 = vld [vmem:[#allocation34_spill] sm:$0xff] }
 0x45c   :  { %7079 = vmatprep.subr.bf16.mxu0 %v10602_v6 }
 0x45e   :  { %6594 = vmatmul.mubr.f32.gmra.mrb[42].mxu0 %v10603_v46 }
 0x45f   :  { %6596 = vmatprep.mubr.f32.mxu0 %v10604_v42  ;;  %7081 = vmatpush3.bf16.msra.mxu0 %v10602_v6 }
 0x460   :  { %7083 = vmatprep.subr.bf16.mxu0 %v10605_v34 }
 0x462   :  { %6597 = vmatmul.mubr.f32.gmra.mrb[44].mxu0 %v10606_v15 }
 0x463   :  { %6599 = vmatprep.mubr.f32.mxu0 %v10607_v39  ;;  %7085 = vmatpush3.bf16.msra.mxu0 %v10605_v34 }
 0x464   :  { %7087 = vmatprep.subr.bf16.mxu0 %v10608_v47 }
 0x466   :  { %6600 = vmatmul.mubr.f32.gmra.mrb[46].mxu0 %v10609_v57 }
 0x467   :  { %6602 = vmatprep.mubr.f32.mxu0 %v10610_v32  ;;  %7089 = vmatpush3.bf16.msra.mxu0 %v10608_v47 }
 0x46a   :  { %6603 = vmatmul.mubr.f32.gmra.mrb[48].mxu0 %v10611_v19 }
 0x46b   :  { %6605 = vmatprep.mubr.f32.mxu0 %v10612_v22 }
 0x46e   :  { %6606 = vmatmul.mubr.f32.gmra.mrb[50].mxu0 %v10613_v51 }
 0x46f   :  { %6608 = vmatprep.mubr.f32.mxu0 %v10614_v55 }
 0x472   :  { %6609 = vmatmul.mubr.f32.gmra.mrb[52].mxu0 %v10615_v56 }
 0x473   :  { %6611 = vmatprep.mubr.f32.mxu0 %v10616_v0 }
 0x476   :  { %6612 = vmatmul.mubr.f32.gmra.mrb[54].mxu0 %v10617_v8 }
 0x477   :  { %6614 = vmatprep.mubr.f32.mxu0 %v10618_v50 }
 0x47a   :  { %6615 = vmatmul.mubr.f32.gmra.mrb[56].mxu0 %v10619_v53 }
 0x47b   :  { %6617 = vmatprep.mubr.f32.mxu0 %v10620_v60 }
 0x47e   :  { %6618 = vmatmul.mubr.f32.gmra.mrb[58].mxu0 %v10621_v2 }
 0x47f   :  { %6620 = vmatprep.mubr.f32.mxu0 %v10622_v24 }
 0x482   :  { %6621 = vmatmul.mubr.f32.gmra.mrb[60].mxu0 %v10623_v17 }
 0x483   :  { %6623 = vmatprep.mubr.f32.mxu0 %v10624_v63 }
 0x486   :  { %6624 = vmatmul.mubr.f32.gmra.mrb[62].mxu0 %v10625_v30 }
 0x487   :  { %6658 = vmatprep.mubr.f32.mxu0 %v9134_v29 }
 0x48a   :  { %6659 = vmatmul.mubr.f32.vlgmr.msra.gmra.mrb[32].mxu0 %v9131_v26  ;;  %v9775_v26 = vld [vmem:[%s9915_s4 + $0x1] ss:$0 sm:$0xff] }
 0x48b   :  { %6661 = vmatprep.mubr.f32.mxu0 %v9165_v33 }
 0x48e   :  { %6662 = vmatmul.mubr.f32.gmra.mrb[34].mxu0 %v9161_v25 }
 0x48f   :  { %6664 = vmatprep.mubr.f32.mxu0 %v9193_v1 }
 0x492   :  { %6665 = vmatmul.mubr.f32.gmra.mrb[36].mxu0 %v9186_v41 }
 0x493   :  { %6667 = vmatprep.mubr.f32.mxu0 %v9213_v43 }
 0x496   :  { %6668 = vmatmul.mubr.f32.gmra.mrb[38].mxu0 %v9209_v31 }
 0x497   :  { %6670 = vmatprep.mubr.f32.mxu0 %v9239_v28 }
 0x49a   :  { %6671 = vmatmul.mubr.f32.gmra.mrb[40].mxu0 %v9233_v5 }
 0x49b   :  { %6673 = vmatprep.mubr.f32.mxu0 %v9263_v35 }
 0x49e   :  { %6674 = vmatmul.mubr.f32.gmra.mrb[42].mxu0 %v10603_v46 }
 0x49f   :  { %6676 = vmatprep.mubr.f32.mxu0 %v10604_v42 }
 0x4a2   :  { %6677 = vmatmul.mubr.f32.gmra.mrb[44].mxu0 %v10606_v15 }
 0x4a3   :  { %6679 = vmatprep.mubr.f32.mxu0 %v10607_v39 }
 0x4a6   :  { %6680 = vmatmul.mubr.f32.gmra.mrb[46].mxu0 %v10609_v57 }
 0x4a7   :  { %6682 = vmatprep.mubr.f32.mxu0 %v10610_v32 }
 0x4aa   :  { %6683 = vmatmul.mubr.f32.gmra.mrb[48].mxu0 %v10611_v19 }
 0x4ab   :  { %6685 = vmatprep.mubr.f32.mxu0 %v10612_v22 }
 0x4ae   :  { %6686 = vmatmul.mubr.f32.gmra.mrb[50].mxu0 %v10613_v51 }
 0x4af   :  { %6688 = vmatprep.mubr.f32.mxu0 %v10614_v55 }
 0x4b2   :  { %6689 = vmatmul.mubr.f32.gmra.mrb[52].mxu0 %v10615_v56 }
 0x4b3   :  { %6691 = vmatprep.mubr.f32.mxu0 %v10616_v0 }
 0x4b6   :  { %6692 = vmatmul.mubr.f32.gmra.mrb[54].mxu0 %v10617_v8 }
 0x4b7   :  { %6694 = vmatprep.mubr.f32.mxu0 %v10618_v50 }
 0x4ba   :  { %6695 = vmatmul.mubr.f32.gmra.mrb[56].mxu0 %v10619_v53 }
 0x4bb   :  { %6697 = vmatprep.mubr.f32.mxu0 %v10620_v60 }
 0x4be   :  { %6698 = vmatmul.mubr.f32.gmra.mrb[58].mxu0 %v10621_v2 }
 0x4bf   :  { %6700 = vmatprep.mubr.f32.mxu0 %v10622_v24 }
 0x4c2   :  { %6701 = vmatmul.mubr.f32.gmra.mrb[60].mxu0 %v10623_v17 }
 0x4c3   :  { %6703 = vmatprep.mubr.f32.mxu0 %v10624_v63 }
 0x4c6   :  { %6704 = vmatmul.mubr.f32.gmra.mrb[62].mxu0 %v10625_v30 }
 0x55d   :  { %v6660_v35 = vpop.f32.mrb[32].mxu0 }
 0x55e   :  { %v7138_v43 = vadd.f32 %v6660_v35, %v9775_v26  ;;  %v4459_v29 = vpop.f32.mrb[33].mxu0 }
 0x55f   :  { %v7139_v33 = vadd.f32 %v9775_v26, %v4459_v29 }
 0x560   :  { %v4650_v41 = vmax.f32 %v7138_v43, 0.0 }
 0x561   :  { %v4649_v25 = vmax.f32 %v7139_v33, 0.0  ;;  %v6663_v1 = vpop.f32.mrb[34].mxu0 }
 0x562   :  { %4682 = vst [vmem:[%s9916_s5 + $0x8] sm:$0xff] %v4650_v41  ;;  %v4947_v31 = vmul.f32 %v4650_v41, %v4650_v41  ;;  %v7140_v5 = vadd.f32 %v6663_v1, %v9775_v26  ;;  %v4471_v28 = vpop.f32.mrb[35].mxu0 }
 0x563   :  { %4681 = vst [vmem:[%s9916_s5] sm:$0xff] %v4649_v25  ;;  %v4908_v18 = vadd.f32 %v4650_v41, %v4649_v25  ;;  %v4946_v45 = vmul.f32 %v4649_v25, %v4649_v25  ;;  %v7141_v40 = vadd.f32 %v9775_v26, %v4471_v28 }
 0x564   :  { %v4652_v21 = vmax.f32 %v7140_v5, 0.0 }
 0x565   :  { %v4978_v11 = vadd.f32 %v4947_v31, %v4946_v45  ;;  %v4651_v61 = vmax.f32 %v7141_v40, 0.0  ;;  %v6666_v62 = vpop.f32.mrb[36].mxu0 }
 0x566   :  { %4684 = vst [vmem:[%s9916_s5 + $0x18] sm:$0xff] %v4652_v21  ;;  %v7142_v48 = vadd.f32 %v6666_v62, %v9775_v26  ;;  %v4483_v13 = vpop.f32.mrb[37].mxu0  ;;  %v4949_v3 = vmul.f32 %v4652_v21, %v4652_v21 }
 0x567   :  { %4683 = vst [vmem:[%s9916_s5 + $0x10] sm:$0xff] %v4651_v61  ;;  %v4909_v54 = vadd.f32 %v4908_v18, %v4651_v61  ;;  %v4948_v58 = vmul.f32 %v4651_v61, %v4651_v61  ;;  %v7143_v36 = vadd.f32 %v9775_v26, %v4483_v13 }
 0x568   :  { %v4654_v14 = vmax.f32 %v7142_v48, 0.0 }
 0x569   :  { %v4979_v37 = vadd.f32 %v4978_v11, %v4948_v58  ;;  %v4653_v12 = vmax.f32 %v7143_v36, 0.0  ;;  %v4910_v20 = vadd.f32 %v4909_v54, %v4652_v21  ;;  %v6669_v9 = vpop.f32.mrb[38].mxu0 }
 0x56a   :  { %4686 = vst [vmem:[%s9916_s5 + $0x28] sm:$0xff] %v4654_v14  ;;  %v7144_v23 = vadd.f32 %v6669_v9, %v9775_v26  ;;  %v4495_v10 = vpop.f32.mrb[39].mxu0  ;;  %v4951_v44 = vmul.f32 %v4654_v14, %v4654_v14 }
 0x56b   :  { %4685 = vst [vmem:[%s9916_s5 + $0x20] sm:$0xff] %v4653_v12  ;;  %v4911_v59 = vadd.f32 %v4910_v20, %v4653_v12  ;;  %v4950_v4 = vmul.f32 %v4653_v12, %v4653_v12  ;;  %v4980_v27 = vadd.f32 %v4979_v37, %v4949_v3  ;;  %v7145_v7 = vadd.f32 %v9775_v26, %v4495_v10 }
 0x56c   :  { %v4656_v16 = vmax.f32 %v7144_v23, 0.0 }
 0x56d   :  { %v4981_v38 = vadd.f32 %v4980_v27, %v4950_v4  ;;  %v4655_v49 = vmax.f32 %v7145_v7, 0.0  ;;  %v4912_v52 = vadd.f32 %v4911_v59, %v4654_v14  ;;  %v6672_v6 = vpop.f32.mrb[40].mxu0 }
 0x56e   :  { %4688 = vst [vmem:[%s9916_s5 + $0x38] sm:$0xff] %v4656_v16  ;;  %v7146_v46 = vadd.f32 %v6672_v6, %v9775_v26  ;;  %v4507_v42 = vpop.f32.mrb[41].mxu0  ;;  %v4953_v32 = vmul.f32 %v4656_v16, %v4656_v16 }
 0x56f   :  { %4687 = vst [vmem:[%s9916_s5 + $0x30] sm:$0xff] %v4655_v49  ;;  %v4913_v34 = vadd.f32 %v4912_v52, %v4655_v49  ;;  %v4952_v15 = vmul.f32 %v4655_v49, %v4655_v49  ;;  %v4982_v39 = vadd.f32 %v4981_v38, %v4951_v44  ;;  %v7147_v47 = vadd.f32 %v9775_v26, %v4507_v42 }
 0x570   :  { %v4658_v57 = vmax.f32 %v7146_v46, 0.0 }
 0x571   :  { %v4983_v19 = vadd.f32 %v4982_v39, %v4952_v15  ;;  %v4657_v22 = vmax.f32 %v7147_v47, 0.0  ;;  %v4914_v51 = vadd.f32 %v4913_v34, %v4656_v16  ;;  %v6675_v55 = vpop.f32.mrb[42].mxu0 }
 0x572   :  { %4690 = vst [vmem:[%s9916_s5 + $0x48] sm:$0xff] %v4658_v57  ;;  %v7148_v56 = vadd.f32 %v6675_v55, %v9775_v26  ;;  %v4519_v0 = vpop.f32.mrb[43].mxu0  ;;  %v4955_v24 = vmul.f32 %v4658_v57, %v4658_v57 }
 0x573   :  { %4689 = vst [vmem:[%s9916_s5 + $0x40] sm:$0xff] %v4657_v22  ;;  %v4915_v8 = vadd.f32 %v4914_v51, %v4657_v22  ;;  %v4954_v50 = vmul.f32 %v4657_v22, %v4657_v22  ;;  %v4984_v53 = vadd.f32 %v4983_v19, %v4953_v32  ;;  %v7149_v60 = vadd.f32 %v9775_v26, %v4519_v0 }
 0x574   :  { %v4660_v2 = vmax.f32 %v7148_v56, 0.0 }
 0x575   :  { %v4985_v17 = vadd.f32 %v4984_v53, %v4954_v50  ;;  %v4659_v63 = vmax.f32 %v7149_v60, 0.0  ;;  %v4916_v30 = vadd.f32 %v4915_v8, %v4658_v57  ;;  %v6678_v35 = vpop.f32.mrb[44].mxu0 }
 0x576   :  { %4692 = vst [vmem:[%s9916_s5 + $0x58] sm:$0xff] %v4660_v2  ;;  %v7150_v43 = vadd.f32 %v6678_v35, %v9775_v26  ;;  %v4531_v29 = vpop.f32.mrb[45].mxu0  ;;  %v4957_v5 = vmul.f32 %v4660_v2, %v4660_v2 }
 0x577   :  { %4691 = vst [vmem:[%s9916_s5 + $0x50] sm:$0xff] %v4659_v63  ;;  %v4917_v33 = vadd.f32 %v4916_v30, %v4659_v63  ;;  %v4956_v41 = vmul.f32 %v4659_v63, %v4659_v63  ;;  %v4986_v25 = vadd.f32 %v4985_v17, %v4955_v24  ;;  %v7151_v1 = vadd.f32 %v9775_v26, %v4531_v29 }
 0x578   :  { %v4662_v31 = vmax.f32 %v7150_v43, 0.0 }
 0x579   :  { %v4987_v28 = vadd.f32 %v4986_v25, %v4956_v41  ;;  %v4661_v18 = vmax.f32 %v7151_v1, 0.0  ;;  %v4918_v45 = vadd.f32 %v4917_v33, %v4660_v2  ;;  %v6681_v40 = vpop.f32.mrb[46].mxu0 }
 0x57a   :  { %4694 = vst [vmem:[%s9916_s5 + $0x68] sm:$0xff] %v4662_v31  ;;  %v7152_v21 = vadd.f32 %v6681_v40, %v9775_v26  ;;  %v4543_v11 = vpop.f32.mrb[47].mxu0  ;;  %v4959_v58 = vmul.f32 %v4662_v31, %v4662_v31 }
 0x57b   :  { %4693 = vst [vmem:[%s9916_s5 + $0x60] sm:$0xff] %v4661_v18  ;;  %v4919_v61 = vadd.f32 %v4918_v45, %v4661_v18  ;;  %v4958_v62 = vmul.f32 %v4661_v18, %v4661_v18  ;;  %v4988_v48 = vadd.f32 %v4987_v28, %v4957_v5  ;;  %v7153_v13 = vadd.f32 %v9775_v26, %v4543_v11 }
 0x57c   :  { %v4664_v54 = vmax.f32 %v7152_v21, 0.0 }
 0x57d   :  { %v4989_v36 = vadd.f32 %v4988_v48, %v4958_v62  ;;  %v4663_v14 = vmax.f32 %v7153_v13, 0.0  ;;  %v4920_v3 = vadd.f32 %v4919_v61, %v4662_v31  ;;  %v6684_v37 = vpop.f32.mrb[48].mxu0 }
 0x57e   :  { %4696 = vst [vmem:[%s9916_s5 + $0x78] sm:$0xff] %v4664_v54  ;;  %v7154_v12 = vadd.f32 %v6684_v37, %v9775_v26  ;;  %v4555_v20 = vpop.f32.mrb[49].mxu0  ;;  %v4961_v27 = vmul.f32 %v4664_v54, %v4664_v54 }
 0x57f   :  { %4695 = vst [vmem:[%s9916_s5 + $0x70] sm:$0xff] %v4663_v14  ;;  %v4921_v9 = vadd.f32 %v4920_v3, %v4663_v14  ;;  %v4960_v23 = vmul.f32 %v4663_v14, %v4663_v14  ;;  %v4990_v10 = vadd.f32 %v4989_v36, %v4959_v58  ;;  %v7155_v59 = vadd.f32 %v9775_v26, %v4555_v20 }
 0x580   :  { %v4666_v4 = vmax.f32 %v7154_v12, 0.0 }
 0x581   :  { %v4991_v7 = vadd.f32 %v4990_v10, %v4960_v23  ;;  %v4665_v16 = vmax.f32 %v7155_v59, 0.0  ;;  %v4922_v44 = vadd.f32 %v4921_v9, %v4664_v54  ;;  %v6687_v38 = vpop.f32.mrb[50].mxu0 }
 0x582   :  { %4698 = vst [vmem:[%s9916_s5 + $0x88] sm:$0xff] %v4666_v4  ;;  %v7156_v49 = vadd.f32 %v6687_v38, %v9775_v26  ;;  %v4567_v52 = vpop.f32.mrb[51].mxu0  ;;  %v4963_v39 = vmul.f32 %v4666_v4, %v4666_v4 }
 0x583   :  { %4697 = vst [vmem:[%s9916_s5 + $0x80] sm:$0xff] %v4665_v16  ;;  %v4923_v6 = vadd.f32 %v4922_v44, %v4665_v16  ;;  %v4962_v46 = vmul.f32 %v4665_v16, %v4665_v16  ;;  %v4992_v42 = vadd.f32 %v4991_v7, %v4961_v27  ;;  %v7157_v34 = vadd.f32 %v9775_v26, %v4567_v52 }
 0x584   :  { %v4668_v15 = vmax.f32 %v7156_v49, 0.0 }
 0x585   :  { %v4993_v47 = vadd.f32 %v4992_v42, %v4962_v46  ;;  %v4667_v57 = vmax.f32 %v7157_v34, 0.0  ;;  %v4924_v32 = vadd.f32 %v4923_v6, %v4666_v4  ;;  %v6690_v19 = vpop.f32.mrb[52].mxu0 }
 0x586   :  { %4700 = vst [vmem:[%s9916_s5 + $0x98] sm:$0xff] %v4668_v15  ;;  %v7158_v22 = vadd.f32 %v6690_v19, %v9775_v26  ;;  %v4579_v51 = vpop.f32.mrb[53].mxu0  ;;  %v4965_v53 = vmul.f32 %v4668_v15, %v4668_v15 }
 0x587   :  { %4699 = vst [vmem:[%s9916_s5 + $0x90] sm:$0xff] %v4667_v57  ;;  %v4925_v55 = vadd.f32 %v4924_v32, %v4667_v57  ;;  %v4964_v56 = vmul.f32 %v4667_v57, %v4667_v57  ;;  %v4994_v0 = vadd.f32 %v4993_v47, %v4963_v39  ;;  %v7159_v8 = vadd.f32 %v9775_v26, %v4579_v51 }
 0x588   :  { %v4670_v50 = vmax.f32 %v7158_v22, 0.0 }
 0x589   :  { %v4995_v60 = vadd.f32 %v4994_v0, %v4964_v56  ;;  %v4669_v2 = vmax.f32 %v7159_v8, 0.0  ;;  %v4926_v24 = vadd.f32 %v4925_v55, %v4668_v15  ;;  %v6693_v17 = vpop.f32.mrb[54].mxu0 }
 0x58a   :  { %4702 = vst [vmem:[%s9916_s5 + $0xa8] sm:$0xff] %v4670_v50  ;;  %v7160_v63 = vadd.f32 %v6693_v17, %v9775_v26  ;;  %v4591_v30 = vpop.f32.mrb[55].mxu0  ;;  %v4967_v25 = vmul.f32 %v4670_v50, %v4670_v50 }
 0x58b   :  { %4701 = vst [vmem:[%s9916_s5 + $0xa0] sm:$0xff] %v4669_v2  ;;  %v4927_v35 = vadd.f32 %v4926_v24, %v4669_v2  ;;  %v4966_v43 = vmul.f32 %v4669_v2, %v4669_v2  ;;  %v4996_v29 = vadd.f32 %v4995_v60, %v4965_v53  ;;  %v7161_v33 = vadd.f32 %v9775_v26, %v4591_v30 }
 0x58c   :  { %v4672_v41 = vmax.f32 %v7160_v63, 0.0 }
 0x58d   :  { %v4997_v1 = vadd.f32 %v4996_v29, %v4966_v43  ;;  %v4671_v31 = vmax.f32 %v7161_v33, 0.0  ;;  %v4928_v5 = vadd.f32 %v4927_v35, %v4670_v50  ;;  %v6696_v28 = vpop.f32.mrb[56].mxu0 }
 0x58e   :  { %4704 = vst [vmem:[%s9916_s5 + $0xb8] sm:$0xff] %v4672_v41  ;;  %v7162_v18 = vadd.f32 %v6696_v28, %v9775_v26  ;;  %v4603_v45 = vpop.f32.mrb[57].mxu0  ;;  %v4969_v48 = vmul.f32 %v4672_v41, %v4672_v41 }
 0x58f   :  { %4703 = vst [vmem:[%s9916_s5 + $0xb0] sm:$0xff] %v4671_v31  ;;  %v4929_v40 = vadd.f32 %v4928_v5, %v4671_v31  ;;  %v4968_v21 = vmul.f32 %v4671_v31, %v4671_v31  ;;  %v4998_v11 = vadd.f32 %v4997_v1, %v4967_v25  ;;  %v7163_v61 = vadd.f32 %v9775_v26, %v4603_v45 }
 0x590   :  { %v4674_v62 = vmax.f32 %v7162_v18, 0.0 }
 0x591   :  { %v4999_v13 = vadd.f32 %v4998_v11, %v4968_v21  ;;  %v4673_v54 = vmax.f32 %v7163_v61, 0.0  ;;  %v4930_v58 = vadd.f32 %v4929_v40, %v4672_v41  ;;  %v6699_v36 = vpop.f32.mrb[58].mxu0 }
 0x592   :  { %4706 = vst [vmem:[%s9916_s5 + $0xc8] sm:$0xff] %v4674_v62  ;;  %v7164_v14 = vadd.f32 %v6699_v36, %v9775_v26  ;;  %v4615_v3 = vpop.f32.mrb[59].mxu0 }
 0x593   :  { %4705 = vst [vmem:[%s9916_s5 + $0xc0] sm:$0xff] %v4673_v54  ;;  %v4931_v37 = vadd.f32 %v4930_v58, %v4673_v54  ;;  %v4970_v12 = vmul.f32 %v4673_v54, %v4673_v54  ;;  %v5000_v20 = vadd.f32 %v4999_v13, %v4969_v48  ;;  %v7165_v9 = vadd.f32 %v9775_v26, %v4615_v3 }
 0x594   :  { %v4676_v23 = vmax.f32 %v7164_v14, 0.0 }
 0x595   :  { %v4939_v10 = vrot.slane %v4931_v37, 4  ;;  %v5001_v59 = vadd.f32 %v5000_v20, %v4970_v12  ;;  %v4675_v4 = vmax.f32 %v7165_v9, 0.0  ;;  %v6702_v27 = vpop.f32.mrb[60].mxu0 }
 0x596   :  { %4708 = vst [vmem:[%s9916_s5 + $0xd8] sm:$0xff] %v4676_v23  ;;  %v7166_v7 = vadd.f32 %v6702_v27, %v9775_v26  ;;  %v4627_v16 = vpop.f32.mrb[61].mxu0 }
 0x597   :  { %v4940_v44 = vadd.f32 %v4939_v10, %v4931_v37  ;;  %v5009_v38 = vrot.slane %v5001_v59, 4  ;;  %4707 = vst [vmem:[%s9916_s5 + $0xd0] sm:$0xff] %v4675_v4  ;;  %v7167_v49 = vadd.f32 %v9775_v26, %v4627_v16 }
 0x598   :  { %v4678_v52 = vmax.f32 %v7166_v7, 0.0 }
 0x599   :  { %v4941_v6 = vrot.slane %v4940_v44, 2  ;;  %v5010_v46 = vadd.f32 %v5009_v38, %v5001_v59  ;;  %v4677_v42 = vmax.f32 %v7167_v49, 0.0  ;;  %v6705_v34 = vpop.f32.mrb[62].mxu0 }
 0x59a   :  { %4710 = vst [vmem:[%s9916_s5 + $0xe8] sm:$0xff] %v4678_v52  ;;  %v7168_v15 = vadd.f32 %v6705_v34, %v9775_v26  ;;  %v4639_v39 = vpop.f32.mrb[63].mxu0 }
 0x59b   :  { %v4942_v47 = vadd.f32 %v4941_v6, %v4940_v44  ;;  %v5011_v57 = vrot.slane %v5010_v46, 2  ;;  %4709 = vst [vmem:[%s9916_s5 + $0xe0] sm:$0xff] %v4677_v42  ;;  %v7169_v32 = vadd.f32 %v9775_v26, %v4639_v39 }
 0x59c   :  { %v4680_v19 = vmax.f32 %v7168_v15, 0.0 }
 0x59d   :  { %v4943_v22 = vrot.slane %v4942_v47, 1  ;;  %v5012_v51 = vadd.f32 %v5011_v57, %v5010_v46  ;;  %v4679_v55 = vmax.f32 %v7169_v32, 0.0 }
 0x59e   :  { %4712 = vst [vmem:[%s9916_s5 + $0xf8] sm:$0xff] %v4680_v19 }
 0x59f   :  { %v4944_v56 = vadd.f32 %v4943_v22, %v4942_v47  ;;  %v5013_v0 = vrot.slane %v5012_v51, 1  ;;  %4711 = vst [vmem:[%s9916_s5 + $0xf0] sm:$0xff] %v4679_v55 }
 0x5a1   :  { %4945 = vst [vmem:[%s9917_s6] sm:$0x1] %v4944_v56  ;;  %v5014_v8 = vadd.f32 %v5013_v0, %v5012_v51 }
 0x5a3   :  { %5015 = vst [vmem:[%s9917_s6 + $0x1] sm:$0x1] %v5014_v8 }

</bundles_post_ra>
